<compile_context>
chip_gen: v7x
topology: tpu7x:2x2x1
jax: 0.10.0
libtpu: 0.0.40
codegen_flags: <defaults>
</compile_context>

<pallas_src>
import jax
import jax.numpy as jnp
from jax.experimental import pallas as pl
from jax.experimental.pallas import tpu as pltpu

IN_FEATURES = 50 * 150      # 7500, from nn.Linear(50*150, 1024)
H1, H2, H3 = 1024, 512, 256
NUM_CLASSES = 2             # regression=False branch
LANE = 128
SUBLANE_BF16 = 16           # bf16 sublane tile
BN_EPS = 1e-5

TK = 1024                   # layer-1 contraction tile
KP = 8 * TK                 # 7500 padded to 8192
BP = SUBLANE_BF16           # padded batch rows
CP = LANE                   # lane-dense logits slab width


def _round_up(x, m):
    return (x + m - 1) // m * m


# ----------------------------- Pallas kernel -----------------------------

def _dnn_fused_kernel(x_ref, w1_ref, b1_ref, w2_ref, b2_ref,
                      w3_ref, b3_ref, w4_ref, b4_ref,
                      o_ref, acc_ref):
    """K-pipelined layer-1 matmul; layers 2-4 run on the last grid step."""
    k = pl.program_id(0)

    @pl.when(k == 0)
    def _():
        acc_ref[...] = jnp.zeros_like(acc_ref)

    # layer 1 partial: [BP, TK] @ [TK, H1] accumulated in f32
    acc_ref[...] += jnp.dot(x_ref[...], w1_ref[...],
                            preferred_element_type=jnp.float32)

    @pl.when(k == pl.num_programs(0) - 1)
    def _():
        # layer 1 epilogue (bias + ReLU); BN1 is folded into w2/b2
        h = jnp.maximum(acc_ref[...] + b1_ref[...], 0.0)
        # layer 2: 1024 -> 512  (BN2 folded into w3/b3)
        h = jnp.maximum(
            jnp.dot(h.astype(jnp.bfloat16), w2_ref[...],
                    preferred_element_type=jnp.float32) + b2_ref[...], 0.0)
        # layer 3: 512 -> 256   (BN3 folded into w4/b4)
        h = jnp.maximum(
            jnp.dot(h.astype(jnp.bfloat16), w3_ref[...],
                    preferred_element_type=jnp.float32) + b3_ref[...], 0.0)
        # layer 4 (logits), lane-padded to 128 columns for unmasked stores
        o_ref[...] = jnp.dot(h.astype(jnp.bfloat16), w4_ref[...],
                             preferred_element_type=jnp.float32) + b4_ref[...]


# ----------------------------- one-time param prep -----------------------------

def _bn_scale_shift(bn):
    """Eval-mode BatchNorm1d -> per-feature (scale, shift)."""
    s = bn['gamma'] / jnp.sqrt(bn['var'] + BN_EPS)
    t = bn['beta'] - bn['mean'] * s
    return s, t


def prepare_params(params):
    """Fold BN into next-layer weights, pad & cast to bf16. Run ONCE."""
    s1, t1 = _bn_scale_shift(params['bn1'])
    s2, t2 = _bn_scale_shift(params['bn2'])
    s3, t3 = _bn_scale_shift(params['bn3'])

    # BN_i folded into layer i+1:  a_i @ W = h_i @ (s_i * W) + t_i @ W
    w2f = s1[:, None] * params['w2']
    b2f = params['b2'] + t1 @ params['w2']
    w3f = s2[:, None] * params['w3']
    b3f = params['b3'] + t2 @ params['w3']
    w4f = s3[:, None] * params['w4']
    b4f = params['b4'] + t3 @ params['w4']

    # pad w1 along K (zeros contribute nothing), w4/b4 along lanes
    w1_p = jnp.zeros((KP, H1), jnp.float32).at[:IN_FEATURES, :].set(params['w1'])
    w4_p = jnp.zeros((H3, CP), jnp.float32).at[:, :NUM_CLASSES].set(w4f)
    b4_p = jnp.zeros((1, CP), jnp.float32).at[:, :NUM_CLASSES].set(b4f)

    return dict(
        w1=w1_p.astype(jnp.bfloat16),
        b1=params['b1'].reshape(1, -1).astype(jnp.float32),
        w2=w2f.astype(jnp.bfloat16),
        b2=b2f.reshape(1, -1).astype(jnp.float32),
        w3=w3f.astype(jnp.bfloat16),
        b3=b3f.reshape(1, -1).astype(jnp.float32),
        w4=w4_p.astype(jnp.bfloat16),
        b4=b4_p,
    )


# ----------------------------- forward wrapper -----------------------------

def _dnn_forward(feature, pp):
    B = feature.shape[0]
    assert B <= BP, "increase BP (padded batch) for larger batches"
    x = feature.reshape(B, -1).astype(jnp.bfloat16)           # [B, 7500]

    # tiny per-call pad of the activation slab (zeros in padded rows/cols)
    x_p = jnp.zeros((BP, KP), jnp.bfloat16).at[:B, :IN_FEATURES].set(x)

    def full2d(shape):
        return pl.BlockSpec(shape, lambda k: (0, 0))

    out_p = pl.pallas_call(
        _dnn_fused_kernel,
        out_shape=jax.ShapeDtypeStruct((BP, CP), jnp.float32),
        grid_spec=pltpu.PrefetchScalarGridSpec(
            num_scalar_prefetch=0,
            grid=(KP // TK,),
            in_specs=[
                pl.BlockSpec((BP, TK), lambda k: (0, k)),      # x, K-tiled
                pl.BlockSpec((TK, H1), lambda k: (k, 0)),      # w1, K-tiled
                full2d((1, H1)),                               # b1
                full2d((H1, H2)),                              # w2 (BN1-folded)
                full2d((1, H2)),                               # b2
                full2d((H2, H3)),                              # w3 (BN2-folded)
                full2d((1, H3)),                               # b3
                full2d((H3, CP)),                              # w4 (BN3-folded, padded)
                full2d((1, CP)),                               # b4
            ],
            out_specs=pl.BlockSpec((BP, CP), lambda k: (0, 0)),
            scratch_shapes=[pltpu.VMEM((BP, H1), jnp.float32)],
        ),
        compiler_params=pltpu.CompilerParams(
            dimension_semantics=("arbitrary",)),
    )(x_p, pp['w1'], pp['b1'], pp['w2'], pp['b2'],
      pp['w3'], pp['b3'], pp['w4'], pp['b4'])

    return out_p[:B, :NUM_CLASSES]


dnn_forward = jax.jit(_dnn_forward)


# ----------------------------- parameter init -----------------------------

def init_params(key):
    ks = jax.random.split(key, 20)

    def lin(kw, kb, fan_in, fan_out):
        bnd = 1.0 / (fan_in ** 0.5)
        w = jax.random.uniform(kw, (fan_in, fan_out), jnp.float32, -bnd, bnd)
        b = jax.random.uniform(kb, (fan_out,), jnp.float32, -bnd, bnd)
        return w, b

    def bn(kg, kb, km, kv, n):
        return dict(
            gamma=jax.random.uniform(kg, (n,), jnp.float32, 0.5, 1.5),
            beta=0.1 * jax.random.normal(kb, (n,), jnp.float32),
            mean=0.1 * jax.random.normal(km, (n,), jnp.float32),
            var=jax.random.uniform(kv, (n,), jnp.float32, 0.5, 1.5),
        )

    w1, b1 = lin(ks[0], ks[1], IN_FEATURES, H1)
    w2, b2 = lin(ks[2], ks[3], H1, H2)
    w3, b3 = lin(ks[4], ks[5], H2, H3)
    w4, b4 = lin(ks[6], ks[7], H3, NUM_CLASSES)
    return dict(
        w1=w1, b1=b1, w2=w2, b2=b2, w3=w3, b3=b3, w4=w4, b4=b4,
        bn1=bn(ks[8], ks[9], ks[10], ks[11], H1),
        bn2=bn(ks[12], ks[13], ks[14], ks[15], H2),
        bn3=bn(ks[16], ks[17], ks[18], ks[19], H3),
    )


# ----------------------------- pure-JAX reference -----------------------------

def reference_forward(feature, params):
    x = feature.reshape(feature.shape[0], -1).astype(jnp.float32)

    def bn(h, p):
        return p['gamma'] * (h - p['mean']) / jnp.sqrt(p['var'] + BN_EPS) + p['beta']

    hp = jax.lax.Precision.HIGHEST
    h = bn(jax.nn.relu(jnp.dot(x, params['w1'], precision=hp) + params['b1']), params['bn1'])
    h = bn(jax.nn.relu(jnp.dot(h, params['w2'], precision=hp) + params['b2']), params['bn2'])
    h = bn(jax.nn.relu(jnp.dot(h, params['w3'], precision=hp) + params['b3']), params['bn3'])
    return jnp.dot(h, params['w4'], precision=hp) + params['b4']


# ----------------------------- main -----------------------------

if __name__ == "__main__":
    key = jax.random.PRNGKey(0)
    kp, kx = jax.random.split(key, 2)

    batch = 2
    params = init_params(kp)
    feature = jax.random.normal(kx, (batch, 50, 150), jnp.float32)

    # one-time weight prep (BN fold, pad, bf16 cast) outside the hot path
    prepped = jax.tree_util.tree_map(jax.block_until_ready, prepare_params(params))

    logits = jax.block_until_ready(dnn_forward(feature, prepped))
    ref = jax.block_until_ready(reference_forward(feature, params))

    assert logits.shape == (batch, NUM_CLASSES)
    assert bool(jnp.all(jnp.isfinite(logits)))
    assert bool(jnp.allclose(logits, ref, atol=3e-2, rtol=3e-2)), (
        f"max abs err {float(jnp.max(jnp.abs(logits - ref)))}")

    print("KERNEL_OK")
</pallas_src>

<mosaic_0001>
module attributes {stable_mosaic.version = 11 : i64} {
  func.func @_dnn_fused_kernel(%arg0: i32, %arg1: memref<16x1024xbf16, #tpu.memory_space<vmem>>, %arg2: memref<1024x1024xbf16, #tpu.memory_space<vmem>>, %arg3: memref<1x1024xf32, #tpu.memory_space<vmem>>, %arg4: memref<1024x512xbf16, #tpu.memory_space<vmem>>, %arg5: memref<1x512xf32, #tpu.memory_space<vmem>>, %arg6: memref<512x256xbf16, #tpu.memory_space<vmem>>, %arg7: memref<1x256xf32, #tpu.memory_space<vmem>>, %arg8: memref<256x128xbf16, #tpu.memory_space<vmem>>, %arg9: memref<1x128xf32, #tpu.memory_space<vmem>>, %arg10: memref<16x128xf32, #tpu.memory_space<vmem>>, %arg11: memref<16x1024xf32, #tpu.memory_space<vmem>>) attributes {dimension_semantics = [#tpu.dimension_semantics<arbitrary>], iteration_bounds = array<i64: 8>, scalar_prefetch = 0 : i64, scratch_operands = 1 : i64, tpu.core_type = #tpu.core_type<tc>, window_params = [{transform_indices = @transform_0, window_bounds = array<i64: 16, 1024>}, {transform_indices = @transform_1, window_bounds = array<i64: 1024, 1024>}, {pipeline_mode = #tpu.pipeline_mode<synchronous>, transform_indices = @transform_2, window_bounds = array<i64: 1, 1024>}, {pipeline_mode = #tpu.pipeline_mode<synchronous>, transform_indices = @transform_3, window_bounds = array<i64: 1024, 512>}, {pipeline_mode = #tpu.pipeline_mode<synchronous>, transform_indices = @transform_4, window_bounds = array<i64: 1, 512>}, {pipeline_mode = #tpu.pipeline_mode<synchronous>, transform_indices = @transform_5, window_bounds = array<i64: 512, 256>}, {pipeline_mode = #tpu.pipeline_mode<synchronous>, transform_indices = @transform_6, window_bounds = array<i64: 1, 256>}, {pipeline_mode = #tpu.pipeline_mode<synchronous>, transform_indices = @transform_7, window_bounds = array<i64: 256, 128>}, {pipeline_mode = #tpu.pipeline_mode<synchronous>, transform_indices = @transform_8, window_bounds = array<i64: 1, 128>}, {pipeline_mode = #tpu.pipeline_mode<synchronous>, transform_indices = @transform_9, window_bounds = array<i64: 16, 128>}]} {
    %c0_i32 = arith.constant 0 : i32
    %0 = arith.cmpi eq, %arg0, %c0_i32 : i32
    %1 = arith.extui %0 : i1 to i32
    %c0_i32_0 = arith.constant 0 : i32
    %2 = arith.cmpi ne, %1, %c0_i32_0 : i32
    scf.if %2 {
      %cst_9 = arith.constant 0.000000e+00 : f32
      %12 = vector.broadcast %cst_9 : f32 to vector<16x1024xf32>
      %c0_10 = arith.constant 0 : index
      %c0_11 = arith.constant 0 : index
      %13 = vector.load %arg11[%c0_10, %c0_11] : memref<16x1024xf32, #tpu.memory_space<vmem>>, vector<16x1024xf32>
      tpu.vector_store %arg11[%c0_10, %c0_11], %12 {strides = array<i32>} : memref<16x1024xf32, #tpu.memory_space<vmem>>, vector<16x1024xf32>,
    } else {
    }
    %c0 = arith.constant 0 : index
    %c0_1 = arith.constant 0 : index
    %3 = vector.load %arg11[%c0, %c0_1] : memref<16x1024xf32, #tpu.memory_space<vmem>>, vector<16x1024xf32>
    %c0_2 = arith.constant 0 : index
    %c0_3 = arith.constant 0 : index
    %4 = vector.load %arg1[%c0_2, %c0_3] : memref<16x1024xbf16, #tpu.memory_space<vmem>>, vector<16x1024xbf16>
    %c0_4 = arith.constant 0 : index
    %c0_5 = arith.constant 0 : index
    %5 = vector.load %arg2[%c0_4, %c0_5] : memref<1024x1024xbf16, #tpu.memory_space<vmem>>, vector<1024x1024xbf16>
    %cst = arith.constant dense<0.000000e+00> : vector<16x1024xf32>
    %6 = tpu.matmul %4, %5, %cst {dimension_numbers = #tpu.dot_dimension_numbers<[1], [0], [0], [1], [0, 0, 1, 1], [], []>} : vector<16x1024xbf16>, vector<1024x1024xbf16>, vector<16x1024xf32> -> vector<16x1024xf32>
    %7 = arith.addf %3, %6 : vector<16x1024xf32>
    %c0_6 = arith.constant 0 : index
    %c0_7 = arith.constant 0 : index
    %8 = vector.load %arg11[%c0_6, %c0_7] : memref<16x1024xf32, #tpu.memory_space<vmem>>, vector<16x1024xf32>
    tpu.vector_store %arg11[%c0_6, %c0_7], %7 {strides = array<i32>} : memref<16x1024xf32, #tpu.memory_space<vmem>>, vector<16x1024xf32>,
    %c7_i32 = arith.constant 7 : i32
    %9 = arith.cmpi eq, %arg0, %c7_i32 : i32
    %10 = arith.extui %9 : i1 to i32
    %c0_i32_8 = arith.constant 0 : i32
    %11 = arith.cmpi ne, %10, %c0_i32_8 : i32
    scf.if %11 {
      %c0_9 = arith.constant 0 : index
      %c0_10 = arith.constant 0 : index
      %12 = vector.load %arg11[%c0_9, %c0_10] : memref<16x1024xf32, #tpu.memory_space<vmem>>, vector<16x1024xf32>
      %c0_11 = arith.constant 0 : index
      %c0_12 = arith.constant 0 : index
      %13 = vector.load %arg3[%c0_11, %c0_12] : memref<1x1024xf32, #tpu.memory_space<vmem>>, vector<1x1024xf32>
      %14 = vector.broadcast %13 : vector<1x1024xf32> to vector<16x1024xf32>
      %15 = arith.addf %12, %14 : vector<16x1024xf32>
      %cst_13 = arith.constant 0.000000e+00 : f32
      %16 = vector.broadcast %cst_13 : f32 to vector<16x1024xf32>
      %17 = arith.maximumf %15, %16 : vector<16x1024xf32>
      %18 = arith.truncf %17 : vector<16x1024xf32> to vector<16x1024xbf16>
      %c0_14 = arith.constant 0 : index
      %c0_15 = arith.constant 0 : index
      %19 = vector.load %arg4[%c0_14, %c0_15] : memref<1024x512xbf16, #tpu.memory_space<vmem>>, vector<1024x512xbf16>
      %cst_16 = arith.constant dense<0.000000e+00> : vector<16x512xf32>
      %20 = tpu.matmul %18, %19, %cst_16 {dimension_numbers = #tpu.dot_dimension_numbers<[1], [0], [0], [1], [0, 0, 1, 1], [], []>} : vector<16x1024xbf16>, vector<1024x512xbf16>, vector<16x512xf32> -> vector<16x512xf32>
      %c0_17 = arith.constant 0 : index
      %c0_18 = arith.constant 0 : index
      %21 = vector.load %arg5[%c0_17, %c0_18] : memref<1x512xf32, #tpu.memory_space<vmem>>, vector<1x512xf32>
      %22 = vector.broadcast %21 : vector<1x512xf32> to vector<16x512xf32>
      %23 = arith.addf %20, %22 : vector<16x512xf32>
      %cst_19 = arith.constant 0.000000e+00 : f32
      %24 = vector.broadcast %cst_19 : f32 to vector<16x512xf32>
      %25 = arith.maximumf %23, %24 : vector<16x512xf32>
      %26 = arith.truncf %25 : vector<16x512xf32> to vector<16x512xbf16>
      %c0_20 = arith.constant 0 : index
      %c0_21 = arith.constant 0 : index
      %27 = vector.load %arg6[%c0_20, %c0_21] : memref<512x256xbf16, #tpu.memory_space<vmem>>, vector<512x256xbf16>
      %cst_22 = arith.constant dense<0.000000e+00> : vector<16x256xf32>
      %28 = tpu.matmul %26, %27, %cst_22 {dimension_numbers = #tpu.dot_dimension_numbers<[1], [0], [0], [1], [0, 0, 1, 1], [], []>} : vector<16x512xbf16>, vector<512x256xbf16>, vector<16x256xf32> -> vector<16x256xf32>
      %c0_23 = arith.constant 0 : index
      %c0_24 = arith.constant 0 : index
      %29 = vector.load %arg7[%c0_23, %c0_24] : memref<1x256xf32, #tpu.memory_space<vmem>>, vector<1x256xf32>
      %30 = vector.broadcast %29 : vector<1x256xf32> to vector<16x256xf32>
      %31 = arith.addf %28, %30 : vector<16x256xf32>
      %cst_25 = arith.constant 0.000000e+00 : f32
      %32 = vector.broadcast %cst_25 : f32 to vector<16x256xf32>
      %33 = arith.maximumf %31, %32 : vector<16x256xf32>
      %34 = arith.truncf %33 : vector<16x256xf32> to vector<16x256xbf16>
      %c0_26 = arith.constant 0 : index
      %c0_27 = arith.constant 0 : index
      %35 = vector.load %arg8[%c0_26, %c0_27] : memref<256x128xbf16, #tpu.memory_space<vmem>>, vector<256x128xbf16>
      %cst_28 = arith.constant dense<0.000000e+00> : vector<16x128xf32>
      %36 = tpu.matmul %34, %35, %cst_28 {dimension_numbers = #tpu.dot_dimension_numbers<[1], [0], [0], [1], [0, 0, 1, 1], [], []>} : vector<16x256xbf16>, vector<256x128xbf16>, vector<16x128xf32> -> vector<16x128xf32>
      %c0_29 = arith.constant 0 : index
      %c0_30 = arith.constant 0 : index
      %37 = vector.load %arg9[%c0_29, %c0_30] : memref<1x128xf32, #tpu.memory_space<vmem>>, vector<1x128xf32>
      %38 = vector.broadcast %37 : vector<1x128xf32> to vector<16x128xf32>
      %39 = arith.addf %36, %38 : vector<16x128xf32>
      %c0_31 = arith.constant 0 : index
      %c0_32 = arith.constant 0 : index
      %40 = vector.load %arg10[%c0_31, %c0_32] : memref<16x128xf32, #tpu.memory_space<vmem>>, vector<16x128xf32>
      tpu.vector_store %arg10[%c0_31, %c0_32], %39 {strides = array<i32>} : memref<16x128xf32, #tpu.memory_space<vmem>>, vector<16x128xf32>,
    } else {
    }
    return
  }
  func.func @transform_0(%arg0: i32) -> (i32, i32) {
    %c0_i32 = arith.constant 0 : i32
    %c0_i32_0 = arith.constant 0 : i32
    return %c0_i32, %arg0 : i32, i32
  }
  func.func @transform_1(%arg0: i32) -> (i32, i32) {
    %c0_i32 = arith.constant 0 : i32
    %c0_i32_0 = arith.constant 0 : i32
    return %arg0, %c0_i32 : i32, i32
  }
  func.func @transform_2(%arg0: i32) -> (i32, i32) {
    %c0_i32 = arith.constant 0 : i32
    %c0_i32_0 = arith.constant 0 : i32
    %c0_i32_1 = arith.constant 0 : i32
    return %c0_i32, %c0_i32_0 : i32, i32
  }
  func.func @transform_3(%arg0: i32) -> (i32, i32) {
    %c0_i32 = arith.constant 0 : i32
    %c0_i32_0 = arith.constant 0 : i32
    %c0_i32_1 = arith.constant 0 : i32
    return %c0_i32, %c0_i32_0 : i32, i32
  }
  func.func @transform_4(%arg0: i32) -> (i32, i32) {
    %c0_i32 = arith.constant 0 : i32
    %c0_i32_0 = arith.constant 0 : i32
    %c0_i32_1 = arith.constant 0 : i32
    return %c0_i32, %c0_i32_0 : i32, i32
  }
  func.func @transform_5(%arg0: i32) -> (i32, i32) {
    %c0_i32 = arith.constant 0 : i32
    %c0_i32_0 = arith.constant 0 : i32
    %c0_i32_1 = arith.constant 0 : i32
    return %c0_i32, %c0_i32_0 : i32, i32
  }
  func.func @transform_6(%arg0: i32) -> (i32, i32) {
    %c0_i32 = arith.constant 0 : i32
    %c0_i32_0 = arith.constant 0 : i32
    %c0_i32_1 = arith.constant 0 : i32
    return %c0_i32, %c0_i32_0 : i32, i32
  }
  func.func @transform_7(%arg0: i32) -> (i32, i32) {
    %c0_i32 = arith.constant 0 : i32
    %c0_i32_0 = arith.constant 0 : i32
    %c0_i32_1 = arith.constant 0 : i32
    return %c0_i32, %c0_i32_0 : i32, i32
  }
  func.func @transform_8(%arg0: i32) -> (i32, i32) {
    %c0_i32 = arith.constant 0 : i32
    %c0_i32_0 = arith.constant 0 : i32
    %c0_i32_1 = arith.constant 0 : i32
    return %c0_i32, %c0_i32_0 : i32, i32
  }
  func.func @transform_9(%arg0: i32) -> (i32, i32) {
    %c0_i32 = arith.constant 0 : i32
    %c0_i32_0 = arith.constant 0 : i32
    %c0_i32_1 = arith.constant 0 : i32
    return %c0_i32, %c0_i32_0 : i32, i32
  }
}

</mosaic_0001>

<bundles_post_ra>
// kernel: _dnn_forward.1
= control target key start
LH: loop header
LB: loop body
LE: loop exit
PB: predicated region body
PF: predicated region fallthrough
CT: control target
= control target key end

     0   :  { %s10110_s0 = inlined_call_operand.vmem [shape: bf16[16,8192], index: 0, kind: input, shape index: {}]   ;;  %s10111_s1 = inlined_call_operand.hbm [shape: bf16[8192,1024], index: 1, kind: input, shape index: {}]   ;;  %s10112_s2 = inlined_call_operand.hbm [shape: f32[1,1024], index: 2, kind: input, shape index: {}]   ;;  %s10113_s3 = inlined_call_operand.hbm [shape: bf16[1024,512], index: 3, kind: input, shape index: {}]   ;;  %s10114_s4 = inlined_call_operand.hbm [shape: f32[1,512], index: 4, kind: input, shape index: {}]   ;;  %s10115_s5 = inlined_call_operand.hbm [shape: bf16[512,256], index: 5, kind: input, shape index: {}]   ;;  %s10116_s6 = inlined_call_operand.hbm [shape: f32[1,256], index: 6, kind: input, shape index: {}]   ;;  %s10117_s7 = inlined_call_operand.hbm [shape: bf16[256,128], index: 7, kind: input, shape index: {}]   ;;  %s10118_s8 = inlined_call_operand.hbm [shape: f32[1,128], index: 8, kind: input, shape index: {}]   ;;  %s10119_s9 = inlined_call_operand.vmem [shape: f32[16,128], index: 9, kind: output, shape index: {}]  }
   0x1   :  { %10126 = sst [smem:[#allocation24_spill]] %s10112_s2 }
   0x2   :  { %10127 = sst [smem:[#allocation25_spill]] %s10114_s4 }
   0x3   :  { %14 = vsyncpa [#allocation5], 0 }
   0x4   :  { %16 = vsyncpa [#allocation5 + $0x1], 0 }
   0x5   :  { %17 = vsyncpa [#allocation7], 0 }
   0x6   :  { %18 = vsyncpa [#allocation10], 0 }
   0x7   :  { %19 = vsyncpa [#allocation13], 0 }
   0x8   :  { %20 = vsyncpa [#allocation16], 0  ;;  %s9126_s30 = smov 0   ;;  %s9128_s10 = smov 0  }
   0x9   :  { %s9130_s11 = smov 0   ;;  %s9132_s12 = smov 0  }
   0xa LB: > { %s9145_s13 = sadd.s32 4294967295, %s9057_s12   ;;  %s9148_s14 = sadd.s32 1, %s9057_s12   ;;  %s9057_s12 = sphi %s9132_s12, %s10150_s12   ;;  %s9053_s11 = sphi %s9130_s11, %s10154_s11   ;;  %s9049_s10 = sphi %s9128_s10, %s10153_s10   ;;  %s9045_s30 = sphi %s9126_s30, %s10152_s30  }
   0xb   : > { %10128 = sst [smem:[#allocation22_spill]] %s9148_s14  ;;  %s30_s15 = ssub.s32 %s9057_s12, %s9148_s14 }
   0xc   : > { %s33_s16 = sadd.s32 1, %s9053_s11  ;;  %p31_p0 = scmp.eq.s32.totalorder %s30_s15, 0 }
   0xd   : > { %p40_p1 = scmp.ne.s32.totalorder %s9053_s11, %s9049_s10  ;;  %p41_p2 = scmp.eq.s32.totalorder %s9057_s12, 0 }
   0xe   : > { %p72_p3 = scmp.ne.s32.totalorder %s9049_s10, %s9045_s30  ;;  %p10120_p5 = scmp.eq.s32.totalorder %s9145_s13, 0 }
   0xf   : > { %s9158_s17 = scalar_select %p31_p0, %s9053_s11, %s33_s16  }
  0x10   : > { %p9160_p4 = por %p41_p2, %p40_p1  ;;  %p7173_p6 = scmp.ge.s32.totalorder %s9057_s12, 1 }
  0x11   : > { %10129 = sst [smem:[#allocation23_spill]] %s9158_s17  ;;  %p251_p7 = scmp.lt.s32.totalorder %s9057_s12, 9 }
  0x12   : > { %s10130_s18 = scalar_select %p9160_p4, 1, 0 }
  0x13   : > { %p9169_p8 = por %p10120_p5, %p72_p3  ;;  %p9174_p10 = pnand %p7173_p6, %p251_p7 }
  0x14   : > { %s9059_s21 = smov [#allocation6]   ;;  %s9060_s23 = smov [#allocation9]  }
  0x15   : > { %s10131_s19 = scalar_select %p9169_p8, 1, 0 }
  0x16   : > { %s10132_s20 = scalar_select %p9174_p10, 1, 0 }
  0x17   : > { %s264_s22 = sshll.u32 %s9059_s21, 4  ;;  %p8203_p11 = pneg %p9174_p10  ;;  %s265_s22 = int_to_ptr.vmem [resolvable:$true] %s264_s22 }
  0x18   : > { %s288_s24 = sshll.u32 %s9060_s23, 4  ;;  %s9061_s26 = smov [#allocation12]   ;;  %s9186_s24 = int_to_ptr.vmem [resolvable:$true] %s288_s24 }
  0x19   : > { %p9182_p12 = pnand %p8203_p11, %p10120_p5  ;;  %s312_s27 = sshll.u32 %s9061_s26, 4  ;;  %s9188_s27 = int_to_ptr.vmem [resolvable:$true] %s312_s27 }
  0x1a   : > { %s10134_s2 = sld [smem:[#allocation24_spill]] }
  0x1b   : > { %p9198_p0 = pneg %p9182_p12 }
  0x20   : > { %s8783_s30 = scalar_lea.hbm %s10134_s2, 128 }
  0x21   : > { %p8784_p13 = scmp.ne.s32.totalorder %s10134_s2, %s8783_s30  ;;  %p8790_p3 = scmp.lt.u32.totalorder %s8783_s30, %s10134_s2 }
  0x23   : > { %p8786_p1 = pnand %p9198_p0, %p8784_p13 }
  0x25   : > { %p8787_p2 = pneg %p8786_p1 }
  0x27   : > { %p8792_p6 = pnand %p8790_p3, %p8787_p2 }
  0x29   : > { %8795 = shalt.err (!%p8792_p6)
}
  0x2a   : > { %s8796_s28 = scalar_lea.vmem %s265_s22, 128  ;;  %p8804_p5 = scmp.lt.s32.totalorder %s265_s22, %s265_s22 }
  0x2b   : > { %p8797_p7 = scmp.ne.s32.totalorder %s265_s22, %s8796_s28  ;;  %p8805_p8 = scmp.lt.s32.totalorder %s8796_s28, %s8796_s28 }
  0x2d   : > { %p8799_p11 = pnand %p8797_p7, %p9198_p0  ;;  %p8806_p10 = por %p8805_p8, %p8804_p5 }
  0x2f   : > { %p8800_p9 = pneg %p8799_p11 }
  0x31   : > { %p8807_p4 = pnand %p8806_p10, %p8800_p9 }
  0x33   : > { %8810 = shalt.err (!%p8807_p4)
}
  0x34   : > { %8206 = dma.hbm_to_vmem [thread:$0]  (!%p9182_p12), %s10134_s2, 128, %s265_s22, [#allocation7]  }
  0x35   : > { %s10136_s4 = sld [smem:[#allocation25_spill]] }
  0x3b   : > { %s8811_s23 = scalar_lea.hbm %s10136_s4, 64 }
  0x3c   : > { %p8812_p13 = scmp.ne.s32.totalorder %s10136_s4, %s8811_s23  ;;  %p8818_p4 = scmp.lt.u32.totalorder %s8811_s23, %s10136_s4 }
  0x3e   : > { %p8814_p1 = pnand %p8812_p13, %p9198_p0 }
  0x40   : > { %p8815_p5 = pneg %p8814_p1 }
  0x42   : > { %p8820_p8 = pnand %p8818_p4, %p8815_p5 }
  0x44   : > { %8823 = shalt.err (!%p8820_p8)
}
  0x45   : > { %s8824_s22 = scalar_lea.vmem %s9186_s24, 64  ;;  %p8832_p3 = scmp.lt.s32.totalorder %s9186_s24, %s9186_s24 }
  0x46   : > { %p8825_p9 = scmp.ne.s32.totalorder %s9186_s24, %s8824_s22  ;;  %p8833_p6 = scmp.lt.s32.totalorder %s8824_s22, %s8824_s22 }
  0x48   : > { %p8827_p10 = pnand %p8825_p9, %p9198_p0  ;;  %p8834_p7 = por %p8833_p6, %p8832_p3 }
  0x4a   : > { %p8828_p2 = pneg %p8827_p10 }
  0x4c   : > { %p8835_p11 = pnand %p8834_p7, %p8828_p2 }
  0x4e   : > { %8838 = shalt.err (!%p8835_p11)
}
  0x4f   : > { %8212 = dma.hbm_to_vmem [thread:$0]  (!%p9182_p12), %s10136_s4, 64, %s9186_s24, [#allocation10]  }
  0x50   : > { %s8839_s30 = scalar_lea.hbm %s10116_s6, 32 }
  0x51   : > { %p8840_p13 = scmp.ne.s32.totalorder %s10116_s6, %s8839_s30  ;;  %p8846_p4 = scmp.lt.u32.totalorder %s8839_s30, %s10116_s6 }
  0x53   : > { %p8842_p1 = pnand %p8840_p13, %p9198_p0 }
  0x55   : > { %p8843_p5 = pneg %p8842_p1 }
  0x57   : > { %p8848_p8 = pnand %p8846_p4, %p8843_p5 }
  0x59   : > { %8851 = shalt.err (!%p8848_p8)
}
  0x5a   : > { %s8852_s24 = scalar_lea.vmem %s9188_s27, 32  ;;  %p8860_p3 = scmp.lt.s32.totalorder %s9188_s27, %s9188_s27 }
  0x5b   : > { %p8853_p9 = scmp.ne.s32.totalorder %s9188_s27, %s8852_s24  ;;  %p8861_p6 = scmp.lt.s32.totalorder %s8852_s24, %s8852_s24 }
  0x5d   : > { %p8855_p10 = pnand %p8853_p9, %p9198_p0  ;;  %p8862_p7 = por %p8861_p6, %p8860_p3 }
  0x5f   : > { %p8856_p2 = pneg %p8855_p10 }
  0x61   : > { %p8863_p11 = pnand %p8862_p7, %p8856_p2 }
  0x63   : > { %8866 = shalt.err (!%p8863_p11)
}
  0x64   : > { %8218 = dma.hbm_to_vmem [thread:$0]  (!%p9182_p12), %s10116_s6, 32, %s9188_s27, [#allocation13]  }
  0x65   : > { %s9062_s17 = smov [#allocation8]   ;;  %s8867_s16 = scalar_lea.hbm %s10113_s3, 32768 }
  0x66   : > { %s274_s29 = sshll.u32 %s9062_s17, 4  ;;  %p8868_p13 = scmp.ne.s32.totalorder %s10113_s3, %s8867_s16  ;;  %s275_s29 = int_to_ptr.vmem [resolvable:$true] %s274_s29 }
  0x67   : > { %p8874_p4 = scmp.lt.u32.totalorder %s8867_s16, %s10113_s3 }
  0x68   : > { %p8870_p1 = pnand %p8868_p13, %p9198_p0 }
  0x6a   : > { %p8871_p5 = pneg %p8870_p1 }
  0x6c   : > { %p8876_p8 = pnand %p8874_p4, %p8871_p5 }
  0x6e   : > { %8879 = shalt.err (!%p8876_p8)
}
  0x6f   : > { %s8880_s27 = scalar_lea.vmem %s275_s29, 32768  ;;  %p8888_p3 = scmp.lt.s32.totalorder %s275_s29, %s275_s29 }
  0x70   : > { %p8881_p9 = scmp.ne.s32.totalorder %s275_s29, %s8880_s27  ;;  %p8889_p6 = scmp.lt.s32.totalorder %s8880_s27, %s8880_s27 }
  0x72   : > { %p8883_p10 = pnand %p8881_p9, %p9198_p0  ;;  %p8890_p7 = por %p8889_p6, %p8888_p3 }
  0x74   : > { %p8884_p2 = pneg %p8883_p10 }
  0x76   : > { %p8891_p11 = pnand %p8890_p7, %p8884_p2 }
  0x78   : > { %8894 = shalt.err (!%p8891_p11)
}
  0x79   : > { %s9063_s22 = smov 256   ;;  %s9064_s14 = smov 16  }
  0x7a   : > { %8209 = dma.hbm_to_vmem [thread:$0]  (!%p9182_p12), %s10113_s3, 32768, %s275_s29, [#allocation7], %s9063_s22, %s9063_s22, %s9064_s14  }
  0x7b   : > { %s9065_s30 = smov [#allocation11]   ;;  %s8895_s28 = scalar_lea.hbm %s10115_s5, 8192 }
  0x7c   : > { %s298_s16 = sshll.u32 %s9065_s30, 4  ;;  %p8896_p13 = scmp.ne.s32.totalorder %s10115_s5, %s8895_s28  ;;  %s299_s16 = int_to_ptr.vmem [resolvable:$true] %s298_s16 }
  0x7d   : > { %p8902_p4 = scmp.lt.u32.totalorder %s8895_s28, %s10115_s5 }
  0x7e   : > { %p8898_p1 = pnand %p8896_p13, %p9198_p0 }
  0x80   : > { %p8899_p5 = pneg %p8898_p1 }
  0x82   : > { %p8904_p8 = pnand %p8902_p4, %p8899_p5 }
  0x84   : > { %8907 = shalt.err (!%p8904_p8)
}
  0x85   : > { %s8908_s29 = scalar_lea.vmem %s299_s16, 8192  ;;  %p8916_p3 = scmp.lt.s32.totalorder %s299_s16, %s299_s16 }
  0x86   : > { %p8909_p9 = scmp.ne.s32.totalorder %s299_s16, %s8908_s29  ;;  %p8917_p6 = scmp.lt.s32.totalorder %s8908_s29, %s8908_s29 }
  0x88   : > { %p8911_p10 = pnand %p8909_p9, %p9198_p0  ;;  %p8918_p7 = por %p8917_p6, %p8916_p3 }
  0x8a   : > { %p8912_p2 = pneg %p8911_p10 }
  0x8c   : > { %p8919_p11 = pnand %p8918_p7, %p8912_p2 }
  0x8e   : > { %8922 = shalt.err (!%p8919_p11)
}
  0x8f   : > { %s9066_s22 = smov 128   ;;  %s9067_s14 = smov 8  }
  0x90   : > { %8215 = dma.hbm_to_vmem [thread:$0]  (!%p9182_p12), %s10115_s5, 8192, %s299_s16, [#allocation10], %s9066_s22, %s9066_s22, %s9067_s14  }
  0x91   : > { %s9068_s17 = smov [#allocation14]   ;;  %s8923_s26 = scalar_lea.hbm %s10117_s7, 2048 }
  0x92   : > { %s322_s15 = sshll.u32 %s9068_s17, 4  ;;  %p8924_p13 = scmp.ne.s32.totalorder %s10117_s7, %s8923_s26  ;;  %s323_s15 = int_to_ptr.vmem [resolvable:$true] %s322_s15 }
  0x93   : > { %p8930_p4 = scmp.lt.u32.totalorder %s8923_s26, %s10117_s7 }
  0x94   : > { %p8926_p1 = pnand %p8924_p13, %p9198_p0 }
  0x96   : > { %p8927_p5 = pneg %p8926_p1 }
  0x98   : > { %p8932_p8 = pnand %p8930_p4, %p8927_p5 }
  0x9a   : > { %8935 = shalt.err (!%p8932_p8)
}
  0x9b   : > { %s8936_s16 = scalar_lea.vmem %s323_s15, 2048  ;;  %p8944_p3 = scmp.lt.s32.totalorder %s323_s15, %s323_s15 }
  0x9c   : > { %p8937_p9 = scmp.ne.s32.totalorder %s323_s15, %s8936_s16  ;;  %p8945_p6 = scmp.lt.s32.totalorder %s8936_s16, %s8936_s16 }
  0x9e   : > { %p8939_p10 = pnand %p8937_p9, %p9198_p0  ;;  %p8946_p7 = por %p8945_p6, %p8944_p3 }
  0xa0   : > { %p8940_p2 = pneg %p8939_p10 }
  0xa2   : > { %p8947_p11 = pnand %p8946_p7, %p8940_p2 }
  0xa4   : > { %8950 = shalt.err (!%p8947_p11)
}
  0xa5   : > { %s9069_s22 = smov 64   ;;  %s9070_s14 = smov 4  }
  0xa6   : > { %8221 = dma.hbm_to_vmem [thread:$0]  (!%p9182_p12), %s10117_s7, 2048, %s323_s15, [#allocation13], %s9069_s22, %s9069_s22, %s9070_s14  }
  0xa7   : > { %s9071_s17 = smov [#allocation15]   ;;  %s8951_s28 = scalar_lea.hbm %s10118_s8, 16 }
  0xa8   : > { %s336_s30 = sshll.u32 %s9071_s17, 4  ;;  %p8952_p13 = scmp.ne.s32.totalorder %s10118_s8, %s8951_s28  ;;  %s337_s30 = int_to_ptr.vmem [resolvable:$true] %s336_s30 }
  0xa9   : > { %p8958_p4 = scmp.lt.u32.totalorder %s8951_s28, %s10118_s8 }
  0xaa   : > { %p8954_p1 = pnand %p8952_p13, %p9198_p0 }
  0xac   : > { %p8955_p5 = pneg %p8954_p1 }
  0xae   : > { %p8960_p8 = pnand %p8958_p4, %p8955_p5 }
  0xb0   : > { %8963 = shalt.err (!%p8960_p8)
}
  0xb1   : > { %s8964_s15 = scalar_lea.vmem %s337_s30, 16  ;;  %s8971_s22 = scalar_lea.vmem %s337_s30, 32 }
  0xb2   : > { %p8965_p9 = scmp.ne.s32.totalorder %s337_s30, %s8964_s15  ;;  %p8972_p3 = scmp.lt.s32.totalorder %s337_s30, %s337_s30 }
  0xb3   : > { %p8973_p6 = scmp.lt.s32.totalorder %s8971_s22, %s8964_s15 }
  0xb4   : > { %p8967_p10 = pnand %p8965_p9, %p9198_p0 }
  0xb5   : > { %p8974_p7 = por %p8973_p6, %p8972_p3 }
  0xb6   : > { %p8968_p2 = pneg %p8967_p10 }
  0xb8   : > { %p8975_p11 = pnand %p8974_p7, %p8968_p2 }
  0xba   : > { %8978 = shalt.err (!%p8975_p11)
}
  0xbb   : > { %8224 = dma.hbm_to_vmem [thread:$0]  (!%p9182_p12), %s10118_s8, 16, %s337_s30, [#allocation16]  }
  0xbc   : > { %p7181_p13 = scmp.ge.s32.totalorder %s9057_s12, 8 }
  0xbd   : > { %p10137_p1 = scmp.ne.s32.totalorder (!%p7181_p13), %s10130_s18, 0 }
  0xbe   : > { %343 = sbr.rel (%p7181_p13) target bundleno = 232 (0xe8), region = 44 }
  0xc5   : > { %346 = sbr.rel (!%p10137_p1) target bundleno = 205 (0xcd), region = 48  ;;  %s348_s21 = sand.u32 (%p10137_p1), 1, %s9053_s11  }
  0xc6   : > { %s8060_s4 = sshll.u32 (%p10137_p1), %s9057_s12, 5  ;;  %s7182_s17 = sshll.u32 (%p10137_p1), %s348_s21, 6 }
  0xc7   : > { %s353_s28 = scalar_lea.vmem (%p10137_p1), %s10110_s0, %s8060_s4  ;;  %s350_s25 = scalar_lea.vmem (%p10137_p1), [#allocation3], %s7182_s17 }
  0xc8   : > { %v366_v0 = vld [vmem:[%s353_s28] sm:$0xff] (%p10137_p1)  ;;  %v368_v1 = vld [vmem:[%s353_s28 + $0x8] sm:$0xff] (%p10137_p1)  ;;  %v370_v2 = vld [vmem:[%s353_s28 + $0x10] sm:$0xff] (%p10137_p1) }
  0xc9   : > { %367 = vst [vmem:[%s350_s25] sm:$0xff] (%p10137_p1), %v366_v0  ;;  %369 = vst [vmem:[%s350_s25 + $0x8] sm:$0xff] (%p10137_p1), %v368_v1  ;;  %v372_v3 = vld [vmem:[%s353_s28 + $0x18] sm:$0xff] (%p10137_p1)  ;;  %v374_v4 = vld [vmem:[%s353_s28 + $0x100] sm:$0xff] (%p10137_p1) }
  0xca   : > { %371 = vst [vmem:[%s350_s25 + $0x10] sm:$0xff] (%p10137_p1), %v370_v2  ;;  %v376_v5 = vld [vmem:[%s353_s28 + $0x108] sm:$0xff] (%p10137_p1)  ;;  %373 = vst [vmem:[%s350_s25 + $0x18] sm:$0xff] (%p10137_p1), %v372_v3  ;;  %v378_v6 = vld [vmem:[%s353_s28 + $0x110] sm:$0xff] (%p10137_p1) }
  0xcb   : > { %375 = vst [vmem:[%s350_s25 + $0x20] sm:$0xff] (%p10137_p1), %v374_v4  ;;  %377 = vst [vmem:[%s350_s25 + $0x28] sm:$0xff] (%p10137_p1), %v376_v5  ;;  %v380_v7 = vld [vmem:[%s353_s28 + $0x118] sm:$0xff] (%p10137_p1) }
  0xcc   : > { %379 = vst [vmem:[%s350_s25 + $0x30] sm:$0xff] %v378_v6  ;;  %381 = vst [vmem:[%s350_s25 + $0x38] sm:$0xff] %v380_v7 }
  0xcd PF: > { %s388_s30 = sand.u32 1, %s9053_s11   ;;  %s8062_s24 = sshll.u32 %s9057_s12, 16 }
  0xce   : > { %s7185_s27 = sshll.u32 %s388_s30, 12  ;;  %s9345_s15 = scalar_lea.hbm %s10111_s1, %s8062_s24 }
  0xcf   : > { %s392_s22 = scalar_lea.vmem [#allocation4], %s7185_s27  ;;  %s9349_s2 = scalar_lea.sflag [#allocation5], %s388_s30 }
  0xd0   : > { %s400_s14 = sshll.u32 %s392_s22, 4  ;;  %s8979_s21 = scalar_lea.hbm %s9345_s15, 65536  ;;  %s9347_s14 = int_to_ptr.vmem [resolvable:$true] %s400_s14 }
  0xd1   : > { %p8980_p12 = scmp.ne.s32.totalorder %s9345_s15, %s8979_s21  ;;  %p10138_p0 = scmp.ne.s32.totalorder %s10130_s18, 0 }
  0xd2   : > { %s8983_s17 = scalar_lea.hbm %s10111_s1, 524288  ;;  %p8984_p8 = scmp.lt.u32.totalorder %s9345_s15, %s10111_s1 }
  0xd3   : > { %p8981_p5 = pnand %p8980_p12, %p10138_p0  ;;  %p8985_p9 = scmp.lt.u32.totalorder %s8983_s17, %s8979_s21 }
  0xd4   : > { %p8987_p2 = scmp.lt.u32.totalorder %s8979_s21, %s9345_s15 }
  0xd5   : > { %p8982_p4 = pneg %p8981_p5  ;;  %p8986_p10 = por %p8985_p9, %p8984_p8 }
  0xd7   : > { %p8988_p3 = por %p8987_p2, %p8986_p10 }
  0xd9   : > { %p8989_p6 = pnand %p8988_p3, %p8982_p4 }
  0xdb   : > { %8992 = shalt.err (!%p8989_p6)
}
  0xdc   : > { %s8993_s28 = scalar_lea.vmem %s9347_s14, 65536  ;;  %s9072_s25 = smov [#allocation4]  }
  0xdd   : > { %p8994_p7 = scmp.ne.s32.totalorder %s9347_s14, %s8993_s28  ;;  %s8997_s30 = sshll.u32 %s9072_s25, 4  ;;  %s8998_s30 = int_to_ptr.vmem [resolvable:$false] %s8997_s30 }
  0xde   : > { %s8999_s24 = scalar_lea.vmem %s8998_s30, 131072  ;;  %p9000_p1 = scmp.lt.s32.totalorder %s9347_s14, %s8998_s30 }
  0xdf   : > { %p8995_p11 = pnand %p8994_p7, %p10138_p0  ;;  %p9001_p12 = scmp.lt.s32.totalorder %s8999_s24, %s8993_s28 }
  0xe1   : > { %p8996_p13 = pneg %p8995_p11  ;;  %p9002_p5 = por %p9001_p12, %p9000_p1 }
  0xe3   : > { %p9003_p8 = pnand %p9002_p5, %p8996_p13 }
  0xe5   : > { %9006 = shalt.err (!%p9003_p8)
}
  0xe6   : > { %s9073_s27 = smov 512   ;;  %s9074_s29 = smov 32  }
  0xe7   : > { %8187 = dma.hbm_to_vmem [thread:$0]  (%p10138_p0), %s9345_s15, 65536, %s9347_s14, %s9349_s2, %s9073_s27, %s9073_s27, %s9074_s29  }
  0xe8 PF: > { %p10139_p4 = scmp.ne.s32.totalorder %s10132_s20, 0 }
  0xe9   : > { %s415_s16 = sand.u32 (!%p10139_p4), 1, %s9049_s10   ;;  %p10140_p9 = scmp.ne.s32.totalorder (!%p10139_p4), %s10131_s19, 0 }
  0xea   : > { %412 = sbr.rel (%p10139_p4) target bundleno = 1939 (0x793), region = 75  ;;  %s7190_s22 = sshll.u32 (!%p10139_p4), %s415_s16, 6 }
  0xeb   : > { %s7191_s21 = sshll.u32 (!%p10139_p4), %s415_s16, 12  ;;  %s9376_s12 = scalar_lea.vmem (!%p10139_p4), [#allocation3], %s7190_s22 }
  0xec   : > { %s422_s4 = scalar_lea.sflag (!%p10139_p4), [#allocation5], %s415_s16  ;;  %s9378_s17 = scalar_lea.vmem (!%p10139_p4), [#allocation4], %s7191_s21 }
  0xf1   : > { %9024 = dma.done.wait (%p10140_p9), %s422_s4, 65536  }
  0xf2   : > { %9026 = vsyncadd (%p10140_p9), %s422_s4, 4294901760  ;;  %p10141_p0 = scmp.eq.s32.totalorder %s9145_s13, 0 }
  0xf4   : > { %9028 = dma.done.wait (%p10141_p0), [#allocation7], 32896   ;;  %p10142_p10 = pmov %p10141_p0 }
  0xf5   : > { %p10143_p2 = pmov %p10141_p0 }
  0xf6   : > { %9030 = vsyncadd (%p10142_p10), [#allocation7], 4294934400 }
  0xf7   : > { %9032 = dma.done.wait (%p10143_p2), [#allocation10], 8256   ;;  %p10144_p3 = pmov %p10141_p0 }
  0xf8   : > { %p10145_p6 = pmov %p10141_p0 }
  0xf9   : > { %9034 = vsyncadd (%p10144_p3), [#allocation10], 4294959040 }
  0xfa   : > { %9036 = dma.done.wait (%p10145_p6), [#allocation13], 2080   ;;  %p10146_p7 = pmov %p10141_p0 }
  0xfb   : > { %p10147_p11 = pmov %p10141_p0 }
  0xfc   : > { %9038 = vsyncadd (%p10146_p7), [#allocation13], 4294965216 }
  0xfd   : > { %9040 = dma.done.wait (%p10147_p11), [#allocation16], 16   ;;  %p10148_p13 = pmov %p10141_p0 }
  0xfe   : > { %p10149_p1 = scmp.ne.s32.totalorder %s9145_s13, 0 }
  0xff   : > { %9042 = vsyncadd (%p10148_p13), [#allocation16], 4294967280  ;;  %v9075_v8 = vmov (!%p10149_p1), 0.0  }
 0x100   : > { %493 = sbr.rel (%p10149_p1) target bundleno = 264 (0x108), region = 115  ;;  %494 = vst [vmem:[#allocation2] sm:$0xff] (!%p10149_p1), %v9075_v8  ;;  %495 = vst [vmem:[#allocation2 + $0x8] sm:$0xff] (!%p10149_p1), %v9075_v8 }
 0x101   : > { %496 = vst [vmem:[#allocation2 + $0x10] sm:$0xff] (!%p10149_p1), %v9075_v8  ;;  %497 = vst [vmem:[#allocation2 + $0x18] sm:$0xff] (!%p10149_p1), %v9075_v8 }
 0x102   : > { %498 = vst [vmem:[#allocation2 + $0x20] sm:$0xff] (!%p10149_p1), %v9075_v8  ;;  %499 = vst [vmem:[#allocation2 + $0x28] sm:$0xff] (!%p10149_p1), %v9075_v8 }
 0x103   : > { %500 = vst [vmem:[#allocation2 + $0x30] sm:$0xff] (!%p10149_p1), %v9075_v8  ;;  %501 = vst [vmem:[#allocation2 + $0x38] sm:$0xff] (!%p10149_p1), %v9075_v8 }
 0x104   : > { %502 = vst [vmem:[#allocation2 + $0x40] sm:$0xff] (!%p10149_p1), %v9075_v8  ;;  %503 = vst [vmem:[#allocation2 + $0x48] sm:$0xff] (!%p10149_p1), %v9075_v8 }
 0x105   : > { %504 = vst [vmem:[#allocation2 + $0x50] sm:$0xff] (!%p10149_p1), %v9075_v8  ;;  %505 = vst [vmem:[#allocation2 + $0x58] sm:$0xff] (!%p10149_p1), %v9075_v8 }
 0x106   : > { %506 = vst [vmem:[#allocation2 + $0x60] sm:$0xff] (!%p10149_p1), %v9075_v8  ;;  %507 = vst [vmem:[#allocation2 + $0x68] sm:$0xff] (!%p10149_p1), %v9075_v8 }
 0x107   : > { %508 = vst [vmem:[#allocation2 + $0x70] sm:$0xff] %v9075_v8  ;;  %509 = vst [vmem:[#allocation2 + $0x78] sm:$0xff] %v9075_v8 }
 0x108 PF: > { %v534_v9 = vld [vmem:[%s9378_s17] sm:$0xff]  ;;  %v535_v11 = vld [vmem:[%s9378_s17 + $0x8] sm:$0xff]  ;;  %p7720_p12 = scmp.ne.s32.totalorder %s9145_s13, 7 }
 0x109   : > { %v538_v10 = vld [vmem:[%s9378_s17 + $0x20] sm:$0xff]  ;;  %v539_v13 = vld [vmem:[%s9378_s17 + $0x28] sm:$0xff] }
 0x10a   : > { %v7209_v12 = vcombine.high %v534_v9, %v538_v10  ;;  %v7208_v14 = vcombine.low %v534_v9, %v538_v10  ;;  %v542_v15 = vld [vmem:[%s9378_s17 + $0x40] sm:$0xff]  ;;  %v7211_v17 = vcombine.high %v535_v11, %v539_v13  ;;  %v7210_v18 = vcombine.low %v535_v11, %v539_v13  ;;  %v543_v20 = vld [vmem:[%s9378_s17 + $0x48] sm:$0xff] }
 0x10b   : > { %v546_v16 = vld [vmem:[%s9378_s17 + $0x60] sm:$0xff]  ;;  %v547_v21 = vld [vmem:[%s9378_s17 + $0x68] sm:$0xff] }
 0x10c   : > { %v7217_v19 = vcombine.high %v542_v15, %v546_v16  ;;  %v550_v22 = vld [vmem:[%s9378_s17 + $0x80] sm:$0xff]  ;;  %3646 = vmatprep.subr.bf16.mxu0 %v7209_v12  ;;  %v7219_v23 = vcombine.high %v543_v20, %v547_v21  ;;  %v551_v25 = vld [vmem:[%s9378_s17 + $0x88] sm:$0xff]  ;;  %3818 = vmatprep.subr.bf16.mxu1 %v7211_v17  ;;  %v7216_v27 = vcombine.low %v542_v15, %v546_v16 }
 0x10d   : > { %v554_v24 = vld [vmem:[%s9378_s17 + $0xa0] sm:$0xff]  ;;  %v555_v26 = vld [vmem:[%s9378_s17 + $0xa8] sm:$0xff]  ;;  %3647 = vmatpush1.bf16.msra.mxu0 %v7208_v14  ;;  %3819 = vmatpush1.bf16.msra.mxu1 %v7210_v18  ;;  %v7218_v28 = vcombine.low %v543_v20, %v547_v21 }
 0x10e   : > { %3648 = vmatprep.subr.bf16.mxu0 %v7217_v19  ;;  %v7225_v29 = vcombine.high %v550_v22, %v554_v24  ;;  %3820 = vmatprep.subr.bf16.mxu1 %v7219_v23  ;;  %v7227_v30 = vcombine.high %v551_v25, %v555_v26  ;;  %v558_v31 = vld [vmem:[%s9378_s17 + $0xc0] sm:$0xff]  ;;  %v559_v33 = vld [vmem:[%s9378_s17 + $0xc8] sm:$0xff]  ;;  %v7224_v35 = vcombine.low %v550_v22, %v554_v24 }
 0x10f   : > { %v562_v32 = vld [vmem:[%s9378_s17 + $0xe0] sm:$0xff]  ;;  %v563_v34 = vld [vmem:[%s9378_s17 + $0xe8] sm:$0xff]  ;;  %v7226_v36 = vcombine.low %v551_v25, %v555_v26 }
 0x110   : > { %v7233_v37 = vcombine.high %v558_v31, %v562_v32  ;;  %v7235_v38 = vcombine.high %v559_v33, %v563_v34  ;;  %v566_v39 = vld [vmem:[%s9378_s17 + $0x100] sm:$0xff]  ;;  %v567_v41 = vld [vmem:[%s9378_s17 + $0x108] sm:$0xff]  ;;  %v7232_v43 = vcombine.low %v558_v31, %v562_v32  ;;  %v7234_v44 = vcombine.low %v559_v33, %v563_v34 }
 0x111   : > { %3649 = vmatpush1.bf16.msra.mxu0 %v7216_v27  ;;  %3821 = vmatpush1.bf16.msra.mxu1 %v7218_v28  ;;  %v570_v40 = vld [vmem:[%s9378_s17 + $0x120] sm:$0xff]  ;;  %v571_v42 = vld [vmem:[%s9378_s17 + $0x128] sm:$0xff] }
 0x112   : > { %3650 = vmatprep.subr.bf16.mxu0 %v7225_v29  ;;  %3822 = vmatprep.subr.bf16.mxu1 %v7227_v30  ;;  %v7241_v45 = vcombine.high %v566_v39, %v570_v40  ;;  %v7243_v46 = vcombine.high %v567_v41, %v571_v42  ;;  %v574_v47 = vld [vmem:[%s9378_s17 + $0x140] sm:$0xff]  ;;  %v575_v49 = vld [vmem:[%s9378_s17 + $0x148] sm:$0xff]  ;;  %v7240_v51 = vcombine.low %v566_v39, %v570_v40 }
 0x113   : > { %v578_v48 = vld [vmem:[%s9378_s17 + $0x160] sm:$0xff]  ;;  %v579_v50 = vld [vmem:[%s9378_s17 + $0x168] sm:$0xff]  ;;  %v7242_v52 = vcombine.low %v567_v41, %v571_v42 }
 0x114   : > { %v7249_v53 = vcombine.high %v574_v47, %v578_v48  ;;  %v7251_v54 = vcombine.high %v575_v49, %v579_v50  ;;  %v582_v55 = vld [vmem:[%s9378_s17 + $0x180] sm:$0xff]  ;;  %v583_v57 = vld [vmem:[%s9378_s17 + $0x188] sm:$0xff]  ;;  %v7248_v59 = vcombine.low %v574_v47, %v578_v48  ;;  %v7250_v60 = vcombine.low %v575_v49, %v579_v50 }
 0x115   : > { %3651 = vmatpush1.bf16.msra.mxu0 %v7224_v35  ;;  %3823 = vmatpush1.bf16.msra.mxu1 %v7226_v36  ;;  %v586_v56 = vld [vmem:[%s9378_s17 + $0x1a0] sm:$0xff]  ;;  %v587_v58 = vld [vmem:[%s9378_s17 + $0x1a8] sm:$0xff] }
 0x116   : > { %3652 = vmatprep.subr.bf16.mxu0 %v7233_v37  ;;  %3824 = vmatprep.subr.bf16.mxu1 %v7235_v38  ;;  %v7257_v61 = vcombine.high %v582_v55, %v586_v56  ;;  %v9431_v62 = vld [vmem:[%s9376_s12] sm:$0xff]  ;;  %v7259_v0 = vcombine.high %v583_v57, %v587_v58  ;;  %v591_v4 = vld [vmem:[%s9378_s17 + $0x1c8] sm:$0xff]  ;;  %v7256_v6 = vcombine.low %v582_v55, %v586_v56 }
 0x117   : > { %v9434_v63 = vld [vmem:[%s9376_s12 + $0x20] sm:$0xff]  ;;  %v595_v5 = vld [vmem:[%s9378_s17 + $0x1e8] sm:$0xff]  ;;  %v7258_v7 = vcombine.low %v583_v57, %v587_v58 }
 0x118   : > { %v590_v1 = vld [vmem:[%s9378_s17 + $0x1c0] sm:$0xff]  ;;  %v9440_v3 = vcombine.high %v9431_v62, %v9434_v63  ;;  %v7267_v9 = vcombine.high %v591_v4, %v595_v5  ;;  %v599_v12 = vld [vmem:[%s9378_s17 + $0x208] sm:$0xff]  ;;  %v7266_v15 = vcombine.low %v591_v4, %v595_v5 }
 0x119   : > { %3653 = vmatpush1.bf16.msra.mxu0 %v7232_v43  ;;  %3825 = vmatpush1.bf16.msra.mxu1 %v7234_v44  ;;  %v594_v2 = vld [vmem:[%s9378_s17 + $0x1e0] sm:$0xff]  ;;  %v603_v13 = vld [vmem:[%s9378_s17 + $0x228] sm:$0xff] }
 0x11a   : > { %3654 = vmatprep.subr.bf16.mxu0 %v7241_v45  ;;  %3826 = vmatprep.subr.bf16.mxu1 %v7243_v46  ;;  %v7265_v8 = vcombine.high %v590_v1, %v594_v2  ;;  %v598_v10 = vld [vmem:[%s9378_s17 + $0x200] sm:$0xff]  ;;  %v7264_v14 = vcombine.low %v590_v1, %v594_v2  ;;  %v7275_v17 = vcombine.high %v599_v12, %v603_v13  ;;  %v607_v20 = vld [vmem:[%s9378_s17 + $0x248] sm:$0xff] }
 0x11b   : > { %3678 = vmatprep.mubr.bf16.mxu0 %v9440_v3  ;;  %v602_v11 = vld [vmem:[%s9378_s17 + $0x220] sm:$0xff]  ;;  %3850 = vmatprep.mubr.bf16.mxu1 %v9440_v3  ;;  %v611_v21 = vld [vmem:[%s9378_s17 + $0x268] sm:$0xff]  ;;  %v7274_v23 = vcombine.low %v599_v12, %v603_v13 }
 0x11c   : > { %v7273_v16 = vcombine.high %v598_v10, %v602_v11  ;;  %v606_v18 = vld [vmem:[%s9378_s17 + $0x240] sm:$0xff]  ;;  %v7272_v22 = vcombine.low %v598_v10, %v602_v11  ;;  %v7283_v25 = vcombine.high %v607_v20, %v611_v21  ;;  %v615_v28 = vld [vmem:[%s9378_s17 + $0x288] sm:$0xff]  ;;  %v7282_v31 = vcombine.low %v607_v20, %v611_v21 }
 0x11d   : > { %3655 = vmatpush1.bf16.msra.mxu0 %v7240_v51  ;;  %3827 = vmatpush1.bf16.msra.mxu1 %v7242_v52  ;;  %v610_v19 = vld [vmem:[%s9378_s17 + $0x260] sm:$0xff]  ;;  %v619_v29 = vld [vmem:[%s9378_s17 + $0x2a8] sm:$0xff] }
 0x11e   : > { %3656 = vmatprep.subr.bf16.mxu0 %v7249_v53  ;;  %3828 = vmatprep.subr.bf16.mxu1 %v7251_v54  ;;  %v7281_v24 = vcombine.high %v606_v18, %v610_v19  ;;  %v614_v26 = vld [vmem:[%s9378_s17 + $0x280] sm:$0xff]  ;;  %v7280_v30 = vcombine.low %v606_v18, %v610_v19  ;;  %v7291_v33 = vcombine.high %v615_v28, %v619_v29  ;;  %v623_v36 = vld [vmem:[%s9378_s17 + $0x2c8] sm:$0xff] }
 0x11f   : > { %v618_v27 = vld [vmem:[%s9378_s17 + $0x2a0] sm:$0xff]  ;;  %v627_v37 = vld [vmem:[%s9378_s17 + $0x2e8] sm:$0xff]  ;;  %v7290_v39 = vcombine.low %v615_v28, %v619_v29 }
 0x120   : > { %v7289_v32 = vcombine.high %v614_v26, %v618_v27  ;;  %v622_v34 = vld [vmem:[%s9378_s17 + $0x2c0] sm:$0xff]  ;;  %v7288_v38 = vcombine.low %v614_v26, %v618_v27  ;;  %v7299_v41 = vcombine.high %v623_v36, %v627_v37  ;;  %v631_v44 = vld [vmem:[%s9378_s17 + $0x308] sm:$0xff]  ;;  %v7298_v47 = vcombine.low %v623_v36, %v627_v37 }
 0x121   : > { %3657 = vmatpush1.bf16.msra.mxu0 %v7248_v59  ;;  %3829 = vmatpush1.bf16.msra.mxu1 %v7250_v60  ;;  %v626_v35 = vld [vmem:[%s9378_s17 + $0x2e0] sm:$0xff]  ;;  %v635_v45 = vld [vmem:[%s9378_s17 + $0x328] sm:$0xff] }
 0x122   : > { %3658 = vmatprep.subr.bf16.mxu0 %v7257_v61  ;;  %3830 = vmatprep.subr.bf16.mxu1 %v7259_v0  ;;  %v7297_v40 = vcombine.high %v622_v34, %v626_v35  ;;  %v630_v42 = vld [vmem:[%s9378_s17 + $0x300] sm:$0xff]  ;;  %v7296_v46 = vcombine.low %v622_v34, %v626_v35  ;;  %v7307_v49 = vcombine.high %v631_v44, %v635_v45  ;;  %v639_v52 = vld [vmem:[%s9378_s17 + $0x348] sm:$0xff] }
 0x123   : > { %v634_v43 = vld [vmem:[%s9378_s17 + $0x320] sm:$0xff]  ;;  %v643_v53 = vld [vmem:[%s9378_s17 + $0x368] sm:$0xff]  ;;  %v7306_v55 = vcombine.low %v631_v44, %v635_v45 }
 0x124   : > { %v7305_v48 = vcombine.high %v630_v42, %v634_v43  ;;  %v638_v50 = vld [vmem:[%s9378_s17 + $0x340] sm:$0xff]  ;;  %v7304_v54 = vcombine.low %v630_v42, %v634_v43  ;;  %v7315_v57 = vcombine.high %v639_v52, %v643_v53  ;;  %v647_v60 = vld [vmem:[%s9378_s17 + $0x388] sm:$0xff]  ;;  %v7314_v1 = vcombine.low %v639_v52, %v643_v53 }
 0x125   : > { %3659 = vmatpush1.bf16.msra.mxu0 %v7256_v6  ;;  %3831 = vmatpush1.bf16.msra.mxu1 %v7258_v7  ;;  %v642_v51 = vld [vmem:[%s9378_s17 + $0x360] sm:$0xff]  ;;  %v651_v61 = vld [vmem:[%s9378_s17 + $0x3a8] sm:$0xff] }
 0x126   : > { %3660 = vmatprep.subr.bf16.mxu0 %v7265_v8  ;;  %3832 = vmatprep.subr.bf16.mxu1 %v7267_v9  ;;  %v7313_v56 = vcombine.high %v638_v50, %v642_v51  ;;  %v646_v58 = vld [vmem:[%s9378_s17 + $0x380] sm:$0xff]  ;;  %v7312_v0 = vcombine.low %v638_v50, %v642_v51  ;;  %v7323_v4 = vcombine.high %v647_v60, %v651_v61  ;;  %v655_v7 = vld [vmem:[%s9378_s17 + $0x3c8] sm:$0xff] }
 0x127   : > { %v650_v59 = vld [vmem:[%s9378_s17 + $0x3a0] sm:$0xff]  ;;  %v659_v8 = vld [vmem:[%s9378_s17 + $0x3e8] sm:$0xff]  ;;  %v7322_v10 = vcombine.low %v647_v60, %v651_v61 }
 0x128   : > { %v7321_v2 = vcombine.high %v646_v58, %v650_v59  ;;  %v654_v5 = vld [vmem:[%s9378_s17 + $0x3c0] sm:$0xff]  ;;  %v7320_v9 = vcombine.low %v646_v58, %v650_v59  ;;  %v7331_v12 = vcombine.high %v655_v7, %v659_v8  ;;  %v7330_v18 = vcombine.low %v655_v7, %v659_v8  ;;  %v9491_v26 = vld [vmem:[%s9376_s12 + $0x8] sm:$0xff] }
 0x129   : > { %3661 = vmatpush1.bf16.msra.mxu0 %v7264_v14  ;;  %3833 = vmatpush1.bf16.msra.mxu1 %v7266_v15  ;;  %v658_v6 = vld [vmem:[%s9378_s17 + $0x3e0] sm:$0xff]  ;;  %v663_v15 = vld [vmem:[%s9378_s17 + $0x408] sm:$0xff] }
 0x12a   : > { %3662 = vmatprep.subr.bf16.mxu0 %v7273_v16  ;;  %3834 = vmatprep.subr.bf16.mxu1 %v7275_v17  ;;  %v7329_v11 = vcombine.high %v654_v5, %v658_v6  ;;  %v662_v13 = vld [vmem:[%s9378_s17 + $0x400] sm:$0xff]  ;;  %v667_v16 = vld [vmem:[%s9378_s17 + $0x428] sm:$0xff]  ;;  %v7328_v17 = vcombine.low %v654_v5, %v658_v6 }
 0x12b   : > { %v666_v14 = vld [vmem:[%s9378_s17 + $0x420] sm:$0xff]  ;;  %v7339_v20 = vcombine.high %v663_v15, %v667_v16  ;;  %v9494_v27 = vld [vmem:[%s9376_s12 + $0x28] sm:$0xff]  ;;  %v7338_v29 = vcombine.low %v663_v15, %v667_v16 }
 0x12c   : > { %v7337_v19 = vcombine.high %v662_v13, %v666_v14  ;;  %v670_v21 = vld [vmem:[%s9378_s17 + $0x440] sm:$0xff]  ;;  %v7336_v28 = vcombine.low %v662_v13, %v666_v14  ;;  %v683_v34 = vld [vmem:[%s9378_s17 + $0x4a8] sm:$0xff] }
 0x12d   : > { %3663 = vmatpush1.bf16.msra.mxu0 %v7272_v22  ;;  %3835 = vmatpush1.bf16.msra.mxu1 %v7274_v23  ;;  %v674_v22 = vld [vmem:[%s9378_s17 + $0x460] sm:$0xff]  ;;  %v671_v23 = vld [vmem:[%s9378_s17 + $0x448] sm:$0xff] }
 0x12e   : > { %3664 = vmatprep.subr.bf16.mxu0 %v7281_v24  ;;  %3836 = vmatprep.subr.bf16.mxu1 %v7283_v25  ;;  %v9487_v24 = vcombine.low %v9431_v62, %v9434_v63  ;;  %v675_v25 = vld [vmem:[%s9378_s17 + $0x468] sm:$0xff]  ;;  %v682_v62 = vld [vmem:[%s9378_s17 + $0x4a0] sm:$0xff]  ;;  %v9500_v63 = vcombine.high %v9491_v26, %v9494_v27  ;;  %v7344_v35 = vcombine.low %v670_v21, %v674_v22 }
 0x12f   : > { %v7346_v36 = vcombine.low %v671_v23, %v675_v25  ;;  %v691_v42 = vld [vmem:[%s9378_s17 + $0x4e8] sm:$0xff] }
 0x130   : > { %v699_v50 = vld [vmem:[%s9378_s17 + $0x528] sm:$0xff] }
 0x131   : > { %3665 = vmatpush1.bf16.msra.mxu0 %v7280_v30  ;;  %3837 = vmatpush1.bf16.msra.mxu1 %v7282_v31  ;;  %v7345_v30 = vcombine.high %v670_v21, %v674_v22  ;;  %v7347_v31 = vcombine.high %v671_v23, %v675_v25  ;;  %v707_v58 = vld [vmem:[%s9378_s17 + $0x568] sm:$0xff] }
 0x132   : > { %3666 = vmatprep.subr.bf16.mxu0 %v7289_v32  ;;  %3838 = vmatprep.subr.bf16.mxu1 %v7291_v33  ;;  %v678_v32 = vld [vmem:[%s9378_s17 + $0x480] sm:$0xff]  ;;  %v679_v33 = vld [vmem:[%s9378_s17 + $0x488] sm:$0xff] }
 0x133   : > { %v7353_v37 = vcombine.high %v678_v32, %v682_v62  ;;  %v7352_v43 = vcombine.low %v678_v32, %v682_v62  ;;  %v7354_v44 = vcombine.low %v679_v33, %v683_v34  ;;  %v715_v5 = vld [vmem:[%s9378_s17 + $0x5a8] sm:$0xff] }
 0x134   : > { %v723_v13 = vld [vmem:[%s9378_s17 + $0x5e8] sm:$0xff] }
 0x135   : > { %3667 = vmatpush1.bf16.msra.mxu0 %v7288_v38  ;;  %3839 = vmatpush1.bf16.msra.mxu1 %v7290_v39  ;;  %v7355_v38 = vcombine.high %v679_v33, %v683_v34  ;;  %v686_v39 = vld [vmem:[%s9378_s17 + $0x4c0] sm:$0xff]  ;;  %v731_v21 = vld [vmem:[%s9378_s17 + $0x628] sm:$0xff] }
 0x136   : > { %3668 = vmatprep.subr.bf16.mxu0 %v7297_v40  ;;  %3840 = vmatprep.subr.bf16.mxu1 %v7299_v41  ;;  %v690_v40 = vld [vmem:[%s9378_s17 + $0x4e0] sm:$0xff]  ;;  %v687_v41 = vld [vmem:[%s9378_s17 + $0x4c8] sm:$0xff] }
 0x137   : > { %v7361_v45 = vcombine.high %v686_v39, %v690_v40  ;;  %v7360_v51 = vcombine.low %v686_v39, %v690_v40  ;;  %v7362_v52 = vcombine.low %v687_v41, %v691_v42  ;;  %v739_v32 = vld [vmem:[%s9378_s17 + $0x668] sm:$0xff] }
 0x138   : > { %v747_v39 = vld [vmem:[%s9378_s17 + $0x6a8] sm:$0xff] }
 0x139   : > { %3669 = vmatpush1.bf16.msra.mxu0 %v7296_v46  ;;  %3841 = vmatpush1.bf16.msra.mxu1 %v7298_v47  ;;  %v7363_v46 = vcombine.high %v687_v41, %v691_v42  ;;  %v694_v47 = vld [vmem:[%s9378_s17 + $0x500] sm:$0xff] }
 0x13a   : > { %3670 = vmatprep.subr.bf16.mxu0 %v7305_v48  ;;  %3842 = vmatprep.subr.bf16.mxu1 %v7307_v49  ;;  %v698_v48 = vld [vmem:[%s9378_s17 + $0x520] sm:$0xff]  ;;  %v695_v49 = vld [vmem:[%s9378_s17 + $0x508] sm:$0xff] }
 0x13b   : > { %v7369_v53 = vcombine.high %v694_v47, %v698_v48  ;;  %v7368_v59 = vcombine.low %v694_v47, %v698_v48  ;;  %v7370_v60 = vcombine.low %v695_v49, %v699_v50  ;;  %v755_v47 = vld [vmem:[%s9378_s17 + $0x6e8] sm:$0xff] }
 0x13d   : > { %3671 = vmatpush1.bf16.msra.mxu0 %v7304_v54  ;;  %3843 = vmatpush1.bf16.msra.mxu1 %v7306_v55  ;;  %v7371_v54 = vcombine.high %v695_v49, %v699_v50  ;;  %v702_v55 = vld [vmem:[%s9378_s17 + $0x540] sm:$0xff] }
 0x13e   : > { %3672 = vmatprep.subr.bf16.mxu0 %v7313_v56  ;;  %3844 = vmatprep.subr.bf16.mxu1 %v7315_v57  ;;  %v706_v56 = vld [vmem:[%s9378_s17 + $0x560] sm:$0xff]  ;;  %v703_v57 = vld [vmem:[%s9378_s17 + $0x548] sm:$0xff] }
 0x13f   : > { %v7377_v61 = vcombine.high %v702_v55, %v706_v56  ;;  %v7376_v6 = vcombine.low %v702_v55, %v706_v56  ;;  %v7378_v7 = vcombine.low %v703_v57, %v707_v58  ;;  %v763_v55 = vld [vmem:[%s9378_s17 + $0x728] sm:$0xff] }
 0x141   : > { %3673 = vmatpush1.bf16.msra.mxu0 %v7312_v0  ;;  %3845 = vmatpush1.bf16.msra.mxu1 %v7314_v1  ;;  %v7379_v0 = vcombine.high %v703_v57, %v707_v58  ;;  %v710_v1 = vld [vmem:[%s9378_s17 + $0x580] sm:$0xff] }
 0x142   : > { %3674 = vmatprep.subr.bf16.mxu0 %v7321_v2  ;;  %3846 = vmatprep.subr.bf16.mxu1 %v7323_v4  ;;  %v714_v2 = vld [vmem:[%s9378_s17 + $0x5a0] sm:$0xff]  ;;  %v711_v4 = vld [vmem:[%s9378_s17 + $0x588] sm:$0xff] }
 0x143   : > { %v7385_v8 = vcombine.high %v710_v1, %v714_v2  ;;  %v7384_v14 = vcombine.low %v710_v1, %v714_v2  ;;  %v7386_v15 = vcombine.low %v711_v4, %v715_v5  ;;  %v771_v1 = vld [vmem:[%s9378_s17 + $0x768] sm:$0xff] }
 0x145   : > { %3675 = vmatpush1.bf16.msra.mxu0 %v7320_v9  ;;  %3847 = vmatpush1.bf16.msra.mxu1 %v7322_v10  ;;  %v7387_v9 = vcombine.high %v711_v4, %v715_v5  ;;  %v718_v10 = vld [vmem:[%s9378_s17 + $0x5c0] sm:$0xff] }
 0x146   : > { %3676 = vmatprep.subr.bf16.mxu0 %v7329_v11  ;;  %3848 = vmatprep.subr.bf16.mxu1 %v7331_v12  ;;  %v722_v11 = vld [vmem:[%s9378_s17 + $0x5e0] sm:$0xff]  ;;  %v719_v12 = vld [vmem:[%s9378_s17 + $0x5c8] sm:$0xff] }
 0x147   : > { %v7393_v16 = vcombine.high %v718_v10, %v722_v11  ;;  %v7392_v22 = vcombine.low %v718_v10, %v722_v11  ;;  %v7394_v23 = vcombine.low %v719_v12, %v723_v13  ;;  %v779_v10 = vld [vmem:[%s9378_s17 + $0x7a8] sm:$0xff] }
 0x149   : > { %3677 = vmatpush1.bf16.msra.mxu0 %v7328_v17  ;;  %3849 = vmatpush1.bf16.msra.mxu1 %v7330_v18  ;;  %v7395_v17 = vcombine.high %v719_v12, %v723_v13  ;;  %v726_v18 = vld [vmem:[%s9378_s17 + $0x600] sm:$0xff] }
 0x14a   : > { %3689 = vmatprep.subr.bf16.mxu0 %v7337_v19  ;;  %3861 = vmatprep.subr.bf16.mxu1 %v7339_v20  ;;  %v730_v19 = vld [vmem:[%s9378_s17 + $0x620] sm:$0xff]  ;;  %v727_v20 = vld [vmem:[%s9378_s17 + $0x608] sm:$0xff] }
 0x14b   : > { %v7401_v25 = vcombine.high %v726_v18, %v730_v19  ;;  %v7400_v62 = vcombine.low %v726_v18, %v730_v19  ;;  %v7402_v33 = vcombine.low %v727_v20, %v731_v21  ;;  %v787_v18 = vld [vmem:[%s9378_s17 + $0x7e8] sm:$0xff] }
 0x14c   : > { %3679 = vmatmul.mubr.bf16.vlgmr.msra.gmra.mrb[0].mxu0 %v9487_v24  ;;  %3851 = vmatmul.mubr.bf16.vlgmr.msra.gmra.mrb[0].mxu1 %v9487_v24 }
 0x14d   : > { %3690 = vmatpush1.bf16.msra.mxu0 %v7336_v28  ;;  %3862 = vmatpush1.bf16.msra.mxu1 %v7338_v29  ;;  %v7403_v28 = vcombine.high %v727_v20, %v731_v21  ;;  %v734_v29 = vld [vmem:[%s9378_s17 + $0x640] sm:$0xff] }
 0x14e   : > { %3691 = vmatprep.subr.bf16.mxu0 %v7345_v30  ;;  %3863 = vmatprep.subr.bf16.mxu1 %v7347_v31  ;;  %v738_v30 = vld [vmem:[%s9378_s17 + $0x660] sm:$0xff]  ;;  %v735_v31 = vld [vmem:[%s9378_s17 + $0x648] sm:$0xff] }
 0x14f   : > { %3721 = vmatprep.mubr.bf16.mxu0 %v9500_v63  ;;  %3893 = vmatprep.mubr.bf16.mxu1 %v9500_v63  ;;  %v7409_v34 = vcombine.high %v734_v29, %v738_v30  ;;  %v7408_v40 = vcombine.low %v734_v29, %v738_v30  ;;  %v7410_v41 = vcombine.low %v735_v31, %v739_v32  ;;  %v795_v29 = vld [vmem:[%s9378_s17 + $0x828] sm:$0xff] }
 0x151   : > { %3692 = vmatpush1.bf16.msra.mxu0 %v7344_v35  ;;  %3864 = vmatpush1.bf16.msra.mxu1 %v7346_v36  ;;  %v7411_v35 = vcombine.high %v735_v31, %v739_v32  ;;  %v742_v36 = vld [vmem:[%s9378_s17 + $0x680] sm:$0xff] }
 0x152   : > { %3693 = vmatprep.subr.bf16.mxu0 %v7353_v37  ;;  %3865 = vmatprep.subr.bf16.mxu1 %v7355_v38  ;;  %v746_v37 = vld [vmem:[%s9378_s17 + $0x6a0] sm:$0xff]  ;;  %v743_v38 = vld [vmem:[%s9378_s17 + $0x688] sm:$0xff] }
 0x153   : > { %v7417_v42 = vcombine.high %v742_v36, %v746_v37  ;;  %v7416_v48 = vcombine.low %v742_v36, %v746_v37  ;;  %v7418_v49 = vcombine.low %v743_v38, %v747_v39  ;;  %v9569_v36 = vcombine.low %v9491_v26, %v9494_v27  ;;  %v803_v37 = vld [vmem:[%s9378_s17 + $0x868] sm:$0xff]  ;;  %v810_v26 = vld [vmem:[%s9378_s17 + $0x8a0] sm:$0xff] }
 0x155   : > { %3694 = vmatpush1.bf16.msra.mxu0 %v7352_v43  ;;  %3866 = vmatpush1.bf16.msra.mxu1 %v7354_v44  ;;  %v7419_v43 = vcombine.high %v743_v38, %v747_v39  ;;  %v750_v44 = vld [vmem:[%s9378_s17 + $0x6c0] sm:$0xff]  ;;  %v9573_v38 = vld [vmem:[%s9376_s12 + $0x10] sm:$0xff] }
 0x156   : > { %3695 = vmatprep.subr.bf16.mxu0 %v7361_v45  ;;  %3867 = vmatprep.subr.bf16.mxu1 %v7363_v46  ;;  %v754_v45 = vld [vmem:[%s9378_s17 + $0x6e0] sm:$0xff]  ;;  %v751_v46 = vld [vmem:[%s9378_s17 + $0x6c8] sm:$0xff]  ;;  %v9576_v39 = vld [vmem:[%s9376_s12 + $0x30] sm:$0xff] }
 0x157   : > { %v7425_v50 = vcombine.high %v750_v44, %v754_v45  ;;  %v7424_v56 = vcombine.low %v750_v44, %v754_v45  ;;  %v7426_v57 = vcombine.low %v751_v46, %v755_v47  ;;  %v806_v44 = vld [vmem:[%s9378_s17 + $0x880] sm:$0xff]  ;;  %v9582_v27 = vcombine.high %v9573_v38, %v9576_v39  ;;  %v807_v45 = vld [vmem:[%s9378_s17 + $0x888] sm:$0xff] }
 0x159   : > { %3696 = vmatpush1.bf16.msra.mxu0 %v7360_v51  ;;  %3868 = vmatpush1.bf16.msra.mxu1 %v7362_v52  ;;  %v7427_v51 = vcombine.high %v751_v46, %v755_v47  ;;  %v758_v52 = vld [vmem:[%s9378_s17 + $0x700] sm:$0xff]  ;;  %v811_v46 = vld [vmem:[%s9378_s17 + $0x8a8] sm:$0xff] }
 0x15a   : > { %3697 = vmatprep.subr.bf16.mxu0 %v7369_v53  ;;  %3869 = vmatprep.subr.bf16.mxu1 %v7371_v54  ;;  %v762_v53 = vld [vmem:[%s9378_s17 + $0x720] sm:$0xff]  ;;  %v759_v54 = vld [vmem:[%s9378_s17 + $0x708] sm:$0xff] }
 0x15b   : > { %v7433_v58 = vcombine.high %v758_v52, %v762_v53  ;;  %v7432_v2 = vcombine.low %v758_v52, %v762_v53  ;;  %v7434_v4 = vcombine.low %v759_v54, %v763_v55  ;;  %v818_v52 = vld [vmem:[%s9378_s17 + $0x8e0] sm:$0xff]  ;;  %v815_v53 = vld [vmem:[%s9378_s17 + $0x8c8] sm:$0xff] }
 0x15d   : > { %3698 = vmatpush1.bf16.msra.mxu0 %v7368_v59  ;;  %3870 = vmatpush1.bf16.msra.mxu1 %v7370_v60  ;;  %v7435_v59 = vcombine.high %v759_v54, %v763_v55  ;;  %v766_v60 = vld [vmem:[%s9378_s17 + $0x740] sm:$0xff]  ;;  %v819_v54 = vld [vmem:[%s9378_s17 + $0x8e8] sm:$0xff]  ;;  %v7480_v55 = vcombine.low %v806_v44, %v810_v26 }
 0x15e   : > { %3699 = vmatprep.subr.bf16.mxu0 %v7377_v61  ;;  %3871 = vmatprep.subr.bf16.mxu1 %v7379_v0  ;;  %v770_v61 = vld [vmem:[%s9378_s17 + $0x760] sm:$0xff]  ;;  %v767_v0 = vld [vmem:[%s9378_s17 + $0x748] sm:$0xff] }
 0x15f   : > { %v7441_v5 = vcombine.high %v766_v60, %v770_v61  ;;  %v7440_v11 = vcombine.low %v766_v60, %v770_v61  ;;  %v7442_v12 = vcombine.low %v767_v0, %v771_v1  ;;  %v826_v60 = vld [vmem:[%s9378_s17 + $0x920] sm:$0xff]  ;;  %v823_v61 = vld [vmem:[%s9378_s17 + $0x908] sm:$0xff] }
 0x161   : > { %3700 = vmatpush1.bf16.msra.mxu0 %v7376_v6  ;;  %3872 = vmatpush1.bf16.msra.mxu1 %v7378_v7  ;;  %v7443_v6 = vcombine.high %v767_v0, %v771_v1  ;;  %v774_v7 = vld [vmem:[%s9378_s17 + $0x780] sm:$0xff]  ;;  %v827_v0 = vld [vmem:[%s9378_s17 + $0x928] sm:$0xff] }
 0x162   : > { %3701 = vmatprep.subr.bf16.mxu0 %v7385_v8  ;;  %3873 = vmatprep.subr.bf16.mxu1 %v7387_v9  ;;  %v778_v8 = vld [vmem:[%s9378_s17 + $0x7a0] sm:$0xff]  ;;  %v775_v9 = vld [vmem:[%s9378_s17 + $0x788] sm:$0xff] }
 0x163   : > { %v7449_v13 = vcombine.high %v774_v7, %v778_v8  ;;  %v7448_v19 = vcombine.low %v774_v7, %v778_v8  ;;  %v7450_v20 = vcombine.low %v775_v9, %v779_v10  ;;  %v834_v7 = vld [vmem:[%s9378_s17 + $0x960] sm:$0xff]  ;;  %v831_v8 = vld [vmem:[%s9378_s17 + $0x948] sm:$0xff] }
 0x165   : > { %3702 = vmatpush1.bf16.msra.mxu0 %v7384_v14  ;;  %3874 = vmatpush1.bf16.msra.mxu1 %v7386_v15  ;;  %v7451_v14 = vcombine.high %v775_v9, %v779_v10  ;;  %v782_v15 = vld [vmem:[%s9378_s17 + $0x7c0] sm:$0xff]  ;;  %v835_v9 = vld [vmem:[%s9378_s17 + $0x968] sm:$0xff] }
 0x166   : > { %3703 = vmatprep.subr.bf16.mxu0 %v7393_v16  ;;  %3875 = vmatprep.subr.bf16.mxu1 %v7395_v17  ;;  %v786_v16 = vld [vmem:[%s9378_s17 + $0x7e0] sm:$0xff]  ;;  %v783_v17 = vld [vmem:[%s9378_s17 + $0x7c8] sm:$0xff] }
 0x167   : > { %v7457_v21 = vcombine.high %v782_v15, %v786_v16  ;;  %v7456_v30 = vcombine.low %v782_v15, %v786_v16  ;;  %v7458_v31 = vcombine.low %v783_v17, %v787_v18  ;;  %v842_v15 = vld [vmem:[%s9378_s17 + $0x9a0] sm:$0xff]  ;;  %v839_v16 = vld [vmem:[%s9378_s17 + $0x988] sm:$0xff] }
 0x169   : > { %3704 = vmatpush1.bf16.msra.mxu0 %v7392_v22  ;;  %3876 = vmatpush1.bf16.msra.mxu1 %v7394_v23  ;;  %v7459_v22 = vcombine.high %v783_v17, %v787_v18  ;;  %v790_v23 = vld [vmem:[%s9378_s17 + $0x800] sm:$0xff]  ;;  %v843_v17 = vld [vmem:[%s9378_s17 + $0x9a8] sm:$0xff] }
 0x16a   : > { %3705 = vmatprep.subr.bf16.mxu0 %v7401_v25  ;;  %3877 = vmatprep.subr.bf16.mxu1 %v7403_v28  ;;  %v794_v25 = vld [vmem:[%s9378_s17 + $0x820] sm:$0xff]  ;;  %v791_v28 = vld [vmem:[%s9378_s17 + $0x808] sm:$0xff] }
 0x16b   : > { %v7465_v32 = vcombine.high %v790_v23, %v794_v25 }
 0x16d   : > { %3706 = vmatpush1.bf16.msra.mxu0 %v7400_v62  ;;  %3878 = vmatpush1.bf16.msra.mxu1 %v7402_v33  ;;  %v7467_v62 = vcombine.high %v791_v28, %v795_v29  ;;  %v798_v33 = vld [vmem:[%s9378_s17 + $0x840] sm:$0xff] }
 0x16e   : > { %3707 = vmatprep.subr.bf16.mxu0 %v7409_v34  ;;  %3879 = vmatprep.subr.bf16.mxu1 %v7411_v35  ;;  %v802_v34 = vld [vmem:[%s9378_s17 + $0x860] sm:$0xff]  ;;  %v799_v35 = vld [vmem:[%s9378_s17 + $0x848] sm:$0xff] }
 0x16f   : > { %v7472_v47 = vcombine.low %v798_v33, %v802_v34 }
 0x171   : > { %3708 = vmatpush1.bf16.msra.mxu0 %v7408_v40  ;;  %3880 = vmatpush1.bf16.msra.mxu1 %v7410_v41  ;;  %v7464_v40 = vcombine.low %v790_v23, %v794_v25  ;;  %v7466_v41 = vcombine.low %v791_v28, %v795_v29  ;;  %v850_v23 = vld [vmem:[%s9378_s17 + $0x9e0] sm:$0xff]  ;;  %v847_v25 = vld [vmem:[%s9378_s17 + $0x9c8] sm:$0xff] }
 0x172   : > { %3709 = vmatprep.subr.bf16.mxu0 %v7417_v42  ;;  %3881 = vmatprep.subr.bf16.mxu1 %v7419_v43  ;;  %v7473_v42 = vcombine.high %v798_v33, %v802_v34  ;;  %v7475_v43 = vcombine.high %v799_v35, %v803_v37  ;;  %v851_v28 = vld [vmem:[%s9378_s17 + $0x9e8] sm:$0xff]  ;;  %v858_v33 = vld [vmem:[%s9378_s17 + $0xa20] sm:$0xff] }
 0x173   : > { %v855_v34 = vld [vmem:[%s9378_s17 + $0xa08] sm:$0xff] }
 0x175   : > { %3710 = vmatpush1.bf16.msra.mxu0 %v7416_v48  ;;  %3882 = vmatpush1.bf16.msra.mxu1 %v7418_v49  ;;  %v7474_v48 = vcombine.low %v799_v35, %v803_v37  ;;  %v7481_v49 = vcombine.high %v806_v44, %v810_v26  ;;  %v859_v35 = vld [vmem:[%s9378_s17 + $0xa28] sm:$0xff]  ;;  %v866_v44 = vld [vmem:[%s9378_s17 + $0xa60] sm:$0xff] }
 0x176   : > { %3711 = vmatprep.subr.bf16.mxu0 %v7425_v50  ;;  %3883 = vmatprep.subr.bf16.mxu1 %v7427_v51  ;;  %v7483_v50 = vcombine.high %v807_v45, %v811_v46  ;;  %v814_v51 = vld [vmem:[%s9378_s17 + $0x8c0] sm:$0xff]  ;;  %v863_v26 = vld [vmem:[%s9378_s17 + $0xa48] sm:$0xff] }
 0x177   : > { %v7488_v1 = vcombine.low %v814_v51, %v818_v52 }
 0x179   : > { %3712 = vmatpush1.bf16.msra.mxu0 %v7424_v56  ;;  %3884 = vmatpush1.bf16.msra.mxu1 %v7426_v57  ;;  %v7482_v56 = vcombine.low %v807_v45, %v811_v46  ;;  %v7489_v57 = vcombine.high %v814_v51, %v818_v52  ;;  %v867_v45 = vld [vmem:[%s9378_s17 + $0xa68] sm:$0xff]  ;;  %v874_v51 = vld [vmem:[%s9378_s17 + $0xaa0] sm:$0xff] }
 0x17a   : > { %3713 = vmatprep.subr.bf16.mxu0 %v7433_v58  ;;  %3885 = vmatprep.subr.bf16.mxu1 %v7435_v59  ;;  %v7491_v58 = vcombine.high %v815_v53, %v819_v54  ;;  %v822_v59 = vld [vmem:[%s9378_s17 + $0x900] sm:$0xff]  ;;  %v871_v52 = vld [vmem:[%s9378_s17 + $0xa88] sm:$0xff] }
 0x17b   : > { %v7496_v10 = vcombine.low %v822_v59, %v826_v60 }
 0x17d   : > { %3714 = vmatpush1.bf16.msra.mxu0 %v7432_v2  ;;  %3886 = vmatpush1.bf16.msra.mxu1 %v7434_v4  ;;  %v7490_v2 = vcombine.low %v815_v53, %v819_v54  ;;  %v7497_v4 = vcombine.high %v822_v59, %v826_v60  ;;  %v875_v53 = vld [vmem:[%s9378_s17 + $0xaa8] sm:$0xff]  ;;  %v882_v59 = vld [vmem:[%s9378_s17 + $0xae0] sm:$0xff] }
 0x17e   : > { %3715 = vmatprep.subr.bf16.mxu0 %v7441_v5  ;;  %3887 = vmatprep.subr.bf16.mxu1 %v7443_v6  ;;  %v7499_v5 = vcombine.high %v823_v61, %v827_v0  ;;  %v830_v6 = vld [vmem:[%s9378_s17 + $0x940] sm:$0xff]  ;;  %v879_v60 = vld [vmem:[%s9378_s17 + $0xac8] sm:$0xff] }
 0x17f   : > { %v7504_v18 = vcombine.low %v830_v6, %v834_v7 }
 0x181   : > { %3716 = vmatpush1.bf16.msra.mxu0 %v7440_v11  ;;  %3888 = vmatpush1.bf16.msra.mxu1 %v7442_v12  ;;  %v7498_v11 = vcombine.low %v823_v61, %v827_v0  ;;  %v7505_v12 = vcombine.high %v830_v6, %v834_v7  ;;  %v883_v61 = vld [vmem:[%s9378_s17 + $0xae8] sm:$0xff]  ;;  %v890_v6 = vld [vmem:[%s9378_s17 + $0xb20] sm:$0xff] }
 0x182   : > { %3717 = vmatprep.subr.bf16.mxu0 %v7449_v13  ;;  %3889 = vmatprep.subr.bf16.mxu1 %v7451_v14  ;;  %v7507_v13 = vcombine.high %v831_v8, %v835_v9  ;;  %v838_v14 = vld [vmem:[%s9378_s17 + $0x980] sm:$0xff]  ;;  %v887_v7 = vld [vmem:[%s9378_s17 + $0xb08] sm:$0xff] }
 0x183   : > { %v7512_v29 = vcombine.low %v838_v14, %v842_v15 }
 0x185   : > { %3718 = vmatpush1.bf16.msra.mxu0 %v7448_v19  ;;  %3890 = vmatpush1.bf16.msra.mxu1 %v7450_v20  ;;  %v7506_v19 = vcombine.low %v831_v8, %v835_v9  ;;  %v7513_v20 = vcombine.high %v838_v14, %v842_v15  ;;  %v891_v8 = vld [vmem:[%s9378_s17 + $0xb28] sm:$0xff]  ;;  %v898_v14 = vld [vmem:[%s9378_s17 + $0xb60] sm:$0xff] }
 0x186   : > { %3719 = vmatprep.subr.bf16.mxu0 %v7457_v21  ;;  %3891 = vmatprep.subr.bf16.mxu1 %v7459_v22  ;;  %v7515_v21 = vcombine.high %v839_v16, %v843_v17  ;;  %v846_v22 = vld [vmem:[%s9378_s17 + $0x9c0] sm:$0xff]  ;;  %v895_v15 = vld [vmem:[%s9378_s17 + $0xb48] sm:$0xff] }
 0x187   : > { %v7520_v37 = vcombine.low %v846_v22, %v850_v23 }
 0x189   : > { %3720 = vmatpush1.bf16.msra.mxu0 %v7456_v30  ;;  %3892 = vmatpush1.bf16.msra.mxu1 %v7458_v31  ;;  %v7514_v30 = vcombine.low %v839_v16, %v843_v17  ;;  %v7521_v31 = vcombine.high %v846_v22, %v850_v23  ;;  %v899_v16 = vld [vmem:[%s9378_s17 + $0xb68] sm:$0xff]  ;;  %v906_v22 = vld [vmem:[%s9378_s17 + $0xba0] sm:$0xff] }
 0x18a   : > { %3732 = vmatprep.subr.bf16.mxu0 %v7465_v32  ;;  %3904 = vmatprep.subr.bf16.mxu1 %v7467_v62  ;;  %v7523_v32 = vcombine.high %v847_v25, %v851_v28  ;;  %v854_v62 = vld [vmem:[%s9378_s17 + $0xa00] sm:$0xff]  ;;  %v903_v23 = vld [vmem:[%s9378_s17 + $0xb88] sm:$0xff] }
 0x18b   : > { %v7528_v46 = vcombine.low %v854_v62, %v858_v33 }
 0x18c   : > { %3722 = vmatmul.mubr.bf16.vlgmr.msra.gmra.mrb[0].mxu0 %v9569_v36  ;;  %3894 = vmatmul.mubr.bf16.vlgmr.msra.gmra.mrb[0].mxu1 %v9569_v36 }
 0x18d   : > { %3733 = vmatpush1.bf16.msra.mxu0 %v7464_v40  ;;  %3905 = vmatpush1.bf16.msra.mxu1 %v7466_v41  ;;  %v7522_v40 = vcombine.low %v847_v25, %v851_v28  ;;  %v7529_v41 = vcombine.high %v854_v62, %v858_v33  ;;  %v907_v25 = vld [vmem:[%s9378_s17 + $0xba8] sm:$0xff]  ;;  %v914_v62 = vld [vmem:[%s9378_s17 + $0xbe0] sm:$0xff] }
 0x18e   : > { %3734 = vmatprep.subr.bf16.mxu0 %v7473_v42  ;;  %3906 = vmatprep.subr.bf16.mxu1 %v7475_v43  ;;  %v7531_v42 = vcombine.high %v855_v34, %v859_v35  ;;  %v862_v43 = vld [vmem:[%s9378_s17 + $0xa40] sm:$0xff]  ;;  %v911_v33 = vld [vmem:[%s9378_s17 + $0xbc8] sm:$0xff] }
 0x18f   : > { %3764 = vmatprep.mubr.bf16.mxu0 %v9582_v27  ;;  %3936 = vmatprep.mubr.bf16.mxu1 %v9582_v27  ;;  %v7536_v54 = vcombine.low %v862_v43, %v866_v44 }
 0x191   : > { %3735 = vmatpush1.bf16.msra.mxu0 %v7472_v47  ;;  %3907 = vmatpush1.bf16.msra.mxu1 %v7474_v48  ;;  %v7530_v47 = vcombine.low %v855_v34, %v859_v35  ;;  %v7537_v48 = vcombine.high %v862_v43, %v866_v44  ;;  %v915_v34 = vld [vmem:[%s9378_s17 + $0xbe8] sm:$0xff]  ;;  %v922_v43 = vld [vmem:[%s9378_s17 + $0xc20] sm:$0xff] }
 0x192   : > { %3736 = vmatprep.subr.bf16.mxu0 %v7481_v49  ;;  %3908 = vmatprep.subr.bf16.mxu1 %v7483_v50  ;;  %v7539_v49 = vcombine.high %v863_v26, %v867_v45  ;;  %v870_v50 = vld [vmem:[%s9378_s17 + $0xa80] sm:$0xff]  ;;  %v919_v44 = vld [vmem:[%s9378_s17 + $0xc08] sm:$0xff] }
 0x193   : > { %v7544_v0 = vcombine.low %v870_v50, %v874_v51 }
 0x195   : > { %3737 = vmatpush1.bf16.msra.mxu0 %v7480_v55  ;;  %3909 = vmatpush1.bf16.msra.mxu1 %v7482_v56  ;;  %v7538_v55 = vcombine.low %v863_v26, %v867_v45  ;;  %v7545_v56 = vcombine.high %v870_v50, %v874_v51  ;;  %v923_v26 = vld [vmem:[%s9378_s17 + $0xc28] sm:$0xff]  ;;  %v930_v50 = vld [vmem:[%s9378_s17 + $0xc60] sm:$0xff] }
 0x196   : > { %3738 = vmatprep.subr.bf16.mxu0 %v7489_v57  ;;  %3910 = vmatprep.subr.bf16.mxu1 %v7491_v58  ;;  %v7547_v57 = vcombine.high %v871_v52, %v875_v53  ;;  %v878_v58 = vld [vmem:[%s9378_s17 + $0xac0] sm:$0xff]  ;;  %v927_v51 = vld [vmem:[%s9378_s17 + $0xc48] sm:$0xff] }
 0x197   : > { %v7552_v9 = vcombine.low %v878_v58, %v882_v59 }
 0x199   : > { %3739 = vmatpush1.bf16.msra.mxu0 %v7488_v1  ;;  %3911 = vmatpush1.bf16.msra.mxu1 %v7490_v2  ;;  %v7546_v1 = vcombine.low %v871_v52, %v875_v53  ;;  %v7553_v2 = vcombine.high %v878_v58, %v882_v59  ;;  %v9651_v52 = vcombine.low %v9573_v38, %v9576_v39  ;;  %v931_v53 = vld [vmem:[%s9378_s17 + $0xc68] sm:$0xff]  ;;  %v938_v38 = vld [vmem:[%s9378_s17 + $0xca0] sm:$0xff] }
 0x19a   : > { %3740 = vmatprep.subr.bf16.mxu0 %v7497_v4  ;;  %3912 = vmatprep.subr.bf16.mxu1 %v7499_v5  ;;  %v7555_v4 = vcombine.high %v879_v60, %v883_v61  ;;  %v886_v5 = vld [vmem:[%s9378_s17 + $0xb00] sm:$0xff]  ;;  %v7603_v59 = vcombine.high %v927_v51, %v931_v53 }
 0x19b   : > { %v7560_v17 = vcombine.low %v886_v5, %v890_v6 }
 0x19d   : > { %3741 = vmatpush1.bf16.msra.mxu0 %v7496_v10  ;;  %3913 = vmatpush1.bf16.msra.mxu1 %v7498_v11  ;;  %v7554_v10 = vcombine.low %v879_v60, %v883_v61  ;;  %v7561_v11 = vcombine.high %v886_v5, %v890_v6  ;;  %v934_v60 = vld [vmem:[%s9378_s17 + $0xc80] sm:$0xff]  ;;  %v935_v61 = vld [vmem:[%s9378_s17 + $0xc88] sm:$0xff] }
 0x19e   : > { %3742 = vmatprep.subr.bf16.mxu0 %v7505_v12  ;;  %3914 = vmatprep.subr.bf16.mxu1 %v7507_v13  ;;  %v7563_v12 = vcombine.high %v887_v7, %v891_v8  ;;  %v894_v13 = vld [vmem:[%s9378_s17 + $0xb40] sm:$0xff] }
 0x19f   : > { %v7568_v28 = vcombine.low %v894_v13, %v898_v14  ;;  %v942_v6 = vld [vmem:[%s9378_s17 + $0xcc0] sm:$0xff] }
 0x1a1   : > { %3743 = vmatpush1.bf16.msra.mxu0 %v7504_v18  ;;  %3915 = vmatpush1.bf16.msra.mxu1 %v7506_v19  ;;  %v7562_v18 = vcombine.low %v887_v7, %v891_v8  ;;  %v7569_v19 = vcombine.high %v894_v13, %v898_v14  ;;  %v946_v7 = vld [vmem:[%s9378_s17 + $0xce0] sm:$0xff]  ;;  %v943_v8 = vld [vmem:[%s9378_s17 + $0xcc8] sm:$0xff] }
 0x1a2   : > { %3744 = vmatprep.subr.bf16.mxu0 %v7513_v20  ;;  %3916 = vmatprep.subr.bf16.mxu1 %v7515_v21  ;;  %v7571_v20 = vcombine.high %v895_v15, %v899_v16  ;;  %v902_v21 = vld [vmem:[%s9378_s17 + $0xb80] sm:$0xff] }
 0x1a3   : > { %v7576_v35 = vcombine.low %v902_v21, %v906_v22  ;;  %v950_v14 = vld [vmem:[%s9378_s17 + $0xd00] sm:$0xff] }
 0x1a5   : > { %3745 = vmatpush1.bf16.msra.mxu0 %v7512_v29  ;;  %3917 = vmatpush1.bf16.msra.mxu1 %v7514_v30  ;;  %v7570_v29 = vcombine.low %v895_v15, %v899_v16  ;;  %v7577_v30 = vcombine.high %v902_v21, %v906_v22  ;;  %v954_v15 = vld [vmem:[%s9378_s17 + $0xd20] sm:$0xff]  ;;  %v951_v16 = vld [vmem:[%s9378_s17 + $0xd08] sm:$0xff] }
 0x1a6   : > { %3746 = vmatprep.subr.bf16.mxu0 %v7521_v31  ;;  %3918 = vmatprep.subr.bf16.mxu1 %v7523_v32  ;;  %v7579_v31 = vcombine.high %v903_v23, %v907_v25  ;;  %v910_v32 = vld [vmem:[%s9378_s17 + $0xbc0] sm:$0xff] }
 0x1a7   : > { %v7584_v45 = vcombine.low %v910_v32, %v914_v62  ;;  %v958_v22 = vld [vmem:[%s9378_s17 + $0xd40] sm:$0xff] }
 0x1a9   : > { %3747 = vmatpush1.bf16.msra.mxu0 %v7520_v37  ;;  %3919 = vmatpush1.bf16.msra.mxu1 %v7522_v40  ;;  %v7578_v37 = vcombine.low %v903_v23, %v907_v25  ;;  %v7585_v40 = vcombine.high %v910_v32, %v914_v62  ;;  %v962_v23 = vld [vmem:[%s9378_s17 + $0xd60] sm:$0xff]  ;;  %v959_v25 = vld [vmem:[%s9378_s17 + $0xd48] sm:$0xff] }
 0x1aa   : > { %3748 = vmatprep.subr.bf16.mxu0 %v7529_v41  ;;  %3920 = vmatprep.subr.bf16.mxu1 %v7531_v42  ;;  %v7587_v41 = vcombine.high %v911_v33, %v915_v34  ;;  %v918_v42 = vld [vmem:[%s9378_s17 + $0xc00] sm:$0xff] }
 0x1ab   : > { %v966_v62 = vld [vmem:[%s9378_s17 + $0xd80] sm:$0xff] }
 0x1ad   : > { %3749 = vmatpush1.bf16.msra.mxu0 %v7528_v46  ;;  %3921 = vmatpush1.bf16.msra.mxu1 %v7530_v47  ;;  %v7586_v46 = vcombine.low %v911_v33, %v915_v34  ;;  %v7593_v47 = vcombine.high %v918_v42, %v922_v43  ;;  %v970_v33 = vld [vmem:[%s9378_s17 + $0xda0] sm:$0xff]  ;;  %v967_v34 = vld [vmem:[%s9378_s17 + $0xd88] sm:$0xff] }
 0x1ae   : > { %3750 = vmatprep.subr.bf16.mxu0 %v7537_v48  ;;  %3922 = vmatprep.subr.bf16.mxu1 %v7539_v49  ;;  %v7595_v48 = vcombine.high %v919_v44, %v923_v26  ;;  %v926_v49 = vld [vmem:[%s9378_s17 + $0xc40] sm:$0xff] }
 0x1af   : > { %v7601_v58 = vcombine.high %v926_v49, %v930_v50 }
 0x1b1   : > { %3751 = vmatpush1.bf16.msra.mxu0 %v7536_v54  ;;  %3923 = vmatpush1.bf16.msra.mxu1 %v7538_v55  ;;  %v9655_v54 = vld [vmem:[%s9376_s12 + $0x18] sm:$0xff] }
 0x1b2   : > { %3752 = vmatprep.subr.bf16.mxu0 %v7545_v56  ;;  %3924 = vmatprep.subr.bf16.mxu1 %v7547_v57  ;;  %v9658_v55 = vld [vmem:[%s9376_s12 + $0x38] sm:$0xff]  ;;  %v7592_v56 = vcombine.low %v918_v42, %v922_v43  ;;  %v7594_v57 = vcombine.low %v919_v44, %v923_v26  ;;  %v974_v43 = vld [vmem:[%s9378_s17 + $0xdc0] sm:$0xff]  ;;  %v975_v26 = vld [vmem:[%s9378_s17 + $0xdc8] sm:$0xff] }
 0x1b3   : > { %v9664_v39 = vcombine.high %v9655_v54, %v9658_v55  ;;  %v978_v44 = vld [vmem:[%s9378_s17 + $0xde0] sm:$0xff] }
 0x1b5   : > { %3753 = vmatpush1.bf16.msra.mxu0 %v7544_v0  ;;  %3925 = vmatpush1.bf16.msra.mxu1 %v7546_v1  ;;  %v939_v0 = vld [vmem:[%s9378_s17 + $0xca8] sm:$0xff]  ;;  %v7600_v1 = vcombine.low %v926_v49, %v930_v50  ;;  %v982_v50 = vld [vmem:[%s9378_s17 + $0xe00] sm:$0xff] }
 0x1b6   : > { %3754 = vmatprep.subr.bf16.mxu0 %v7553_v2  ;;  %3926 = vmatprep.subr.bf16.mxu1 %v7555_v4  ;;  %v7602_v2 = vcombine.low %v927_v51, %v931_v53  ;;  %v7609_v4 = vcombine.high %v934_v60, %v938_v38  ;;  %v7611_v5 = vcombine.high %v935_v61, %v939_v0  ;;  %v986_v51 = vld [vmem:[%s9378_s17 + $0xe20] sm:$0xff]  ;;  %v983_v53 = vld [vmem:[%s9378_s17 + $0xe08] sm:$0xff] }
 0x1b9   : > { %3755 = vmatpush1.bf16.msra.mxu0 %v7552_v9  ;;  %3927 = vmatpush1.bf16.msra.mxu1 %v7554_v10  ;;  %v947_v9 = vld [vmem:[%s9378_s17 + $0xce8] sm:$0xff]  ;;  %v7608_v10 = vcombine.low %v934_v60, %v938_v38  ;;  %v990_v38 = vld [vmem:[%s9378_s17 + $0xe40] sm:$0xff] }
 0x1ba   : > { %3756 = vmatprep.subr.bf16.mxu0 %v7561_v11  ;;  %3928 = vmatprep.subr.bf16.mxu1 %v7563_v12  ;;  %v7610_v11 = vcombine.low %v935_v61, %v939_v0  ;;  %v7617_v12 = vcombine.high %v942_v6, %v946_v7  ;;  %v7619_v13 = vcombine.high %v943_v8, %v947_v9  ;;  %v994_v61 = vld [vmem:[%s9378_s17 + $0xe60] sm:$0xff]  ;;  %v991_v0 = vld [vmem:[%s9378_s17 + $0xe48] sm:$0xff] }
 0x1bd   : > { %3757 = vmatpush1.bf16.msra.mxu0 %v7560_v17  ;;  %3929 = vmatpush1.bf16.msra.mxu1 %v7562_v18  ;;  %v955_v17 = vld [vmem:[%s9378_s17 + $0xd28] sm:$0xff]  ;;  %v7616_v18 = vcombine.low %v942_v6, %v946_v7  ;;  %v998_v7 = vld [vmem:[%s9378_s17 + $0xe80] sm:$0xff] }
 0x1be   : > { %3758 = vmatprep.subr.bf16.mxu0 %v7569_v19  ;;  %3930 = vmatprep.subr.bf16.mxu1 %v7571_v20  ;;  %v7618_v19 = vcombine.low %v943_v8, %v947_v9  ;;  %v7625_v20 = vcombine.high %v950_v14, %v954_v15  ;;  %v7627_v21 = vcombine.high %v951_v16, %v955_v17  ;;  %v1002_v8 = vld [vmem:[%s9378_s17 + $0xea0] sm:$0xff]  ;;  %v999_v9 = vld [vmem:[%s9378_s17 + $0xe88] sm:$0xff] }
 0x1c1   : > { %3759 = vmatpush1.bf16.msra.mxu0 %v7568_v28  ;;  %3931 = vmatpush1.bf16.msra.mxu1 %v7570_v29  ;;  %v963_v28 = vld [vmem:[%s9378_s17 + $0xd68] sm:$0xff]  ;;  %v7624_v29 = vcombine.low %v950_v14, %v954_v15  ;;  %v1006_v15 = vld [vmem:[%s9378_s17 + $0xec0] sm:$0xff] }
 0x1c2   : > { %3760 = vmatprep.subr.bf16.mxu0 %v7577_v30  ;;  %3932 = vmatprep.subr.bf16.mxu1 %v7579_v31  ;;  %v7626_v30 = vcombine.low %v951_v16, %v955_v17  ;;  %v7633_v31 = vcombine.high %v958_v22, %v962_v23  ;;  %v7635_v32 = vcombine.high %v959_v25, %v963_v28  ;;  %v1010_v16 = vld [vmem:[%s9378_s17 + $0xee0] sm:$0xff]  ;;  %v1007_v17 = vld [vmem:[%s9378_s17 + $0xec8] sm:$0xff] }
 0x1c5   : > { %3761 = vmatpush1.bf16.msra.mxu0 %v7576_v35  ;;  %3933 = vmatpush1.bf16.msra.mxu1 %v7578_v37  ;;  %v971_v35 = vld [vmem:[%s9378_s17 + $0xda8] sm:$0xff]  ;;  %v7632_v37 = vcombine.low %v958_v22, %v962_v23  ;;  %v1014_v23 = vld [vmem:[%s9378_s17 + $0xf00] sm:$0xff] }
 0x1c6   : > { %3762 = vmatprep.subr.bf16.mxu0 %v7585_v40  ;;  %3934 = vmatprep.subr.bf16.mxu1 %v7587_v41  ;;  %v7634_v40 = vcombine.low %v959_v25, %v963_v28  ;;  %v7641_v41 = vcombine.high %v966_v62, %v970_v33  ;;  %v7643_v42 = vcombine.high %v967_v34, %v971_v35  ;;  %v1018_v25 = vld [vmem:[%s9378_s17 + $0xf20] sm:$0xff]  ;;  %v1015_v28 = vld [vmem:[%s9378_s17 + $0xf08] sm:$0xff] }
 0x1c9   : > { %3763 = vmatpush1.bf16.msra.mxu0 %v7584_v45  ;;  %3935 = vmatpush1.bf16.msra.mxu1 %v7586_v46  ;;  %v979_v45 = vld [vmem:[%s9378_s17 + $0xde8] sm:$0xff]  ;;  %v7640_v46 = vcombine.low %v966_v62, %v970_v33  ;;  %v1022_v33 = vld [vmem:[%s9378_s17 + $0xf40] sm:$0xff] }
 0x1ca   : > { %3775 = vmatprep.subr.bf16.mxu0 %v7593_v47  ;;  %3947 = vmatprep.subr.bf16.mxu1 %v7595_v48  ;;  %v7642_v47 = vcombine.low %v967_v34, %v971_v35  ;;  %v7649_v48 = vcombine.high %v974_v43, %v978_v44  ;;  %v7651_v49 = vcombine.high %v975_v26, %v979_v45  ;;  %v1026_v34 = vld [vmem:[%s9378_s17 + $0xf60] sm:$0xff]  ;;  %v1023_v35 = vld [vmem:[%s9378_s17 + $0xf48] sm:$0xff] }
 0x1cc   : > { %3765 = vmatmul.mubr.bf16.vlgmr.msra.gmra.mrb[0].mxu0 %v9651_v52  ;;  %3937 = vmatmul.mubr.bf16.vlgmr.msra.gmra.mrb[0].mxu1 %v9651_v52 }
 0x1cd   : > { %3776 = vmatpush1.bf16.msra.mxu0 %v7592_v56  ;;  %3948 = vmatpush1.bf16.msra.mxu1 %v7594_v57  ;;  %v987_v56 = vld [vmem:[%s9378_s17 + $0xe28] sm:$0xff]  ;;  %v7648_v57 = vcombine.low %v974_v43, %v978_v44  ;;  %v1030_v44 = vld [vmem:[%s9378_s17 + $0xf80] sm:$0xff] }
 0x1ce   : > { %3777 = vmatprep.subr.bf16.mxu0 %v7601_v58  ;;  %3949 = vmatprep.subr.bf16.mxu1 %v7603_v59  ;;  %v7650_v58 = vcombine.low %v975_v26, %v979_v45  ;;  %v7657_v59 = vcombine.high %v982_v50, %v986_v51  ;;  %v7659_v60 = vcombine.high %v983_v53, %v987_v56  ;;  %v1034_v26 = vld [vmem:[%s9378_s17 + $0xfa0] sm:$0xff]  ;;  %v1031_v45 = vld [vmem:[%s9378_s17 + $0xf88] sm:$0xff] }
 0x1cf   : > { %3807 = vmatprep.mubr.bf16.mxu0 %v9664_v39  ;;  %3979 = vmatprep.mubr.bf16.mxu1 %v9664_v39 }
 0x1d1   : > { %3778 = vmatpush1.bf16.msra.mxu0 %v7600_v1  ;;  %3950 = vmatpush1.bf16.msra.mxu1 %v7602_v2  ;;  %v995_v1 = vld [vmem:[%s9378_s17 + $0xe68] sm:$0xff]  ;;  %v7656_v2 = vcombine.low %v982_v50, %v986_v51  ;;  %v1038_v51 = vld [vmem:[%s9378_s17 + $0xfc0] sm:$0xff] }
 0x1d2   : > { %3779 = vmatprep.subr.bf16.mxu0 %v7609_v4  ;;  %3951 = vmatprep.subr.bf16.mxu1 %v7611_v5  ;;  %v7658_v4 = vcombine.low %v983_v53, %v987_v56  ;;  %v7665_v5 = vcombine.high %v990_v38, %v994_v61  ;;  %v7667_v6 = vcombine.high %v991_v0, %v995_v1  ;;  %v1042_v53 = vld [vmem:[%s9378_s17 + $0xfe0] sm:$0xff]  ;;  %v1039_v56 = vld [vmem:[%s9378_s17 + $0xfc8] sm:$0xff] }
 0x1d5   : > { %3780 = vmatpush1.bf16.msra.mxu0 %v7608_v10  ;;  %3952 = vmatpush1.bf16.msra.mxu1 %v7610_v11  ;;  %v1003_v10 = vld [vmem:[%s9378_s17 + $0xea8] sm:$0xff]  ;;  %v7664_v11 = vcombine.low %v990_v38, %v994_v61  ;;  %v536_v61 = vld [vmem:[%s9378_s17 + $0x10] sm:$0xff] }
 0x1d6   : > { %3781 = vmatprep.subr.bf16.mxu0 %v7617_v12  ;;  %3953 = vmatprep.subr.bf16.mxu1 %v7619_v13  ;;  %v7666_v12 = vcombine.low %v991_v0, %v995_v1  ;;  %v7673_v13 = vcombine.high %v998_v7, %v1002_v8  ;;  %v7675_v14 = vcombine.high %v999_v9, %v1003_v10  ;;  %v540_v0 = vld [vmem:[%s9378_s17 + $0x30] sm:$0xff]  ;;  %v537_v1 = vld [vmem:[%s9378_s17 + $0x18] sm:$0xff] }
 0x1d9   : > { %3782 = vmatpush1.bf16.msra.mxu0 %v7616_v18  ;;  %3954 = vmatpush1.bf16.msra.mxu1 %v7618_v19  ;;  %v1011_v18 = vld [vmem:[%s9378_s17 + $0xee8] sm:$0xff]  ;;  %v7672_v19 = vcombine.low %v998_v7, %v1002_v8  ;;  %v544_v8 = vld [vmem:[%s9378_s17 + $0x50] sm:$0xff] }
 0x1da   : > { %3783 = vmatprep.subr.bf16.mxu0 %v7625_v20  ;;  %3955 = vmatprep.subr.bf16.mxu1 %v7627_v21  ;;  %v7674_v20 = vcombine.low %v999_v9, %v1003_v10  ;;  %v7681_v21 = vcombine.high %v1006_v15, %v1010_v16  ;;  %v7683_v22 = vcombine.high %v1007_v17, %v1011_v18  ;;  %v548_v9 = vld [vmem:[%s9378_s17 + $0x70] sm:$0xff] }
 0x1db   : > { %v9732_v10 = vcombine.low %v9655_v54, %v9658_v55  ;;  %v553_v54 = vld [vmem:[%s9378_s17 + $0x98] sm:$0xff] }
 0x1dc   : > { %v557_v55 = vld [vmem:[%s9378_s17 + $0xb8] sm:$0xff] }
 0x1dd   : > { %3784 = vmatpush1.bf16.msra.mxu0 %v7624_v29  ;;  %3956 = vmatpush1.bf16.msra.mxu1 %v7626_v30  ;;  %v1019_v29 = vld [vmem:[%s9378_s17 + $0xf28] sm:$0xff]  ;;  %v7680_v30 = vcombine.low %v1006_v15, %v1010_v16  ;;  %v7221_v15 = vcombine.high %v544_v8, %v548_v9 }
 0x1de   : > { %3785 = vmatprep.subr.bf16.mxu0 %v7633_v31  ;;  %3957 = vmatprep.subr.bf16.mxu1 %v7635_v32  ;;  %v7682_v31 = vcombine.low %v1007_v17, %v1011_v18  ;;  %v7689_v32 = vcombine.high %v1014_v23, %v1018_v25  ;;  %v7691_v62 = vcombine.high %v1015_v28, %v1019_v29  ;;  %v552_v17 = vld [vmem:[%s9378_s17 + $0x90] sm:$0xff] }
 0x1df   : > { %v556_v18 = vld [vmem:[%s9378_s17 + $0xb0] sm:$0xff] }
 0x1e1   : > { %3786 = vmatpush1.bf16.msra.mxu0 %v7632_v37  ;;  %3958 = vmatpush1.bf16.msra.mxu1 %v7634_v40  ;;  %v1027_v37 = vld [vmem:[%s9378_s17 + $0xf68] sm:$0xff]  ;;  %v7688_v40 = vcombine.low %v1014_v23, %v1018_v25  ;;  %v560_v23 = vld [vmem:[%s9378_s17 + $0xd0] sm:$0xff] }
 0x1e2   : > { %3787 = vmatprep.subr.bf16.mxu0 %v7641_v41  ;;  %3959 = vmatprep.subr.bf16.mxu1 %v7643_v42  ;;  %v7690_v41 = vcombine.low %v1015_v28, %v1019_v29  ;;  %v7697_v42 = vcombine.high %v1022_v33, %v1026_v34  ;;  %v7699_v43 = vcombine.high %v1023_v35, %v1027_v37  ;;  %v564_v25 = vld [vmem:[%s9378_s17 + $0xf0] sm:$0xff]  ;;  %v561_v28 = vld [vmem:[%s9378_s17 + $0xd8] sm:$0xff] }
 0x1e3   : > { %v565_v29 = vld [vmem:[%s9378_s17 + $0xf8] sm:$0xff] }
 0x1e5   : > { %3788 = vmatpush1.bf16.msra.mxu0 %v7640_v46  ;;  %3960 = vmatpush1.bf16.msra.mxu1 %v7642_v47  ;;  %v1035_v46 = vld [vmem:[%s9378_s17 + $0xfa8] sm:$0xff]  ;;  %v7696_v47 = vcombine.low %v1022_v33, %v1026_v34  ;;  %v568_v33 = vld [vmem:[%s9378_s17 + $0x110] sm:$0xff] }
 0x1e6   : > { %3789 = vmatprep.subr.bf16.mxu0 %v7649_v48  ;;  %3961 = vmatprep.subr.bf16.mxu1 %v7651_v49  ;;  %v7698_v48 = vcombine.low %v1023_v35, %v1027_v37  ;;  %v7705_v49 = vcombine.high %v1030_v44, %v1034_v26  ;;  %v7707_v50 = vcombine.high %v1031_v45, %v1035_v46  ;;  %v572_v34 = vld [vmem:[%s9378_s17 + $0x130] sm:$0xff]  ;;  %v569_v35 = vld [vmem:[%s9378_s17 + $0x118] sm:$0xff] }
 0x1e7   : > { %v573_v37 = vld [vmem:[%s9378_s17 + $0x138] sm:$0xff] }
 0x1e9   : > { %3790 = vmatpush1.bf16.msra.mxu0 %v7648_v57  ;;  %3962 = vmatpush1.bf16.msra.mxu1 %v7650_v58  ;;  %v1043_v57 = vld [vmem:[%s9378_s17 + $0xfe8] sm:$0xff]  ;;  %v7704_v58 = vcombine.low %v1030_v44, %v1034_v26  ;;  %v580_v44 = vld [vmem:[%s9378_s17 + $0x170] sm:$0xff]  ;;  %v577_v26 = vld [vmem:[%s9378_s17 + $0x158] sm:$0xff] }
 0x1ea   : > { %3791 = vmatprep.subr.bf16.mxu0 %v7657_v59  ;;  %3963 = vmatprep.subr.bf16.mxu1 %v7659_v60  ;;  %v7706_v59 = vcombine.low %v1031_v45, %v1035_v46  ;;  %v7713_v60 = vcombine.high %v1038_v51, %v1042_v53  ;;  %v7715_v38 = vcombine.high %v1039_v56, %v1043_v57  ;;  %v581_v45 = vld [vmem:[%s9378_s17 + $0x178] sm:$0xff] }
 0x1eb   : > { %v7244_v46 = vcombine.low %v568_v33, %v572_v34 }
 0x1ed   : > { %3792 = vmatpush1.bf16.msra.mxu0 %v7656_v2  ;;  %3964 = vmatpush1.bf16.msra.mxu1 %v7658_v4  ;;  %v541_v2 = vld [vmem:[%s9378_s17 + $0x38] sm:$0xff]  ;;  %v7712_v4 = vcombine.low %v1038_v51, %v1042_v53  ;;  %v588_v51 = vld [vmem:[%s9378_s17 + $0x1b0] sm:$0xff] }
 0x1ee   : > { %3793 = vmatprep.subr.bf16.mxu0 %v7665_v5  ;;  %3965 = vmatprep.subr.bf16.mxu1 %v7667_v6  ;;  %v7714_v5 = vcombine.low %v1039_v56, %v1043_v57  ;;  %v7213_v6 = vcombine.high %v536_v61, %v540_v0  ;;  %v7215_v7 = vcombine.high %v537_v1, %v541_v2  ;;  %v585_v53 = vld [vmem:[%s9378_s17 + $0x198] sm:$0xff] }
 0x1ef   : > { %v589_v56 = vld [vmem:[%s9378_s17 + $0x1b8] sm:$0xff] }
 0x1f1   : > { %3794 = vmatpush1.bf16.msra.mxu0 %v7664_v11  ;;  %3966 = vmatpush1.bf16.msra.mxu1 %v7666_v12  ;;  %v545_v11 = vld [vmem:[%s9378_s17 + $0x58] sm:$0xff] }
 0x1f2   : > { %3795 = vmatprep.subr.bf16.mxu0 %v7673_v13  ;;  %3967 = vmatprep.subr.bf16.mxu1 %v7675_v14  ;;  %v549_v12 = vld [vmem:[%s9378_s17 + $0x78] sm:$0xff]  ;;  %v7212_v13 = vcombine.low %v536_v61, %v540_v0  ;;  %v7214_v14 = vcombine.low %v537_v1, %v541_v2  ;;  %v596_v61 = vld [vmem:[%s9378_s17 + $0x1f0] sm:$0xff] }
 0x1f3   : > { %v7223_v16 = vcombine.high %v545_v11, %v549_v12  ;;  %v593_v0 = vld [vmem:[%s9378_s17 + $0x1d8] sm:$0xff] }
 0x1f4   : > { %v597_v1 = vld [vmem:[%s9378_s17 + $0x1f8] sm:$0xff] }
 0x1f5   : > { %3796 = vmatpush1.bf16.msra.mxu0 %v7672_v19  ;;  %3968 = vmatpush1.bf16.msra.mxu1 %v7674_v20  ;;  %v7220_v19 = vcombine.low %v544_v8, %v548_v9  ;;  %v7222_v20 = vcombine.low %v545_v11, %v549_v12  ;;  %v604_v8 = vld [vmem:[%s9378_s17 + $0x230] sm:$0xff]  ;;  %v601_v9 = vld [vmem:[%s9378_s17 + $0x218] sm:$0xff] }
 0x1f6   : > { %3797 = vmatprep.subr.bf16.mxu0 %v7681_v21  ;;  %3969 = vmatprep.subr.bf16.mxu1 %v7683_v22  ;;  %v7229_v21 = vcombine.high %v552_v17, %v556_v18  ;;  %v7231_v22 = vcombine.high %v553_v54, %v557_v55  ;;  %v605_v11 = vld [vmem:[%s9378_s17 + $0x238] sm:$0xff] }
 0x1f9   : > { %3798 = vmatpush1.bf16.msra.mxu0 %v7680_v30  ;;  %3970 = vmatpush1.bf16.msra.mxu1 %v7682_v31  ;;  %v7228_v30 = vcombine.low %v552_v17, %v556_v18  ;;  %v7230_v31 = vcombine.low %v553_v54, %v557_v55  ;;  %v612_v17 = vld [vmem:[%s9378_s17 + $0x270] sm:$0xff]  ;;  %v609_v18 = vld [vmem:[%s9378_s17 + $0x258] sm:$0xff] }
 0x1fa   : > { %3799 = vmatprep.subr.bf16.mxu0 %v7689_v32  ;;  %3971 = vmatprep.subr.bf16.mxu1 %v7691_v62  ;;  %v7237_v32 = vcombine.high %v560_v23, %v564_v25  ;;  %v7239_v62 = vcombine.high %v561_v28, %v565_v29  ;;  %v613_v54 = vld [vmem:[%s9378_s17 + $0x278] sm:$0xff] }
 0x1fd   : > { %3800 = vmatpush1.bf16.msra.mxu0 %v7688_v40  ;;  %3972 = vmatpush1.bf16.msra.mxu1 %v7690_v41  ;;  %v7236_v40 = vcombine.low %v560_v23, %v564_v25  ;;  %v7245_v41 = vcombine.high %v568_v33, %v572_v34  ;;  %v620_v23 = vld [vmem:[%s9378_s17 + $0x2b0] sm:$0xff]  ;;  %v617_v25 = vld [vmem:[%s9378_s17 + $0x298] sm:$0xff] }
 0x1fe   : > { %3801 = vmatprep.subr.bf16.mxu0 %v7697_v42  ;;  %3973 = vmatprep.subr.bf16.mxu1 %v7699_v43  ;;  %v7247_v42 = vcombine.high %v569_v35, %v573_v37  ;;  %v576_v43 = vld [vmem:[%s9378_s17 + $0x150] sm:$0xff]  ;;  %v625_v34 = vld [vmem:[%s9378_s17 + $0x2d8] sm:$0xff] }
 0x1ff   : > { %v7252_v57 = vcombine.low %v576_v43, %v580_v44  ;;  %v628_v33 = vld [vmem:[%s9378_s17 + $0x2f0] sm:$0xff] }
 0x201   : > { %3802 = vmatpush1.bf16.msra.mxu0 %v7696_v47  ;;  %3974 = vmatpush1.bf16.msra.mxu1 %v7698_v48  ;;  %v7246_v47 = vcombine.low %v569_v35, %v573_v37  ;;  %v7253_v48 = vcombine.high %v576_v43, %v580_v44  ;;  %v629_v35 = vld [vmem:[%s9378_s17 + $0x2f8] sm:$0xff]  ;;  %v636_v43 = vld [vmem:[%s9378_s17 + $0x330] sm:$0xff] }
 0x202   : > { %3803 = vmatprep.subr.bf16.mxu0 %v7705_v49  ;;  %3975 = vmatprep.subr.bf16.mxu1 %v7707_v50  ;;  %v7255_v49 = vcombine.high %v577_v26, %v581_v45  ;;  %v584_v50 = vld [vmem:[%s9378_s17 + $0x190] sm:$0xff]  ;;  %v633_v44 = vld [vmem:[%s9378_s17 + $0x318] sm:$0xff] }
 0x203   : > { %v7260_v2 = vcombine.low %v584_v50, %v588_v51 }
 0x205   : > { %3804 = vmatpush1.bf16.msra.mxu0 %v7704_v58  ;;  %3976 = vmatpush1.bf16.msra.mxu1 %v7706_v59  ;;  %v7254_v58 = vcombine.low %v577_v26, %v581_v45  ;;  %v7261_v59 = vcombine.high %v584_v50, %v588_v51  ;;  %v637_v26 = vld [vmem:[%s9378_s17 + $0x338] sm:$0xff]  ;;  %v644_v50 = vld [vmem:[%s9378_s17 + $0x370] sm:$0xff] }
 0x206   : > { %3805 = vmatprep.subr.bf16.mxu0 %v7713_v60  ;;  %3977 = vmatprep.subr.bf16.mxu1 %v7715_v38  ;;  %v7263_v60 = vcombine.high %v585_v53, %v589_v56  ;;  %v592_v38 = vld [vmem:[%s9378_s17 + $0x1d0] sm:$0xff]  ;;  %v641_v51 = vld [vmem:[%s9378_s17 + $0x358] sm:$0xff] }
 0x207   : > { %v7268_v12 = vcombine.low %v592_v38, %v596_v61 }
 0x209   : > { %3806 = vmatpush1.bf16.msra.mxu0 %v7712_v4  ;;  %3978 = vmatpush1.bf16.msra.mxu1 %v7714_v5  ;;  %v7262_v4 = vcombine.low %v585_v53, %v589_v56  ;;  %v7269_v5 = vcombine.high %v592_v38, %v596_v61  ;;  %v645_v53 = vld [vmem:[%s9378_s17 + $0x378] sm:$0xff]  ;;  %v652_v38 = vld [vmem:[%s9378_s17 + $0x3b0] sm:$0xff] }
 0x20a   : > { %3990 = vmatprep.subr.bf16.mxu0 %v7213_v6  ;;  %4162 = vmatprep.subr.bf16.mxu1 %v7215_v7  ;;  %v7271_v6 = vcombine.high %v593_v0, %v597_v1  ;;  %v600_v7 = vld [vmem:[%s9378_s17 + $0x210] sm:$0xff]  ;;  %v649_v61 = vld [vmem:[%s9378_s17 + $0x398] sm:$0xff] }
 0x20b   : > { %v7276_v55 = vcombine.low %v600_v7, %v604_v8 }
 0x20c   : > { %3808 = vmatmul.mubr.bf16.vlgmr.msra.gmra.mrb[0].mxu0 %v9732_v10  ;;  %3980 = vmatmul.mubr.bf16.vlgmr.msra.gmra.mrb[0].mxu1 %v9732_v10 }
 0x20d   : > { %3991 = vmatpush1.bf16.msra.mxu0 %v7212_v13  ;;  %4163 = vmatpush1.bf16.msra.mxu1 %v7214_v14  ;;  %v7270_v13 = vcombine.low %v593_v0, %v597_v1  ;;  %v7277_v14 = vcombine.high %v600_v7, %v604_v8  ;;  %v653_v0 = vld [vmem:[%s9378_s17 + $0x3b8] sm:$0xff]  ;;  %v660_v7 = vld [vmem:[%s9378_s17 + $0x3f0] sm:$0xff] }
 0x20e   : > { %3992 = vmatprep.subr.bf16.mxu0 %v7221_v15  ;;  %4164 = vmatprep.subr.bf16.mxu1 %v7223_v16  ;;  %v7279_v15 = vcombine.high %v601_v9, %v605_v11  ;;  %v608_v16 = vld [vmem:[%s9378_s17 + $0x250] sm:$0xff]  ;;  %v657_v8 = vld [vmem:[%s9378_s17 + $0x3d8] sm:$0xff] }
 0x20f   : > { %4022 = vmatprep.mubr.bf16.mxu0 %v9440_v3  ;;  %4194 = vmatprep.mubr.bf16.mxu1 %v9440_v3  ;;  %v7238_v3 = vcombine.low %v561_v28, %v565_v29  ;;  %v621_v28 = vld [vmem:[%s9378_s17 + $0x2b8] sm:$0xff]  ;;  %v7284_v29 = vcombine.low %v608_v16, %v612_v17 }
 0x211   : > { %3993 = vmatpush1.bf16.msra.mxu0 %v7220_v19  ;;  %4165 = vmatpush1.bf16.msra.mxu1 %v7222_v20  ;;  %v7278_v19 = vcombine.low %v601_v9, %v605_v11  ;;  %v7285_v20 = vcombine.high %v608_v16, %v612_v17  ;;  %v661_v9 = vld [vmem:[%s9378_s17 + $0x3f8] sm:$0xff]  ;;  %v668_v16 = vld [vmem:[%s9378_s17 + $0x430] sm:$0xff] }
 0x212   : > { %3994 = vmatprep.subr.bf16.mxu0 %v7229_v21  ;;  %4166 = vmatprep.subr.bf16.mxu1 %v7231_v22  ;;  %v7287_v21 = vcombine.high %v609_v18, %v613_v54  ;;  %v616_v22 = vld [vmem:[%s9378_s17 + $0x290] sm:$0xff]  ;;  %v665_v17 = vld [vmem:[%s9378_s17 + $0x418] sm:$0xff] }
 0x213   : > { %v7292_v37 = vcombine.low %v616_v22, %v620_v23 }
 0x215   : > { %3995 = vmatpush1.bf16.msra.mxu0 %v7228_v30  ;;  %4167 = vmatpush1.bf16.msra.mxu1 %v7230_v31  ;;  %v7286_v30 = vcombine.low %v609_v18, %v613_v54  ;;  %v7293_v31 = vcombine.high %v616_v22, %v620_v23  ;;  %v669_v18 = vld [vmem:[%s9378_s17 + $0x438] sm:$0xff]  ;;  %v676_v22 = vld [vmem:[%s9378_s17 + $0x470] sm:$0xff] }
 0x216   : > { %3996 = vmatprep.subr.bf16.mxu0 %v7237_v32  ;;  %4168 = vmatprep.subr.bf16.mxu1 %v7239_v62  ;;  %v7295_v32 = vcombine.high %v617_v25, %v621_v28  ;;  %v624_v62 = vld [vmem:[%s9378_s17 + $0x2d0] sm:$0xff]  ;;  %v673_v23 = vld [vmem:[%s9378_s17 + $0x458] sm:$0xff] }
 0x217   : > { %v7300_v45 = vcombine.low %v624_v62, %v628_v33 }
 0x219   : > { %3997 = vmatpush1.bf16.msra.mxu0 %v7236_v40  ;;  %4169 = vmatpush1.bf16.msra.mxu1 %v7238_v3  ;;  %v7294_v40 = vcombine.low %v617_v25, %v621_v28  ;;  %v7301_v3 = vcombine.high %v624_v62, %v628_v33  ;;  %v677_v25 = vld [vmem:[%s9378_s17 + $0x478] sm:$0xff]  ;;  %v684_v62 = vld [vmem:[%s9378_s17 + $0x4b0] sm:$0xff] }
 0x21a   : > { %3998 = vmatprep.subr.bf16.mxu0 %v7245_v41  ;;  %4170 = vmatprep.subr.bf16.mxu1 %v7247_v42  ;;  %v7303_v41 = vcombine.high %v625_v34, %v629_v35  ;;  %v632_v42 = vld [vmem:[%s9378_s17 + $0x310] sm:$0xff]  ;;  %v681_v33 = vld [vmem:[%s9378_s17 + $0x498] sm:$0xff] }
 0x21b   : > { %v7308_v56 = vcombine.low %v632_v42, %v636_v43 }
 0x21d   : > { %3999 = vmatpush1.bf16.msra.mxu0 %v7244_v46  ;;  %4171 = vmatpush1.bf16.msra.mxu1 %v7246_v47  ;;  %v7302_v46 = vcombine.low %v625_v34, %v629_v35  ;;  %v7309_v47 = vcombine.high %v632_v42, %v636_v43  ;;  %v685_v34 = vld [vmem:[%s9378_s17 + $0x4b8] sm:$0xff]  ;;  %v692_v42 = vld [vmem:[%s9378_s17 + $0x4f0] sm:$0xff] }
 0x21e   : > { %4000 = vmatprep.subr.bf16.mxu0 %v7253_v48  ;;  %4172 = vmatprep.subr.bf16.mxu1 %v7255_v49  ;;  %v7311_v48 = vcombine.high %v633_v44, %v637_v26  ;;  %v640_v49 = vld [vmem:[%s9378_s17 + $0x350] sm:$0xff]  ;;  %v689_v43 = vld [vmem:[%s9378_s17 + $0x4d8] sm:$0xff] }
 0x21f   : > { %v7316_v1 = vcombine.low %v640_v49, %v644_v50 }
 0x221   : > { %4001 = vmatpush1.bf16.msra.mxu0 %v7252_v57  ;;  %4173 = vmatpush1.bf16.msra.mxu1 %v7254_v58  ;;  %v7310_v57 = vcombine.low %v633_v44, %v637_v26  ;;  %v7317_v58 = vcombine.high %v640_v49, %v644_v50  ;;  %v693_v44 = vld [vmem:[%s9378_s17 + $0x4f8] sm:$0xff]  ;;  %v7358_v26 = vcombine.low %v681_v33, %v685_v34 }
 0x222   : > { %4002 = vmatprep.subr.bf16.mxu0 %v7261_v59  ;;  %4174 = vmatprep.subr.bf16.mxu1 %v7263_v60  ;;  %v7319_v59 = vcombine.high %v641_v51, %v645_v53  ;;  %v648_v60 = vld [vmem:[%s9378_s17 + $0x390] sm:$0xff]  ;;  %v697_v49 = vld [vmem:[%s9378_s17 + $0x518] sm:$0xff] }
 0x223   : > { %v7324_v11 = vcombine.low %v648_v60, %v652_v38  ;;  %v701_v50 = vld [vmem:[%s9378_s17 + $0x538] sm:$0xff] }
 0x225   : > { %4003 = vmatpush1.bf16.msra.mxu0 %v7260_v2  ;;  %4175 = vmatpush1.bf16.msra.mxu1 %v7262_v4  ;;  %v7318_v2 = vcombine.low %v641_v51, %v645_v53  ;;  %v7325_v4 = vcombine.high %v648_v60, %v652_v38  ;;  %v709_v60 = vld [vmem:[%s9378_s17 + $0x578] sm:$0xff] }
 0x226   : > { %4004 = vmatprep.subr.bf16.mxu0 %v7269_v5  ;;  %4176 = vmatprep.subr.bf16.mxu1 %v7271_v6  ;;  %v7327_v5 = vcombine.high %v649_v61, %v653_v0  ;;  %v656_v6 = vld [vmem:[%s9378_s17 + $0x3d0] sm:$0xff] }
 0x227   : > { %v7332_v54 = vcombine.low %v656_v6, %v660_v7 }
 0x229   : > { %4005 = vmatpush1.bf16.msra.mxu0 %v7268_v12  ;;  %4177 = vmatpush1.bf16.msra.mxu1 %v7270_v13  ;;  %v7326_v12 = vcombine.low %v649_v61, %v653_v0  ;;  %v7333_v13 = vcombine.high %v656_v6, %v660_v7  ;;  %v7374_v61 = vcombine.low %v697_v49, %v701_v50  ;;  %v717_v6 = vld [vmem:[%s9378_s17 + $0x5b8] sm:$0xff] }
 0x22a   : > { %4006 = vmatprep.subr.bf16.mxu0 %v7277_v14  ;;  %4178 = vmatprep.subr.bf16.mxu1 %v7279_v15  ;;  %v7335_v14 = vcombine.high %v657_v8, %v661_v9  ;;  %v664_v15 = vld [vmem:[%s9378_s17 + $0x410] sm:$0xff] }
 0x22b   : > { %v7340_v28 = vcombine.low %v664_v15, %v668_v16 }
 0x22d   : > { %4007 = vmatpush1.bf16.msra.mxu0 %v7276_v55  ;;  %4179 = vmatpush1.bf16.msra.mxu1 %v7278_v19  ;;  %v7334_v55 = vcombine.low %v657_v8, %v661_v9  ;;  %v7341_v19 = vcombine.high %v664_v15, %v668_v16  ;;  %v725_v15 = vld [vmem:[%s9378_s17 + $0x5f8] sm:$0xff] }
 0x22e   : > { %4008 = vmatprep.subr.bf16.mxu0 %v7285_v20  ;;  %4180 = vmatprep.subr.bf16.mxu1 %v7287_v21  ;;  %v7343_v20 = vcombine.high %v665_v17, %v669_v18  ;;  %v672_v21 = vld [vmem:[%s9378_s17 + $0x450] sm:$0xff] }
 0x22f   : > { %v7348_v35 = vcombine.low %v672_v21, %v676_v22 }
 0x231   : > { %4009 = vmatpush1.bf16.msra.mxu0 %v7284_v29  ;;  %4181 = vmatpush1.bf16.msra.mxu1 %v7286_v30  ;;  %v7342_v29 = vcombine.low %v665_v17, %v669_v18  ;;  %v7349_v30 = vcombine.high %v672_v21, %v676_v22  ;;  %v733_v21 = vld [vmem:[%s9378_s17 + $0x638] sm:$0xff] }
 0x232   : > { %4010 = vmatprep.subr.bf16.mxu0 %v7293_v31  ;;  %4182 = vmatprep.subr.bf16.mxu1 %v7295_v32  ;;  %v7351_v31 = vcombine.high %v673_v23, %v677_v25  ;;  %v680_v32 = vld [vmem:[%s9378_s17 + $0x490] sm:$0xff] }
 0x235   : > { %4011 = vmatpush1.bf16.msra.mxu0 %v7292_v37  ;;  %4183 = vmatpush1.bf16.msra.mxu1 %v7294_v40  ;;  %v7350_v37 = vcombine.low %v673_v23, %v677_v25  ;;  %v7357_v40 = vcombine.high %v680_v32, %v684_v62 }
 0x236   : > { %4012 = vmatprep.subr.bf16.mxu0 %v7301_v3  ;;  %4184 = vmatprep.subr.bf16.mxu1 %v7303_v41  ;;  %v7359_v3 = vcombine.high %v681_v33, %v685_v34  ;;  %v688_v41 = vld [vmem:[%s9378_s17 + $0x4d0] sm:$0xff] }
 0x237   : > { %v7364_v51 = vcombine.low %v688_v41, %v692_v42 }
 0x239   : > { %4013 = vmatpush1.bf16.msra.mxu0 %v7300_v45  ;;  %4185 = vmatpush1.bf16.msra.mxu1 %v7302_v46  ;;  %v7365_v45 = vcombine.high %v688_v41, %v692_v42  ;;  %v7367_v46 = vcombine.high %v689_v43, %v693_v44  ;;  %v749_v41 = vld [vmem:[%s9378_s17 + $0x6b8] sm:$0xff] }
 0x23a   : > { %4014 = vmatprep.subr.bf16.mxu0 %v7309_v47  ;;  %4186 = vmatprep.subr.bf16.mxu1 %v7311_v48  ;;  %v696_v47 = vld [vmem:[%s9378_s17 + $0x510] sm:$0xff] }
 0x23b   : > { %v700_v48 = vld [vmem:[%s9378_s17 + $0x530] sm:$0xff] }
 0x23c   : > { %v7373_v53 = vcombine.high %v696_v47, %v700_v48  ;;  %v7372_v38 = vcombine.low %v696_v47, %v700_v48  ;;  %v757_v47 = vld [vmem:[%s9378_s17 + $0x6f8] sm:$0xff] }
 0x23d   : > { %4015 = vmatpush1.bf16.msra.mxu0 %v7308_v56  ;;  %4187 = vmatpush1.bf16.msra.mxu1 %v7310_v57  ;;  %v7375_v56 = vcombine.high %v697_v49, %v701_v50  ;;  %v704_v57 = vld [vmem:[%s9378_s17 + $0x550] sm:$0xff] }
 0x23e   : > { %4016 = vmatprep.subr.bf16.mxu0 %v7317_v58  ;;  %4188 = vmatprep.subr.bf16.mxu1 %v7319_v59  ;;  %v708_v58 = vld [vmem:[%s9378_s17 + $0x570] sm:$0xff]  ;;  %v705_v59 = vld [vmem:[%s9378_s17 + $0x558] sm:$0xff] }
 0x23f   : > { %v7381_v0 = vcombine.high %v704_v57, %v708_v58  ;;  %v7380_v7 = vcombine.low %v704_v57, %v708_v58  ;;  %v7382_v8 = vcombine.low %v705_v59, %v709_v60  ;;  %v765_v57 = vld [vmem:[%s9378_s17 + $0x738] sm:$0xff] }
 0x241   : > { %4017 = vmatpush1.bf16.msra.mxu0 %v7316_v1  ;;  %4189 = vmatpush1.bf16.msra.mxu1 %v7318_v2  ;;  %v7383_v1 = vcombine.high %v705_v59, %v709_v60  ;;  %v712_v2 = vld [vmem:[%s9378_s17 + $0x590] sm:$0xff] }
 0x242   : > { %4018 = vmatprep.subr.bf16.mxu0 %v7325_v4  ;;  %4190 = vmatprep.subr.bf16.mxu1 %v7327_v5  ;;  %v716_v4 = vld [vmem:[%s9378_s17 + $0x5b0] sm:$0xff]  ;;  %v713_v5 = vld [vmem:[%s9378_s17 + $0x598] sm:$0xff] }
 0x243   : > { %v7389_v9 = vcombine.high %v712_v2, %v716_v4  ;;  %v7388_v16 = vcombine.low %v712_v2, %v716_v4  ;;  %v7390_v17 = vcombine.low %v713_v5, %v717_v6  ;;  %v773_v2 = vld [vmem:[%s9378_s17 + $0x778] sm:$0xff] }
 0x245   : > { %4019 = vmatpush1.bf16.msra.mxu0 %v7324_v11  ;;  %4191 = vmatpush1.bf16.msra.mxu1 %v7326_v12  ;;  %v7391_v11 = vcombine.high %v713_v5, %v717_v6  ;;  %v720_v12 = vld [vmem:[%s9378_s17 + $0x5d0] sm:$0xff] }
 0x246   : > { %4020 = vmatprep.subr.bf16.mxu0 %v7333_v13  ;;  %4192 = vmatprep.subr.bf16.mxu1 %v7335_v14  ;;  %v724_v13 = vld [vmem:[%s9378_s17 + $0x5f0] sm:$0xff]  ;;  %v721_v14 = vld [vmem:[%s9378_s17 + $0x5d8] sm:$0xff] }
 0x247   : > { %v7397_v18 = vcombine.high %v720_v12, %v724_v13  ;;  %v7396_v22 = vcombine.low %v720_v12, %v724_v13  ;;  %v7398_v23 = vcombine.low %v721_v14, %v725_v15  ;;  %v781_v12 = vld [vmem:[%s9378_s17 + $0x7b8] sm:$0xff] }
 0x249   : > { %4021 = vmatpush1.bf16.msra.mxu0 %v7332_v54  ;;  %4193 = vmatpush1.bf16.msra.mxu1 %v7334_v55  ;;  %v7399_v54 = vcombine.high %v721_v14, %v725_v15  ;;  %v728_v55 = vld [vmem:[%s9378_s17 + $0x610] sm:$0xff] }
 0x24a   : > { %4033 = vmatprep.subr.bf16.mxu0 %v7341_v19  ;;  %4205 = vmatprep.subr.bf16.mxu1 %v7343_v20  ;;  %v732_v19 = vld [vmem:[%s9378_s17 + $0x630] sm:$0xff]  ;;  %v729_v20 = vld [vmem:[%s9378_s17 + $0x618] sm:$0xff] }
 0x24b   : > { %v7405_v25 = vcombine.high %v728_v55, %v732_v19  ;;  %v7406_v33 = vcombine.low %v729_v20, %v733_v21 }
 0x24c   : > { %4023 = vmatmul.mubr.bf16.vlgmr.msra.gmra.mrb[4].mxu0 %v9487_v24  ;;  %4195 = vmatmul.mubr.bf16.vlgmr.msra.gmra.mrb[4].mxu1 %v9487_v24  ;;  %v7356_v24 = vcombine.low %v680_v32, %v684_v62  ;;  %v741_v32 = vld [vmem:[%s9378_s17 + $0x678] sm:$0xff]  ;;  %v7404_v62 = vcombine.low %v728_v55, %v732_v19 }
 0x24d   : > { %4034 = vmatpush1.bf16.msra.mxu0 %v7340_v28  ;;  %4206 = vmatpush1.bf16.msra.mxu1 %v7342_v29  ;;  %v7407_v28 = vcombine.high %v729_v20, %v733_v21  ;;  %v736_v29 = vld [vmem:[%s9378_s17 + $0x650] sm:$0xff]  ;;  %v789_v55 = vld [vmem:[%s9378_s17 + $0x7f8] sm:$0xff] }
 0x24e   : > { %4035 = vmatprep.subr.bf16.mxu0 %v7349_v30  ;;  %4207 = vmatprep.subr.bf16.mxu1 %v7351_v31  ;;  %v740_v30 = vld [vmem:[%s9378_s17 + $0x670] sm:$0xff]  ;;  %v737_v31 = vld [vmem:[%s9378_s17 + $0x658] sm:$0xff] }
 0x24f   : > { %4065 = vmatprep.mubr.bf16.mxu0 %v9500_v63  ;;  %4237 = vmatprep.mubr.bf16.mxu1 %v9500_v63  ;;  %v7366_v63 = vcombine.low %v689_v43, %v693_v44  ;;  %v7413_v34 = vcombine.high %v736_v29, %v740_v30  ;;  %v7412_v42 = vcombine.low %v736_v29, %v740_v30  ;;  %v797_v29 = vld [vmem:[%s9378_s17 + $0x838] sm:$0xff] }
 0x250   : > { %v7414_v43 = vcombine.low %v737_v31, %v741_v32 }
 0x251   : > { %4036 = vmatpush1.bf16.msra.mxu0 %v7348_v35  ;;  %4208 = vmatpush1.bf16.msra.mxu1 %v7350_v37  ;;  %v7415_v35 = vcombine.high %v737_v31, %v741_v32  ;;  %v744_v37 = vld [vmem:[%s9378_s17 + $0x690] sm:$0xff] }
 0x252   : > { %4037 = vmatprep.subr.bf16.mxu0 %v7357_v40  ;;  %4209 = vmatprep.subr.bf16.mxu1 %v7359_v3  ;;  %v748_v40 = vld [vmem:[%s9378_s17 + $0x6b0] sm:$0xff]  ;;  %v745_v3 = vld [vmem:[%s9378_s17 + $0x698] sm:$0xff] }
 0x253   : > { %v7421_v44 = vcombine.high %v744_v37, %v748_v40  ;;  %v7420_v48 = vcombine.low %v744_v37, %v748_v40  ;;  %v7422_v49 = vcombine.low %v745_v3, %v749_v41  ;;  %v805_v37 = vld [vmem:[%s9378_s17 + $0x878] sm:$0xff] }
 0x255   : > { %4038 = vmatpush1.bf16.msra.mxu0 %v7356_v24  ;;  %4210 = vmatpush1.bf16.msra.mxu1 %v7358_v26  ;;  %v7423_v24 = vcombine.high %v745_v3, %v749_v41  ;;  %v752_v26 = vld [vmem:[%s9378_s17 + $0x6d0] sm:$0xff] }
 0x256   : > { %4039 = vmatprep.subr.bf16.mxu0 %v7365_v45  ;;  %4211 = vmatprep.subr.bf16.mxu1 %v7367_v46  ;;  %v756_v45 = vld [vmem:[%s9378_s17 + $0x6f0] sm:$0xff]  ;;  %v753_v46 = vld [vmem:[%s9378_s17 + $0x6d8] sm:$0xff] }
 0x257   : > { %v7429_v50 = vcombine.high %v752_v26, %v756_v45  ;;  %v7428_v58 = vcombine.low %v752_v26, %v756_v45  ;;  %v7430_v59 = vcombine.low %v753_v46, %v757_v47  ;;  %v813_v26 = vld [vmem:[%s9378_s17 + $0x8b8] sm:$0xff] }
 0x259   : > { %4040 = vmatpush1.bf16.msra.mxu0 %v7364_v51  ;;  %4212 = vmatpush1.bf16.msra.mxu1 %v7366_v63  ;;  %v7431_v51 = vcombine.high %v753_v46, %v757_v47  ;;  %v760_v63 = vld [vmem:[%s9378_s17 + $0x710] sm:$0xff] }
 0x25a   : > { %4041 = vmatprep.subr.bf16.mxu0 %v7373_v53  ;;  %4213 = vmatprep.subr.bf16.mxu1 %v7375_v56  ;;  %v764_v53 = vld [vmem:[%s9378_s17 + $0x730] sm:$0xff]  ;;  %v761_v56 = vld [vmem:[%s9378_s17 + $0x718] sm:$0xff] }
 0x25b   : > { %v7437_v60 = vcombine.high %v760_v63, %v764_v53  ;;  %v7436_v4 = vcombine.low %v760_v63, %v764_v53  ;;  %v7438_v5 = vcombine.low %v761_v56, %v765_v57  ;;  %v821_v63 = vld [vmem:[%s9378_s17 + $0x8f8] sm:$0xff] }
 0x25d   : > { %4042 = vmatpush1.bf16.msra.mxu0 %v7372_v38  ;;  %4214 = vmatpush1.bf16.msra.mxu1 %v7374_v61  ;;  %v7439_v38 = vcombine.high %v761_v56, %v765_v57  ;;  %v768_v61 = vld [vmem:[%s9378_s17 + $0x750] sm:$0xff] }
 0x25e   : > { %4043 = vmatprep.subr.bf16.mxu0 %v7381_v0  ;;  %4215 = vmatprep.subr.bf16.mxu1 %v7383_v1  ;;  %v772_v0 = vld [vmem:[%s9378_s17 + $0x770] sm:$0xff]  ;;  %v769_v1 = vld [vmem:[%s9378_s17 + $0x758] sm:$0xff] }
 0x25f   : > { %v7445_v6 = vcombine.high %v768_v61, %v772_v0  ;;  %v7444_v13 = vcombine.low %v768_v61, %v772_v0  ;;  %v7446_v14 = vcombine.low %v769_v1, %v773_v2 }
 0x261   : > { %4044 = vmatpush1.bf16.msra.mxu0 %v7380_v7  ;;  %4216 = vmatpush1.bf16.msra.mxu1 %v7382_v8  ;;  %v7447_v7 = vcombine.high %v769_v1, %v773_v2  ;;  %v776_v8 = vld [vmem:[%s9378_s17 + $0x790] sm:$0xff] }
 0x262   : > { %4045 = vmatprep.subr.bf16.mxu0 %v7389_v9  ;;  %4217 = vmatprep.subr.bf16.mxu1 %v7391_v11  ;;  %v780_v9 = vld [vmem:[%s9378_s17 + $0x7b0] sm:$0xff]  ;;  %v777_v11 = vld [vmem:[%s9378_s17 + $0x798] sm:$0xff] }
 0x263   : > { %v7453_v15 = vcombine.high %v776_v8, %v780_v9  ;;  %v7452_v19 = vcombine.low %v776_v8, %v780_v9  ;;  %v7454_v20 = vcombine.low %v777_v11, %v781_v12  ;;  %v832_v2 = vld [vmem:[%s9378_s17 + $0x950] sm:$0xff] }
 0x265   : > { %4046 = vmatpush1.bf16.msra.mxu0 %v7388_v16  ;;  %4218 = vmatpush1.bf16.msra.mxu1 %v7390_v17  ;;  %v7455_v16 = vcombine.high %v777_v11, %v781_v12  ;;  %v784_v17 = vld [vmem:[%s9378_s17 + $0x7d0] sm:$0xff] }
 0x266   : > { %4047 = vmatprep.subr.bf16.mxu0 %v7397_v18  ;;  %4219 = vmatprep.subr.bf16.mxu1 %v7399_v54  ;;  %v788_v18 = vld [vmem:[%s9378_s17 + $0x7f0] sm:$0xff]  ;;  %v785_v54 = vld [vmem:[%s9378_s17 + $0x7d8] sm:$0xff] }
 0x267   : > { %v7461_v21 = vcombine.high %v784_v17, %v788_v18  ;;  %v7460_v30 = vcombine.low %v784_v17, %v788_v18  ;;  %v7462_v31 = vcombine.low %v785_v54, %v789_v55  ;;  %v840_v12 = vld [vmem:[%s9378_s17 + $0x990] sm:$0xff] }
 0x269   : > { %4048 = vmatpush1.bf16.msra.mxu0 %v7396_v22  ;;  %4220 = vmatpush1.bf16.msra.mxu1 %v7398_v23  ;;  %v7463_v22 = vcombine.high %v785_v54, %v789_v55  ;;  %v792_v23 = vld [vmem:[%s9378_s17 + $0x810] sm:$0xff] }
 0x26a   : > { %4049 = vmatprep.subr.bf16.mxu0 %v7405_v25  ;;  %4221 = vmatprep.subr.bf16.mxu1 %v7407_v28  ;;  %v796_v25 = vld [vmem:[%s9378_s17 + $0x830] sm:$0xff]  ;;  %v793_v28 = vld [vmem:[%s9378_s17 + $0x818] sm:$0xff] }
 0x26b   : > { %v7469_v32 = vcombine.high %v792_v23, %v796_v25  ;;  %v7468_v40 = vcombine.low %v792_v23, %v796_v25  ;;  %v7470_v3 = vcombine.low %v793_v28, %v797_v29  ;;  %v848_v55 = vld [vmem:[%s9378_s17 + $0x9d0] sm:$0xff] }
 0x26d   : > { %4050 = vmatpush1.bf16.msra.mxu0 %v7404_v62  ;;  %4222 = vmatpush1.bf16.msra.mxu1 %v7406_v33  ;;  %v7471_v62 = vcombine.high %v793_v28, %v797_v29  ;;  %v800_v33 = vld [vmem:[%s9378_s17 + $0x850] sm:$0xff] }
 0x26e   : > { %4051 = vmatprep.subr.bf16.mxu0 %v7413_v34  ;;  %4223 = vmatprep.subr.bf16.mxu1 %v7415_v35  ;;  %v804_v34 = vld [vmem:[%s9378_s17 + $0x870] sm:$0xff]  ;;  %v801_v35 = vld [vmem:[%s9378_s17 + $0x858] sm:$0xff] }
 0x26f   : > { %v7477_v41 = vcombine.high %v800_v33, %v804_v34  ;;  %v7476_v45 = vcombine.low %v800_v33, %v804_v34  ;;  %v7478_v46 = vcombine.low %v801_v35, %v805_v37  ;;  %v856_v29 = vld [vmem:[%s9378_s17 + $0xa10] sm:$0xff] }
 0x271   : > { %4052 = vmatpush1.bf16.msra.mxu0 %v7412_v42  ;;  %4224 = vmatpush1.bf16.msra.mxu1 %v7414_v43  ;;  %v7479_v42 = vcombine.high %v801_v35, %v805_v37  ;;  %v808_v43 = vld [vmem:[%s9378_s17 + $0x890] sm:$0xff] }
 0x272   : > { %4053 = vmatprep.subr.bf16.mxu0 %v7421_v44  ;;  %4225 = vmatprep.subr.bf16.mxu1 %v7423_v24  ;;  %v812_v44 = vld [vmem:[%s9378_s17 + $0x8b0] sm:$0xff]  ;;  %v809_v24 = vld [vmem:[%s9378_s17 + $0x898] sm:$0xff] }
 0x273   : > { %v7485_v47 = vcombine.high %v808_v43, %v812_v44  ;;  %v7486_v53 = vcombine.low %v809_v24, %v813_v26  ;;  %v864_v37 = vld [vmem:[%s9378_s17 + $0xa50] sm:$0xff] }
 0x275   : > { %4054 = vmatpush1.bf16.msra.mxu0 %v7420_v48  ;;  %4226 = vmatpush1.bf16.msra.mxu1 %v7422_v49  ;;  %v7487_v48 = vcombine.high %v809_v24, %v813_v26  ;;  %v816_v49 = vld [vmem:[%s9378_s17 + $0x8d0] sm:$0xff] }
 0x276   : > { %4055 = vmatprep.subr.bf16.mxu0 %v7429_v50  ;;  %4227 = vmatprep.subr.bf16.mxu1 %v7431_v51  ;;  %v820_v50 = vld [vmem:[%s9378_s17 + $0x8f0] sm:$0xff]  ;;  %v817_v51 = vld [vmem:[%s9378_s17 + $0x8d8] sm:$0xff] }
 0x277   : > { %v7493_v56 = vcombine.high %v816_v49, %v820_v50  ;;  %v7495_v57 = vcombine.high %v817_v51, %v821_v63  ;;  %v7492_v61 = vcombine.low %v816_v49, %v820_v50  ;;  %v872_v26 = vld [vmem:[%s9378_s17 + $0xa90] sm:$0xff] }
 0x279   : > { %4056 = vmatpush1.bf16.msra.mxu0 %v7428_v58  ;;  %4228 = vmatpush1.bf16.msra.mxu1 %v7430_v59  ;;  %v824_v58 = vld [vmem:[%s9378_s17 + $0x910] sm:$0xff] }
 0x27a   : > { %4057 = vmatprep.subr.bf16.mxu0 %v7437_v60  ;;  %4229 = vmatprep.subr.bf16.mxu1 %v7439_v38  ;;  %v828_v59 = vld [vmem:[%s9378_s17 + $0x930] sm:$0xff]  ;;  %v825_v60 = vld [vmem:[%s9378_s17 + $0x918] sm:$0xff] }
 0x27b   : > { %v829_v38 = vld [vmem:[%s9378_s17 + $0x938] sm:$0xff]  ;;  %v7501_v0 = vcombine.high %v824_v58, %v828_v59 }
 0x27c   : > { %v7503_v1 = vcombine.high %v825_v60, %v829_v38  ;;  %v7502_v8 = vcombine.low %v825_v60, %v829_v38  ;;  %v888_v38 = vld [vmem:[%s9378_s17 + $0xb10] sm:$0xff] }
 0x27d   : > { %4058 = vmatpush1.bf16.msra.mxu0 %v7436_v4  ;;  %4230 = vmatpush1.bf16.msra.mxu1 %v7438_v5  ;;  %v836_v4 = vld [vmem:[%s9378_s17 + $0x970] sm:$0xff]  ;;  %v833_v5 = vld [vmem:[%s9378_s17 + $0x958] sm:$0xff] }
 0x27e   : > { %4059 = vmatprep.subr.bf16.mxu0 %v7445_v6  ;;  %4231 = vmatprep.subr.bf16.mxu1 %v7447_v7  ;;  %v837_v6 = vld [vmem:[%s9378_s17 + $0x978] sm:$0xff]  ;;  %v7500_v7 = vcombine.low %v824_v58, %v828_v59  ;;  %v7509_v9 = vcombine.high %v832_v2, %v836_v4 }
 0x27f   : > { %v7511_v11 = vcombine.high %v833_v5, %v837_v6  ;;  %v7510_v17 = vcombine.low %v833_v5, %v837_v6  ;;  %v896_v6 = vld [vmem:[%s9378_s17 + $0xb50] sm:$0xff] }
 0x281   : > { %4060 = vmatpush1.bf16.msra.mxu0 %v7444_v13  ;;  %4232 = vmatpush1.bf16.msra.mxu1 %v7446_v14  ;;  %v844_v13 = vld [vmem:[%s9378_s17 + $0x9b0] sm:$0xff]  ;;  %v841_v14 = vld [vmem:[%s9378_s17 + $0x998] sm:$0xff] }
 0x282   : > { %4061 = vmatprep.subr.bf16.mxu0 %v7453_v15  ;;  %4233 = vmatprep.subr.bf16.mxu1 %v7455_v16  ;;  %v845_v15 = vld [vmem:[%s9378_s17 + $0x9b8] sm:$0xff]  ;;  %v7508_v16 = vcombine.low %v832_v2, %v836_v4  ;;  %v7517_v18 = vcombine.high %v840_v12, %v844_v13 }
 0x283   : > { %v7519_v54 = vcombine.high %v841_v14, %v845_v15  ;;  %v7518_v23 = vcombine.low %v841_v14, %v845_v15  ;;  %v904_v15 = vld [vmem:[%s9378_s17 + $0xb90] sm:$0xff] }
 0x285   : > { %4062 = vmatpush1.bf16.msra.mxu0 %v7452_v19  ;;  %4234 = vmatpush1.bf16.msra.mxu1 %v7454_v20  ;;  %v852_v19 = vld [vmem:[%s9378_s17 + $0x9f0] sm:$0xff]  ;;  %v849_v20 = vld [vmem:[%s9378_s17 + $0x9d8] sm:$0xff] }
 0x286   : > { %4063 = vmatprep.subr.bf16.mxu0 %v7461_v21  ;;  %4235 = vmatprep.subr.bf16.mxu1 %v7463_v22  ;;  %v853_v21 = vld [vmem:[%s9378_s17 + $0x9f8] sm:$0xff]  ;;  %v7516_v22 = vcombine.low %v840_v12, %v844_v13  ;;  %v7525_v25 = vcombine.high %v848_v55, %v852_v19 }
 0x287   : > { %v7527_v28 = vcombine.high %v849_v20, %v853_v21  ;;  %v7526_v33 = vcombine.low %v849_v20, %v853_v21  ;;  %v912_v21 = vld [vmem:[%s9378_s17 + $0xbd0] sm:$0xff] }
 0x289   : > { %4064 = vmatpush1.bf16.msra.mxu0 %v7460_v30  ;;  %4236 = vmatpush1.bf16.msra.mxu1 %v7462_v31  ;;  %v860_v30 = vld [vmem:[%s9378_s17 + $0xa30] sm:$0xff]  ;;  %v857_v31 = vld [vmem:[%s9378_s17 + $0xa18] sm:$0xff] }
 0x28a   : > { %4076 = vmatprep.subr.bf16.mxu0 %v7469_v32  ;;  %4248 = vmatprep.subr.bf16.mxu1 %v7471_v62  ;;  %v861_v32 = vld [vmem:[%s9378_s17 + $0xa38] sm:$0xff]  ;;  %v7524_v62 = vcombine.low %v848_v55, %v852_v19  ;;  %v7533_v34 = vcombine.high %v856_v29, %v860_v30 }
 0x28b   : > { %v7535_v35 = vcombine.high %v857_v31, %v861_v32 }
 0x28c   : > { %4066 = vmatmul.mubr.bf16.vlgmr.msra.gmra.mrb[4].mxu0 %v9569_v36  ;;  %4238 = vmatmul.mubr.bf16.vlgmr.msra.gmra.mrb[4].mxu1 %v9569_v36  ;;  %v7484_v36 = vcombine.low %v808_v43, %v812_v44  ;;  %v7534_v43 = vcombine.low %v857_v31, %v861_v32  ;;  %v920_v32 = vld [vmem:[%s9378_s17 + $0xc10] sm:$0xff] }
 0x28d   : > { %4077 = vmatpush1.bf16.msra.mxu0 %v7468_v40  ;;  %4249 = vmatpush1.bf16.msra.mxu1 %v7470_v3  ;;  %v868_v40 = vld [vmem:[%s9378_s17 + $0xa70] sm:$0xff]  ;;  %v865_v3 = vld [vmem:[%s9378_s17 + $0xa58] sm:$0xff] }
 0x28e   : > { %4078 = vmatprep.subr.bf16.mxu0 %v7477_v41  ;;  %4250 = vmatprep.subr.bf16.mxu1 %v7479_v42  ;;  %v869_v41 = vld [vmem:[%s9378_s17 + $0xa78] sm:$0xff]  ;;  %v7532_v42 = vcombine.low %v856_v29, %v860_v30  ;;  %v7541_v44 = vcombine.high %v864_v37, %v868_v40 }
 0x28f   : > { %4108 = vmatprep.mubr.bf16.mxu0 %v9582_v27  ;;  %4280 = vmatprep.mubr.bf16.mxu1 %v9582_v27  ;;  %v7494_v27 = vcombine.low %v817_v51, %v821_v63  ;;  %v7543_v24 = vcombine.high %v865_v3, %v869_v41  ;;  %v7542_v49 = vcombine.low %v865_v3, %v869_v41  ;;  %v880_v63 = vld [vmem:[%s9378_s17 + $0xad0] sm:$0xff] }
 0x290   : > { %v928_v41 = vld [vmem:[%s9378_s17 + $0xc50] sm:$0xff] }
 0x291   : > { %4079 = vmatpush1.bf16.msra.mxu0 %v7476_v45  ;;  %4251 = vmatpush1.bf16.msra.mxu1 %v7478_v46  ;;  %v876_v45 = vld [vmem:[%s9378_s17 + $0xab0] sm:$0xff]  ;;  %v873_v46 = vld [vmem:[%s9378_s17 + $0xa98] sm:$0xff] }
 0x292   : > { %4080 = vmatprep.subr.bf16.mxu0 %v7485_v47  ;;  %4252 = vmatprep.subr.bf16.mxu1 %v7487_v48  ;;  %v877_v47 = vld [vmem:[%s9378_s17 + $0xab8] sm:$0xff]  ;;  %v7540_v48 = vcombine.low %v864_v37, %v868_v40  ;;  %v7549_v50 = vcombine.high %v872_v26, %v876_v45 }
 0x293   : > { %v7551_v51 = vcombine.high %v873_v46, %v877_v47  ;;  %v7550_v58 = vcombine.low %v873_v46, %v877_v47  ;;  %v936_v47 = vld [vmem:[%s9378_s17 + $0xc90] sm:$0xff] }
 0x295   : > { %4081 = vmatpush1.bf16.msra.mxu0 %v7484_v36  ;;  %4253 = vmatpush1.bf16.msra.mxu1 %v7486_v53  ;;  %v884_v36 = vld [vmem:[%s9378_s17 + $0xaf0] sm:$0xff]  ;;  %v881_v53 = vld [vmem:[%s9378_s17 + $0xad8] sm:$0xff] }
 0x296   : > { %4082 = vmatprep.subr.bf16.mxu0 %v7493_v56  ;;  %4254 = vmatprep.subr.bf16.mxu1 %v7495_v57  ;;  %v885_v56 = vld [vmem:[%s9378_s17 + $0xaf8] sm:$0xff]  ;;  %v7548_v57 = vcombine.low %v872_v26, %v876_v45  ;;  %v7557_v59 = vcombine.high %v880_v63, %v884_v36 }
 0x297   : > { %v7559_v60 = vcombine.high %v881_v53, %v885_v56  ;;  %v7558_v2 = vcombine.low %v881_v53, %v885_v56  ;;  %v944_v56 = vld [vmem:[%s9378_s17 + $0xcd0] sm:$0xff] }
 0x299   : > { %4083 = vmatpush1.bf16.msra.mxu0 %v7492_v61  ;;  %4255 = vmatpush1.bf16.msra.mxu1 %v7494_v27  ;;  %v892_v61 = vld [vmem:[%s9378_s17 + $0xb30] sm:$0xff]  ;;  %v889_v27 = vld [vmem:[%s9378_s17 + $0xb18] sm:$0xff] }
 0x29a   : > { %4084 = vmatprep.subr.bf16.mxu0 %v7501_v0  ;;  %4256 = vmatprep.subr.bf16.mxu1 %v7503_v1  ;;  %v893_v0 = vld [vmem:[%s9378_s17 + $0xb38] sm:$0xff]  ;;  %v7556_v1 = vcombine.low %v880_v63, %v884_v36  ;;  %v7565_v4 = vcombine.high %v888_v38, %v892_v61 }
 0x29b   : > { %v7567_v5 = vcombine.high %v889_v27, %v893_v0  ;;  %v7566_v12 = vcombine.low %v889_v27, %v893_v0  ;;  %v952_v27 = vld [vmem:[%s9378_s17 + $0xd10] sm:$0xff] }
 0x29c   : > { %v956_v0 = vld [vmem:[%s9378_s17 + $0xd30] sm:$0xff] }
 0x29d   : > { %4085 = vmatpush1.bf16.msra.mxu0 %v7500_v7  ;;  %4257 = vmatpush1.bf16.msra.mxu1 %v7502_v8  ;;  %v900_v7 = vld [vmem:[%s9378_s17 + $0xb70] sm:$0xff]  ;;  %v897_v8 = vld [vmem:[%s9378_s17 + $0xb58] sm:$0xff] }
 0x29e   : > { %4086 = vmatprep.subr.bf16.mxu0 %v7509_v9  ;;  %4258 = vmatprep.subr.bf16.mxu1 %v7511_v11  ;;  %v901_v9 = vld [vmem:[%s9378_s17 + $0xb78] sm:$0xff]  ;;  %v7564_v11 = vcombine.low %v888_v38, %v892_v61  ;;  %v7573_v13 = vcombine.high %v896_v6, %v900_v7 }
 0x29f   : > { %v7575_v14 = vcombine.high %v897_v8, %v901_v9  ;;  %v7574_v55 = vcombine.low %v897_v8, %v901_v9  ;;  %v964_v8 = vld [vmem:[%s9378_s17 + $0xd70] sm:$0xff]  ;;  %v961_v9 = vld [vmem:[%s9378_s17 + $0xd58] sm:$0xff] }
 0x2a1   : > { %4087 = vmatpush1.bf16.msra.mxu0 %v7508_v16  ;;  %4259 = vmatpush1.bf16.msra.mxu1 %v7510_v17  ;;  %v908_v16 = vld [vmem:[%s9378_s17 + $0xbb0] sm:$0xff]  ;;  %v905_v17 = vld [vmem:[%s9378_s17 + $0xb98] sm:$0xff] }
 0x2a2   : > { %4088 = vmatprep.subr.bf16.mxu0 %v7517_v18  ;;  %4260 = vmatprep.subr.bf16.mxu1 %v7519_v54  ;;  %v909_v18 = vld [vmem:[%s9378_s17 + $0xbb8] sm:$0xff]  ;;  %v7572_v54 = vcombine.low %v896_v6, %v900_v7  ;;  %v7581_v19 = vcombine.high %v904_v15, %v908_v16  ;;  %v960_v7 = vld [vmem:[%s9378_s17 + $0xd50] sm:$0xff] }
 0x2a3   : > { %v7583_v20 = vcombine.high %v905_v17, %v909_v18  ;;  %v7582_v29 = vcombine.low %v905_v17, %v909_v18  ;;  %v972_v17 = vld [vmem:[%s9378_s17 + $0xdb0] sm:$0xff]  ;;  %v969_v18 = vld [vmem:[%s9378_s17 + $0xd98] sm:$0xff] }
 0x2a5   : > { %4089 = vmatpush1.bf16.msra.mxu0 %v7516_v22  ;;  %4261 = vmatpush1.bf16.msra.mxu1 %v7518_v23  ;;  %v916_v22 = vld [vmem:[%s9378_s17 + $0xbf0] sm:$0xff]  ;;  %v913_v23 = vld [vmem:[%s9378_s17 + $0xbd8] sm:$0xff] }
 0x2a6   : > { %4090 = vmatprep.subr.bf16.mxu0 %v7525_v25  ;;  %4262 = vmatprep.subr.bf16.mxu1 %v7527_v28  ;;  %v917_v25 = vld [vmem:[%s9378_s17 + $0xbf8] sm:$0xff]  ;;  %v7580_v28 = vcombine.low %v904_v15, %v908_v16  ;;  %v7589_v30 = vcombine.high %v912_v21, %v916_v22  ;;  %v968_v16 = vld [vmem:[%s9378_s17 + $0xd90] sm:$0xff] }
 0x2a7   : > { %v7591_v31 = vcombine.high %v913_v23, %v917_v25  ;;  %v7590_v37 = vcombine.low %v913_v23, %v917_v25  ;;  %v518_v25 = vld [vmem:[#allocation2 + $0x40] sm:$0xff] }
 0x2a9   : > { %4091 = vmatpush1.bf16.msra.mxu0 %v7524_v62  ;;  %4263 = vmatpush1.bf16.msra.mxu1 %v7526_v33  ;;  %v924_v62 = vld [vmem:[%s9378_s17 + $0xc30] sm:$0xff]  ;;  %v921_v33 = vld [vmem:[%s9378_s17 + $0xc18] sm:$0xff] }
 0x2aa   : > { %4092 = vmatprep.subr.bf16.mxu0 %v7533_v34  ;;  %4264 = vmatprep.subr.bf16.mxu1 %v7535_v35  ;;  %v925_v34 = vld [vmem:[%s9378_s17 + $0xc38] sm:$0xff]  ;;  %v7588_v35 = vcombine.low %v912_v21, %v916_v22  ;;  %v7597_v40 = vcombine.high %v920_v32, %v924_v62  ;;  %v511_v21 = vld [vmem:[#allocation2 + $0x8] sm:$0xff] }
 0x2ab   : > { %v7599_v3 = vcombine.high %v921_v33, %v925_v34  ;;  %v7598_v26 = vcombine.low %v921_v33, %v925_v34  ;;  %v513_v22 = vld [vmem:[#allocation2 + $0x18] sm:$0xff] }
 0x2ad   : > { %4093 = vmatpush1.bf16.msra.mxu0 %v7532_v42  ;;  %4265 = vmatpush1.bf16.msra.mxu1 %v7534_v43  ;;  %v932_v42 = vld [vmem:[%s9378_s17 + $0xc70] sm:$0xff]  ;;  %v929_v43 = vld [vmem:[%s9378_s17 + $0xc58] sm:$0xff] }
 0x2ae   : > { %4094 = vmatprep.subr.bf16.mxu0 %v7541_v44  ;;  %4266 = vmatprep.subr.bf16.mxu1 %v7543_v24  ;;  %v933_v44 = vld [vmem:[%s9378_s17 + $0xc78] sm:$0xff]  ;;  %v7596_v24 = vcombine.low %v920_v32, %v924_v62  ;;  %v7605_v45 = vcombine.high %v928_v41, %v932_v42  ;;  %v976_v32 = vld [vmem:[%s9378_s17 + $0xdd0] sm:$0xff] }
 0x2af   : > { %v7607_v46 = vcombine.high %v929_v43, %v933_v44  ;;  %v7606_v63 = vcombine.low %v929_v43, %v933_v44  ;;  %v980_v62 = vld [vmem:[%s9378_s17 + $0xdf0] sm:$0xff] }
 0x2b1   : > { %4095 = vmatpush1.bf16.msra.mxu0 %v7540_v48  ;;  %4267 = vmatpush1.bf16.msra.mxu1 %v7542_v49  ;;  %v940_v48 = vld [vmem:[%s9378_s17 + $0xcb0] sm:$0xff]  ;;  %v937_v49 = vld [vmem:[%s9378_s17 + $0xc98] sm:$0xff] }
 0x2b2   : > { %4096 = vmatprep.subr.bf16.mxu0 %v7549_v50  ;;  %4268 = vmatprep.subr.bf16.mxu1 %v7551_v51  ;;  %v941_v50 = vld [vmem:[%s9378_s17 + $0xcb8] sm:$0xff]  ;;  %v7604_v51 = vcombine.low %v928_v41, %v932_v42  ;;  %v7613_v36 = vcombine.high %v936_v47, %v940_v48 }
 0x2b3   : > { %v7615_v53 = vcombine.high %v937_v49, %v941_v50 }
 0x2b5   : > { %4097 = vmatpush1.bf16.msra.mxu0 %v7548_v57  ;;  %4269 = vmatpush1.bf16.msra.mxu1 %v7550_v58  ;;  %v948_v57 = vld [vmem:[%s9378_s17 + $0xcf0] sm:$0xff]  ;;  %v945_v58 = vld [vmem:[%s9378_s17 + $0xcd8] sm:$0xff] }
 0x2b6   : > { %4098 = vmatprep.subr.bf16.mxu0 %v7557_v59  ;;  %4270 = vmatprep.subr.bf16.mxu1 %v7559_v60  ;;  %v949_v59 = vld [vmem:[%s9378_s17 + $0xcf8] sm:$0xff]  ;;  %v7614_v60 = vcombine.low %v937_v49, %v941_v50  ;;  %v7621_v38 = vcombine.high %v944_v56, %v948_v57  ;;  %v7653_v50 = vcombine.high %v976_v32, %v980_v62 }
 0x2b7   : > { %v7623_v61 = vcombine.high %v945_v58, %v949_v59 }
 0x2b9   : > { %4099 = vmatpush1.bf16.msra.mxu0 %v7556_v1  ;;  %4271 = vmatpush1.bf16.msra.mxu1 %v7558_v2  ;;  %v953_v1 = vld [vmem:[%s9378_s17 + $0xd18] sm:$0xff] }
 0x2ba   : > { %4100 = vmatprep.subr.bf16.mxu0 %v7565_v4  ;;  %4272 = vmatprep.subr.bf16.mxu1 %v7567_v5  ;;  %v957_v2 = vld [vmem:[%s9378_s17 + $0xd38] sm:$0xff]  ;;  %v7620_v4 = vcombine.low %v944_v56, %v948_v57  ;;  %v7629_v5 = vcombine.high %v952_v27, %v956_v0  ;;  %v984_v56 = vld [vmem:[%s9378_s17 + $0xe10] sm:$0xff] }
 0x2bb   : > { %v7631_v6 = vcombine.high %v953_v1, %v957_v2  ;;  %v988_v57 = vld [vmem:[%s9378_s17 + $0xe30] sm:$0xff] }
 0x2bd   : > { %4101 = vmatpush1.bf16.msra.mxu0 %v7564_v11  ;;  %4273 = vmatpush1.bf16.msra.mxu1 %v7566_v12  ;;  %v965_v11 = vld [vmem:[%s9378_s17 + $0xd78] sm:$0xff]  ;;  %v7628_v12 = vcombine.low %v952_v27, %v956_v0  ;;  %v992_v0 = vld [vmem:[%s9378_s17 + $0xe50] sm:$0xff] }
 0x2be   : > { %4102 = vmatprep.subr.bf16.mxu0 %v7573_v13  ;;  %4274 = vmatprep.subr.bf16.mxu1 %v7575_v14  ;;  %v7630_v13 = vcombine.low %v953_v1, %v957_v2  ;;  %v7637_v14 = vcombine.high %v960_v7, %v964_v8  ;;  %v7639_v15 = vcombine.high %v961_v9, %v965_v11  ;;  %v996_v1 = vld [vmem:[%s9378_s17 + $0xe70] sm:$0xff]  ;;  %v993_v2 = vld [vmem:[%s9378_s17 + $0xe58] sm:$0xff] }
 0x2bf   : > { %v7638_v23 = vcombine.low %v961_v9, %v965_v11  ;;  %v1004_v9 = vld [vmem:[%s9378_s17 + $0xeb0] sm:$0xff]  ;;  %v1001_v11 = vld [vmem:[%s9378_s17 + $0xe98] sm:$0xff] }
 0x2c1   : > { %4103 = vmatpush1.bf16.msra.mxu0 %v7572_v54  ;;  %4275 = vmatpush1.bf16.msra.mxu1 %v7574_v55  ;;  %v973_v54 = vld [vmem:[%s9378_s17 + $0xdb8] sm:$0xff]  ;;  %v510_v55 = vld [vmem:[#allocation2] sm:$0xff] }
 0x2c2   : > { %4104 = vmatprep.subr.bf16.mxu0 %v7581_v19  ;;  %4276 = vmatprep.subr.bf16.mxu1 %v7583_v20  ;;  %v512_v19 = vld [vmem:[#allocation2 + $0x10] sm:$0xff]  ;;  %v7636_v20 = vcombine.low %v960_v7, %v964_v8 }
 0x2c3   : > { %v1000_v8 = vld [vmem:[%s9378_s17 + $0xe90] sm:$0xff] }
 0x2c5   : > { %4105 = vmatpush1.bf16.msra.mxu0 %v7580_v28  ;;  %4277 = vmatpush1.bf16.msra.mxu1 %v7582_v29  ;;  %v7645_v28 = vcombine.high %v968_v16, %v972_v17 }
 0x2c6   : > { %4106 = vmatprep.subr.bf16.mxu0 %v7589_v30  ;;  %4278 = vmatprep.subr.bf16.mxu1 %v7591_v31  ;;  %v520_v30 = vld [vmem:[#allocation2 + $0x50] sm:$0xff]  ;;  %v7647_v31 = vcombine.high %v969_v18, %v973_v54 }
 0x2c9   : > { %4107 = vmatpush1.bf16.msra.mxu0 %v7588_v35  ;;  %4279 = vmatpush1.bf16.msra.mxu1 %v7590_v37  ;;  %v519_v37 = vld [vmem:[#allocation2 + $0x48] sm:$0xff] }
 0x2ca   : > { %4119 = vmatprep.subr.bf16.mxu0 %v7597_v40  ;;  %4291 = vmatprep.subr.bf16.mxu1 %v7599_v3  ;;  %v977_v40 = vld [vmem:[%s9378_s17 + $0xdd8] sm:$0xff] }
 0x2cb   : > { %v981_v3 = vld [vmem:[%s9378_s17 + $0xdf8] sm:$0xff] }
 0x2cc   : > { %4109 = vmatmul.mubr.bf16.vlgmr.msra.gmra.mrb[4].mxu0 %v9651_v52  ;;  %4281 = vmatmul.mubr.bf16.vlgmr.msra.gmra.mrb[4].mxu1 %v9651_v52  ;;  %v7612_v52 = vcombine.low %v936_v47, %v940_v48 }
 0x2cd   : > { %4120 = vmatpush1.bf16.msra.mxu0 %v7596_v24  ;;  %4292 = vmatpush1.bf16.msra.mxu1 %v7598_v26  ;;  %v521_v24 = vld [vmem:[#allocation2 + $0x58] sm:$0xff]  ;;  %v7644_v26 = vcombine.low %v968_v16, %v972_v17  ;;  %v1008_v17 = vld [vmem:[%s9378_s17 + $0xed0] sm:$0xff] }
 0x2ce   : > { %4121 = vmatprep.subr.bf16.mxu0 %v7605_v45  ;;  %4293 = vmatprep.subr.bf16.mxu1 %v7607_v46  ;;  %v7646_v45 = vcombine.low %v969_v18, %v973_v54  ;;  %v1012_v18 = vld [vmem:[%s9378_s17 + $0xef0] sm:$0xff]  ;;  %v1009_v54 = vld [vmem:[%s9378_s17 + $0xed8] sm:$0xff] }
 0x2cf   : > { %4151 = vmatprep.mubr.bf16.mxu0 %v9664_v39  ;;  %4323 = vmatprep.mubr.bf16.mxu1 %v9664_v39  ;;  %v7622_v39 = vcombine.low %v945_v58, %v949_v59  ;;  %v985_v59 = vld [vmem:[%s9378_s17 + $0xe18] sm:$0xff] }
 0x2d1   : > { %4122 = vmatpush1.bf16.msra.mxu0 %v7604_v51  ;;  %4294 = vmatpush1.bf16.msra.mxu1 %v7606_v63 }
 0x2d2   : > { %4123 = vmatprep.subr.bf16.mxu0 %v7613_v36  ;;  %4295 = vmatprep.subr.bf16.mxu1 %v7615_v53  ;;  %v7655_v53 = vcombine.high %v977_v40, %v981_v3 }
 0x2d5   : > { %4124 = vmatpush1.bf16.msra.mxu0 %v7612_v52  ;;  %4296 = vmatpush1.bf16.msra.mxu1 %v7614_v60  ;;  %v989_v52 = vld [vmem:[%s9378_s17 + $0xe38] sm:$0xff]  ;;  %v7652_v60 = vcombine.low %v976_v32, %v980_v62 }
 0x2d6   : > { %4125 = vmatprep.subr.bf16.mxu0 %v7621_v38  ;;  %4297 = vmatprep.subr.bf16.mxu1 %v7623_v61  ;;  %v7654_v38 = vcombine.low %v977_v40, %v981_v3  ;;  %v7661_v61 = vcombine.high %v984_v56, %v988_v57  ;;  %v7663_v27 = vcombine.high %v985_v59, %v989_v52 }
 0x2d9   : > { %4126 = vmatpush1.bf16.msra.mxu0 %v7620_v4  ;;  %4298 = vmatpush1.bf16.msra.mxu1 %v7622_v39  ;;  %v997_v4 = vld [vmem:[%s9378_s17 + $0xe78] sm:$0xff]  ;;  %v7660_v39 = vcombine.low %v984_v56, %v988_v57 }
 0x2da   : > { %4127 = vmatprep.subr.bf16.mxu0 %v7629_v5  ;;  %4299 = vmatprep.subr.bf16.mxu1 %v7631_v6  ;;  %v7662_v5 = vcombine.low %v985_v59, %v989_v52  ;;  %v7669_v6 = vcombine.high %v992_v0, %v996_v1  ;;  %v7671_v7 = vcombine.high %v993_v2, %v997_v4  ;;  %v514_v52 = vld [vmem:[#allocation2 + $0x20] sm:$0xff] }
 0x2dd   : > { %4128 = vmatpush1.bf16.msra.mxu0 %v7628_v12  ;;  %4300 = vmatpush1.bf16.msra.mxu1 %v7630_v13  ;;  %v1005_v12 = vld [vmem:[%s9378_s17 + $0xeb8] sm:$0xff]  ;;  %v7668_v13 = vcombine.low %v992_v0, %v996_v1  ;;  %v522_v0 = vld [vmem:[#allocation2 + $0x60] sm:$0xff] }
 0x2de   : > { %4129 = vmatprep.subr.bf16.mxu0 %v7637_v14  ;;  %4301 = vmatprep.subr.bf16.mxu1 %v7639_v15  ;;  %v7670_v14 = vcombine.low %v993_v2, %v997_v4  ;;  %v7677_v15 = vcombine.high %v1000_v8, %v1004_v9  ;;  %v7679_v16 = vcombine.high %v1001_v11, %v1005_v12 }
 0x2df   : > { %v3809_v29 = vpop.f32.mrb[0].mxu0  ;;  %v3981_v34 = vpop.f32.mrb[0].mxu1 }
 0x2e0   : > { %v4334_v33 = vadd.f32 %v3809_v29, %v510_v55  ;;  %v3811_v35 = vpop.f32.mrb[1].mxu0  ;;  %v4336_v41 = vadd.f32 %v3981_v34, %v512_v19  ;;  %v3983_v43 = vpop.f32.mrb[1].mxu1  ;;  %v1013_v55 = vld [vmem:[%s9378_s17 + $0xef8] sm:$0xff]  ;;  %v7676_v19 = vcombine.low %v1000_v8, %v1004_v9  ;;  %v1028_v34 = vld [vmem:[%s9378_s17 + $0xf70] sm:$0xff] }
 0x2e1   : > { %v4335_v42 = vadd.f32 %v3811_v35, %v511_v21  ;;  %v3813_v44 = vpop.f32.mrb[2].mxu0  ;;  %4130 = vmatpush1.bf16.msra.mxu0 %v7636_v20  ;;  %v4337_v46 = vadd.f32 %v3983_v43, %v513_v22  ;;  %v3985_v48 = vpop.f32.mrb[2].mxu1  ;;  %4302 = vmatpush1.bf16.msra.mxu1 %v7638_v23  ;;  %v7678_v20 = vcombine.low %v1001_v11, %v1005_v12  ;;  %v1016_v23 = vld [vmem:[%s9378_s17 + $0xf10] sm:$0xff]  ;;  %v1021_v29 = vld [vmem:[%s9378_s17 + $0xf38] sm:$0xff] }
 0x2e2   : > { %4350 = vst [vmem:[#allocation2] sm:$0xff] %v4334_v33  ;;  %v4342_v47 = vadd.f32 %v3813_v44, %v518_v25  ;;  %v3815_v49 = vpop.f32.mrb[3].mxu0  ;;  %4131 = vmatprep.subr.bf16.mxu0 %v7645_v28  ;;  %4352 = vst [vmem:[#allocation2 + $0x10] sm:$0xff] %v4336_v41  ;;  %v4344_v51 = vadd.f32 %v3985_v48, %v520_v30  ;;  %v3987_v36 = vpop.f32.mrb[3].mxu1  ;;  %4303 = vmatprep.subr.bf16.mxu1 %v7647_v31  ;;  %v1020_v25 = vld [vmem:[%s9378_s17 + $0xf30] sm:$0xff]  ;;  %v1017_v28 = vld [vmem:[%s9378_s17 + $0xf18] sm:$0xff] }
 0x2e3   : > { %4351 = vst [vmem:[#allocation2 + $0x8] sm:$0xff] %v4335_v42  ;;  %v4343_v63 = vadd.f32 %v3815_v49, %v519_v37  ;;  %4353 = vst [vmem:[#allocation2 + $0x18] sm:$0xff] %v4337_v46  ;;  %v4345_v58 = vadd.f32 %v3987_v36, %v521_v24  ;;  %v7685_v21 = vcombine.high %v1008_v17, %v1012_v18  ;;  %v1024_v33 = vld [vmem:[%s9378_s17 + $0xf50] sm:$0xff]  ;;  %v1025_v35 = vld [vmem:[%s9378_s17 + $0xf58] sm:$0xff] }
 0x2e4   : > { %4358 = vst [vmem:[#allocation2 + $0x40] sm:$0xff] %v4342_v47  ;;  %4360 = vst [vmem:[#allocation2 + $0x50] sm:$0xff] %v4344_v51  ;;  %v7687_v22 = vcombine.high %v1009_v54, %v1013_v55  ;;  %v7684_v30 = vcombine.low %v1008_v17, %v1012_v18  ;;  %v7686_v31 = vcombine.low %v1009_v54, %v1013_v55  ;;  %v1029_v37 = vld [vmem:[%s9378_s17 + $0xf78] sm:$0xff]  ;;  %v1032_v43 = vld [vmem:[%s9378_s17 + $0xf90] sm:$0xff] }
 0x2e5   : > { %4359 = vst [vmem:[#allocation2 + $0x48] sm:$0xff] %v4343_v63  ;;  %4132 = vmatpush1.bf16.msra.mxu0 %v7644_v26  ;;  %4361 = vst [vmem:[#allocation2 + $0x58] sm:$0xff] %v4345_v58  ;;  %4304 = vmatpush1.bf16.msra.mxu1 %v7646_v45  ;;  %v7693_v32 = vcombine.high %v1016_v23, %v1020_v25  ;;  %v7695_v62 = vcombine.high %v1017_v28, %v1021_v29  ;;  %v1036_v44 = vld [vmem:[%s9378_s17 + $0xfb0] sm:$0xff]  ;;  %v1033_v24 = vld [vmem:[%s9378_s17 + $0xf98] sm:$0xff] }
 0x2e6   : > { %4133 = vmatprep.subr.bf16.mxu0 %v7653_v50  ;;  %4305 = vmatprep.subr.bf16.mxu1 %v7655_v53  ;;  %v7692_v40 = vcombine.low %v1016_v23, %v1020_v25  ;;  %v7694_v3 = vcombine.low %v1017_v28, %v1021_v29  ;;  %v7701_v41 = vcombine.high %v1024_v33, %v1028_v34  ;;  %v1037_v26 = vld [vmem:[%s9378_s17 + $0xfb8] sm:$0xff]  ;;  %v1040_v49 = vld [vmem:[%s9378_s17 + $0xfd0] sm:$0xff] }
 0x2e7   : > { %v7703_v42 = vcombine.high %v1025_v35, %v1029_v37  ;;  %v7700_v45 = vcombine.low %v1024_v33, %v1028_v34  ;;  %v7702_v46 = vcombine.low %v1025_v35, %v1029_v37  ;;  %v7709_v47 = vcombine.high %v1032_v43, %v1036_v44  ;;  %v1044_v50 = vld [vmem:[%s9378_s17 + $0xff0] sm:$0xff]  ;;  %v1041_v51 = vld [vmem:[%s9378_s17 + $0xfd8] sm:$0xff] }
 0x2e8   : > { %v7711_v48 = vcombine.high %v1033_v24, %v1037_v26  ;;  %v1045_v63 = vld [vmem:[%s9378_s17 + $0xff8] sm:$0xff]  ;;  %v7708_v36 = vcombine.low %v1032_v43, %v1036_v44  ;;  %v7710_v53 = vcombine.low %v1033_v24, %v1037_v26  ;;  %v7717_v56 = vcombine.high %v1040_v49, %v1044_v50 }
 0x2e9   : > { %4134 = vmatpush1.bf16.msra.mxu0 %v7652_v60  ;;  %4306 = vmatpush1.bf16.msra.mxu1 %v7654_v38  ;;  %v7719_v57 = vcombine.high %v1041_v51, %v1045_v63  ;;  %v7716_v58 = vcombine.low %v1040_v49, %v1044_v50  ;;  %v7718_v59 = vcombine.low %v1041_v51, %v1045_v63  ;;  %v516_v60 = vld [vmem:[#allocation2 + $0x30] sm:$0xff]  ;;  %v515_v38 = vld [vmem:[#allocation2 + $0x28] sm:$0xff]  ;;  %v525_v11 = vld [vmem:[#allocation2 + $0x78] sm:$0xff] }
 0x2ea   : > { %4135 = vmatprep.subr.bf16.mxu0 %v7661_v61  ;;  %4307 = vmatprep.subr.bf16.mxu1 %v7663_v27  ;;  %v517_v27 = vld [vmem:[#allocation2 + $0x38] sm:$0xff] }
 0x2eb   : > { %v8287_v54 = vld [vmem:[#allocation8 + $0x4] ss:$16 sps:$4 sm:$0xff] (!%p7720_p12)   ;;  %v8297_v23 = vld [vmem:[#allocation8 + $0x20] ss:$16 sps:$4 sm:$0xff] (!%p7720_p12)  }
 0x2ec   : > { %v8289_v55 = vld [vmem:[#allocation8 + $0x204] ss:$16 sps:$4 sm:$0xff] (!%p7720_p12)   ;;  %v8298_v25 = vld [vmem:[#allocation8 + $0x220] ss:$16 sps:$4 sm:$0xff] (!%p7720_p12)  }
 0x2ed   : > { %4136 = vmatpush1.bf16.msra.mxu0 %v7660_v39  ;;  %4308 = vmatpush1.bf16.msra.mxu1 %v7662_v5  ;;  %v524_v39 = vld [vmem:[#allocation2 + $0x70] sm:$0xff]  ;;  %v523_v5 = vld [vmem:[#allocation2 + $0x68] sm:$0xff] }
 0x2ee   : > { %4137 = vmatprep.subr.bf16.mxu0 %v7669_v6  ;;  %4309 = vmatprep.subr.bf16.mxu1 %v7671_v7  ;;  %v8299_v28 = vld [vmem:[#allocation8 + $0x44] ss:$16 sps:$4 sm:$0xff] (!%p7720_p12)   ;;  %v8309_v33 = vld [vmem:[#allocation8 + $0x60] ss:$16 sps:$4 sm:$0xff] (!%p7720_p12)  }
 0x2ef   : > { %v8301_v29 = vld [vmem:[#allocation8 + $0x244] ss:$16 sps:$4 sm:$0xff] (!%p7720_p12)   ;;  %v8310_v34 = vld [vmem:[#allocation8 + $0x260] ss:$16 sps:$4 sm:$0xff] (!%p7720_p12)  }
 0x2f0   : > { %v8311_v35 = vld [vmem:[#allocation8 + $0x84] ss:$16 sps:$4 sm:$0xff] (!%p7720_p12)   ;;  %v8321_v43 = vld [vmem:[#allocation8 + $0xa0] ss:$16 sps:$4 sm:$0xff] (!%p7720_p12)  }
 0x2f1   : > { %4138 = vmatpush1.bf16.msra.mxu0 %v7668_v13  ;;  %4310 = vmatpush1.bf16.msra.mxu1 %v7670_v14  ;;  %v8313_v37 = vld [vmem:[#allocation8 + $0x284] ss:$16 sps:$4 sm:$0xff] (!%p7720_p12)   ;;  %v8322_v44 = vld [vmem:[#allocation8 + $0x2a0] ss:$16 sps:$4 sm:$0xff] (!%p7720_p12)  }
 0x2f2   : > { %4139 = vmatprep.subr.bf16.mxu0 %v7677_v15  ;;  %4311 = vmatprep.subr.bf16.mxu1 %v7679_v16  ;;  %v8323_v24 = vld [vmem:[#allocation8 + $0xc4] ss:$16 sps:$4 sm:$0xff] (!%p7720_p12)   ;;  %v8333_v49 = vld [vmem:[#allocation8 + $0xe0] ss:$16 sps:$4 sm:$0xff] (!%p7720_p12)  }
 0x2f3   : > { %v8325_v26 = vld [vmem:[#allocation8 + $0x2c4] ss:$16 sps:$4 sm:$0xff] (!%p7720_p12)   ;;  %v8334_v50 = vld [vmem:[#allocation8 + $0x2e0] ss:$16 sps:$4 sm:$0xff] (!%p7720_p12)  }
 0x2f4   : > { %v8335_v51 = vld [vmem:[#allocation8 + $0x104] ss:$16 sps:$4 sm:$0xff] (!%p7720_p12)  }
 0x2f5   : > { %4140 = vmatpush1.bf16.msra.mxu0 %v7676_v19  ;;  %4312 = vmatpush1.bf16.msra.mxu1 %v7678_v20  ;;  %v8291_v19 = vld [vmem:[#allocation8] ss:$16 sps:$4 sm:$0xff] (!%p7720_p12)   ;;  %v8337_v63 = vld [vmem:[#allocation8 + $0x304] ss:$16 sps:$4 sm:$0xff] (!%p7720_p12)  }
 0x2f6   : > { %4141 = vmatprep.subr.bf16.mxu0 %v7685_v21  ;;  %4313 = vmatprep.subr.bf16.mxu1 %v7687_v22  ;;  %v8292_v20 = vld [vmem:[#allocation8 + $0x200] ss:$16 sps:$4 sm:$0xff] (!%p7720_p12)   ;;  %v8293_v21 = vld [vmem:[#allocation8 + $0x24] ss:$16 sps:$4 sm:$0xff] (!%p7720_p12)  }
 0x2f7   : > { %v8295_v22 = vld [vmem:[#allocation8 + $0x224] ss:$16 sps:$4 sm:$0xff] (!%p7720_p12)  }
 0x2f9   : > { %4142 = vmatpush1.bf16.msra.mxu0 %v7684_v30  ;;  %4314 = vmatpush1.bf16.msra.mxu1 %v7686_v31  ;;  %v8303_v30 = vld [vmem:[#allocation8 + $0x40] ss:$16 sps:$4 sm:$0xff] (!%p7720_p12)  }
 0x2fa   : > { %4143 = vmatprep.subr.bf16.mxu0 %v7693_v32  ;;  %4315 = vmatprep.subr.bf16.mxu1 %v7695_v62  ;;  %v8304_v31 = vld [vmem:[#allocation8 + $0x240] ss:$16 sps:$4 sm:$0xff] (!%p7720_p12)   ;;  %v8305_v32 = vld [vmem:[#allocation8 + $0x64] ss:$16 sps:$4 sm:$0xff] (!%p7720_p12)  }
 0x2fb   : > { %v8307_v62 = vld [vmem:[#allocation8 + $0x264] ss:$16 sps:$4 sm:$0xff] (!%p7720_p12)  }
 0x2fd   : > { %4144 = vmatpush1.bf16.msra.mxu0 %v7692_v40  ;;  %4316 = vmatpush1.bf16.msra.mxu1 %v7694_v3  ;;  %v8315_v40 = vld [vmem:[#allocation8 + $0x80] ss:$16 sps:$4 sm:$0xff] (!%p7720_p12)  }
 0x2fe   : > { %4145 = vmatprep.subr.bf16.mxu0 %v7701_v41  ;;  %4317 = vmatprep.subr.bf16.mxu1 %v7703_v42  ;;  %v8316_v3 = vld [vmem:[#allocation8 + $0x280] ss:$16 sps:$4 sm:$0xff] (!%p7720_p12)   ;;  %v8317_v41 = vld [vmem:[#allocation8 + $0xa4] ss:$16 sps:$4 sm:$0xff] (!%p7720_p12)  }
 0x2ff   : > { %v8319_v42 = vld [vmem:[#allocation8 + $0x2a4] ss:$16 sps:$4 sm:$0xff] (!%p7720_p12)  }
 0x301   : > { %4146 = vmatpush1.bf16.msra.mxu0 %v7700_v45  ;;  %4318 = vmatpush1.bf16.msra.mxu1 %v7702_v46  ;;  %v8327_v45 = vld [vmem:[#allocation8 + $0xc0] ss:$16 sps:$4 sm:$0xff] (!%p7720_p12)  }
 0x302   : > { %4147 = vmatprep.subr.bf16.mxu0 %v7709_v47  ;;  %4319 = vmatprep.subr.bf16.mxu1 %v7711_v48  ;;  %v8328_v46 = vld [vmem:[#allocation8 + $0x2c0] ss:$16 sps:$4 sm:$0xff] (!%p7720_p12)   ;;  %v8329_v47 = vld [vmem:[#allocation8 + $0xe4] ss:$16 sps:$4 sm:$0xff] (!%p7720_p12)  }
 0x303   : > { %v8331_v48 = vld [vmem:[#allocation8 + $0x2e4] ss:$16 sps:$4 sm:$0xff] (!%p7720_p12)  }
 0x305   : > { %4148 = vmatpush1.bf16.msra.mxu0 %v7708_v36  ;;  %4320 = vmatpush1.bf16.msra.mxu1 %v7710_v53  ;;  %v8339_v36 = vld [vmem:[#allocation8 + $0x100] ss:$16 sps:$4 sm:$0xff] (!%p7720_p12)  }
 0x306   : > { %4149 = vmatprep.subr.bf16.mxu0 %v7717_v56  ;;  %4321 = vmatprep.subr.bf16.mxu1 %v7719_v57  ;;  %v8340_v53 = vld [vmem:[#allocation8 + $0x300] ss:$16 sps:$4 sm:$0xff] (!%p7720_p12)   ;;  %v8341_v56 = vld [vmem:[#allocation8 + $0x124] ss:$16 sps:$4 sm:$0xff] (!%p7720_p12)   ;;  %v4388_v57 = vlaneseq (!%p7720_p12) }
 0x309   : > { %4150 = vmatpush1.bf16.msra.mxu0 %v7716_v58  ;;  %4322 = vmatpush1.bf16.msra.mxu1 %v7718_v59  ;;  %v8343_v58 = vld [vmem:[#allocation8 + $0x324] ss:$16 sps:$4 sm:$0xff] (!%p7720_p12)   ;;  %v8345_v59 = vld [vmem:[#allocation8 + $0x120] ss:$16 sps:$4 sm:$0xff] (!%p7720_p12)  }
 0x30a   : > { %6026 = vmatprep.subr.bf16.mxu1 (!%p7720_p12), %v8287_v54  ;;  %6069 = vmatprep.subr.bf16.mxu0 (!%p7720_p12), %v8289_v55 }
 0x30c   : > { %4152 = vmatmul.mubr.bf16.vlgmr.msra.gmra.mrb[4].mxu0 %v9732_v10  ;;  %4324 = vmatmul.mubr.bf16.vlgmr.msra.gmra.mrb[4].mxu1 %v9732_v10 }
 0x30d   : > { %6027 = vmatpush1.bf16.msra.mxu1 (!%p7720_p12), %v8291_v19  ;;  %6070 = vmatpush1.bf16.msra.mxu0 (!%p7720_p12), %v8292_v20  ;;  %v8363_v19 = vld [vmem:[#allocation8 + $0x180] ss:$16 sps:$4 sm:$0xff] (!%p7720_p12)  }
 0x30e   : > { %6028 = vmatprep.subr.bf16.mxu1 (!%p7720_p12), %v8293_v21  ;;  %6071 = vmatprep.subr.bf16.mxu0 (!%p7720_p12), %v8295_v22  ;;  %v8364_v20 = vld [vmem:[#allocation8 + $0x380] ss:$16 sps:$4 sm:$0xff] (!%p7720_p12)  }
 0x311   : > { %6029 = vmatpush1.bf16.msra.mxu1 (!%p7720_p12), %v8297_v23  ;;  %6072 = vmatpush1.bf16.msra.mxu0 (!%p7720_p12), %v8298_v25  ;;  %v8365_v25 = vld [vmem:[#allocation8 + $0x1a4] ss:$16 sps:$4 sm:$0xff] (!%p7720_p12)  }
 0x312   : > { %6030 = vmatprep.subr.bf16.mxu1 (!%p7720_p12), %v8299_v28  ;;  %6073 = vmatprep.subr.bf16.mxu0 (!%p7720_p12), %v8301_v29 }
 0x315   : > { %6031 = vmatpush1.bf16.msra.mxu1 (!%p7720_p12), %v8303_v30  ;;  %6074 = vmatpush1.bf16.msra.mxu0 (!%p7720_p12), %v8304_v31  ;;  %v8367_v30 = vld [vmem:[#allocation8 + $0x3a4] ss:$16 sps:$4 sm:$0xff] (!%p7720_p12)  }
 0x316   : > { %6032 = vmatprep.subr.bf16.mxu1 (!%p7720_p12), %v8305_v32  ;;  %6075 = vmatprep.subr.bf16.mxu0 (!%p7720_p12), %v8307_v62  ;;  %v8369_v62 = vld [vmem:[#allocation8 + $0x1a0] ss:$16 sps:$4 sm:$0xff] (!%p7720_p12)  }
 0x319   : > { %6033 = vmatpush1.bf16.msra.mxu1 (!%p7720_p12), %v8309_v33  ;;  %6076 = vmatpush1.bf16.msra.mxu0 (!%p7720_p12), %v8310_v34  ;;  %v8370_v33 = vld [vmem:[#allocation8 + $0x3a0] ss:$16 sps:$4 sm:$0xff] (!%p7720_p12)  }
 0x31a   : > { %6034 = vmatprep.subr.bf16.mxu1 (!%p7720_p12), %v8311_v35  ;;  %6077 = vmatprep.subr.bf16.mxu0 (!%p7720_p12), %v8313_v37  ;;  %v4370_v35 = vld [vmem:[#allocation2] sm:$0xff] (!%p7720_p12) }
 0x31d   : > { %6035 = vmatpush1.bf16.msra.mxu1 (!%p7720_p12), %v8315_v40  ;;  %6078 = vmatpush1.bf16.msra.mxu0 (!%p7720_p12), %v8316_v3  ;;  %v4378_v40 = vld [vmem:[#allocation2 + $0x40] sm:$0xff] (!%p7720_p12) }
 0x31e   : > { %6036 = vmatprep.subr.bf16.mxu1 (!%p7720_p12), %v8317_v41  ;;  %6079 = vmatprep.subr.bf16.mxu0 (!%p7720_p12), %v8319_v42  ;;  %v4372_v42 = vld [vmem:[#allocation2 + $0x10] sm:$0xff] (!%p7720_p12) }
 0x321   : > { %6037 = vmatpush1.bf16.msra.mxu1 (!%p7720_p12), %v8321_v43  ;;  %6080 = vmatpush1.bf16.msra.mxu0 (!%p7720_p12), %v8322_v44  ;;  %v4380_v43 = vld [vmem:[#allocation2 + $0x50] sm:$0xff] (!%p7720_p12)  ;;  %v8371_v44 = vld [vmem:[#allocation8 + $0x1c4] ss:$16 sps:$4 sm:$0xff] (!%p7720_p12)  }
 0x322   : > { %6038 = vmatprep.subr.bf16.mxu1 (!%p7720_p12), %v8323_v24  ;;  %6081 = vmatprep.subr.bf16.mxu0 (!%p7720_p12), %v8325_v26  ;;  %v8373_v24 = vld [vmem:[#allocation8 + $0x3c4] ss:$16 sps:$4 sm:$0xff] (!%p7720_p12)  }
 0x325   : > { %6039 = vmatpush1.bf16.msra.mxu1 (!%p7720_p12), %v8327_v45  ;;  %6082 = vmatpush1.bf16.msra.mxu0 (!%p7720_p12), %v8328_v46 }
 0x326   : > { %6040 = vmatprep.subr.bf16.mxu1 (!%p7720_p12), %v8329_v47  ;;  %6083 = vmatprep.subr.bf16.mxu0 (!%p7720_p12), %v8331_v48  ;;  %v8375_v48 = vld [vmem:[#allocation8 + $0x1c0] ss:$16 sps:$4 sm:$0xff] (!%p7720_p12)  }
 0x329   : > { %6041 = vmatpush1.bf16.msra.mxu1 (!%p7720_p12), %v8333_v49  ;;  %6084 = vmatpush1.bf16.msra.mxu0 (!%p7720_p12), %v8334_v50  ;;  %v8376_v49 = vld [vmem:[#allocation8 + $0x3c0] ss:$16 sps:$4 sm:$0xff] (!%p7720_p12)  }
 0x32a   : > { %6042 = vmatprep.subr.bf16.mxu1 (!%p7720_p12), %v8335_v51  ;;  %6085 = vmatprep.subr.bf16.mxu0 (!%p7720_p12), %v8337_v63  ;;  %v8377_v51 = vld [vmem:[#allocation8 + $0x1e4] ss:$16 sps:$4 sm:$0xff] (!%p7720_p12)  }
 0x32b   : > { %v8379_v63 = vld [vmem:[#allocation8 + $0x3e4] ss:$16 sps:$4 sm:$0xff] (!%p7720_p12)  }
 0x32d   : > { %6043 = vmatpush1.bf16.msra.mxu1 (!%p7720_p12), %v8339_v36  ;;  %6086 = vmatpush1.bf16.msra.mxu0 (!%p7720_p12), %v8340_v53 }
 0x32e   : > { %6044 = vmatprep.subr.bf16.mxu1 (!%p7720_p12), %v8341_v56  ;;  %6087 = vmatprep.subr.bf16.mxu0 (!%p7720_p12), %v8343_v58 }
 0x331   : > { %6045 = vmatpush1.bf16.msra.mxu1 (!%p7720_p12), %v8345_v59 }
 0x3df   : > { %v4153_v61 = vpop.f32.mrb[4].mxu0  ;;  %v4325_v2 = vpop.f32.mrb[4].mxu1  ;;  %4369 = sbr.rel (%p7720_p12) target bundleno = 1939 (0x793), region = 119 }
 0x3e0   : > { %v4338_v1 = vadd.f32 %v4153_v61, %v514_v52  ;;  %v4155_v4 = vpop.f32.mrb[5].mxu0  ;;  %v4340_v6 = vadd.f32 %v4325_v2, %v516_v60  ;;  %v4327_v8 = vpop.f32.mrb[5].mxu1  ;;  %v8346_v52 = vld [vmem:[#allocation8 + $0x320] ss:$16 sps:$4 sm:$0xff] (!%p7720_p12)   ;;  %v8347_v60 = vld [vmem:[#allocation8 + $0x144] ss:$16 sps:$4 sm:$0xff] (!%p7720_p12)  }
 0x3e1   : > { %v4339_v7 = vadd.f32 %v4155_v4, %v515_v38  ;;  %v4157_v9 = vpop.f32.mrb[6].mxu0  ;;  %v4341_v12 = vadd.f32 %v4327_v8, %v517_v27  ;;  %v4329_v10 = vpop.f32.mrb[6].mxu1  ;;  %v10003_v38 = vshrl.u32 (!%p7720_p12), %v4388_v57, 7  ;;  %v8349_v61 = vld [vmem:[#allocation8 + $0x344] ss:$16 sps:$4 sm:$0xff] (!%p7720_p12)   ;;  %6088 = vmatpush1.bf16.msra.mxu0 (!%p7720_p12), %v8346_v52  ;;  %6046 = vmatprep.subr.bf16.mxu1 (!%p7720_p12), %v8347_v60 }
 0x3e2   : > { %4354 = vst [vmem:[#allocation2 + $0x20] sm:$0xff] %v4338_v1  ;;  %v4346_v13 = vadd.f32 %v4157_v9, %v522_v0  ;;  %v4159_v14 = vpop.f32.mrb[7].mxu0  ;;  %4356 = vst [vmem:[#allocation2 + $0x30] sm:$0xff] %v4340_v6  ;;  %v4348_v15 = vadd.f32 %v4329_v10, %v524_v39  ;;  %v4331_v17 = vpop.f32.mrb[7].mxu1  ;;  %v8351_v27 = vld [vmem:[#allocation8 + $0x140] ss:$16 sps:$4 sm:$0xff] (!%p7720_p12)   ;;  %6089 = vmatprep.subr.bf16.mxu0 (!%p7720_p12), %v8349_v61 }
 0x3e3   : > { %4355 = vst [vmem:[#allocation2 + $0x28] sm:$0xff] %v4339_v7  ;;  %v4347_v16 = vadd.f32 %v4159_v14, %v523_v5  ;;  %4357 = vst [vmem:[#allocation2 + $0x38] sm:$0xff] %v4341_v12  ;;  %v4349_v18 = vadd.f32 %v4331_v17, %v525_v11  ;;  %v8352_v0 = vld [vmem:[#allocation8 + $0x340] ss:$16 sps:$4 sm:$0xff] (!%p7720_p12)   ;;  %v8353_v1 = vld [vmem:[#allocation8 + $0x164] ss:$16 sps:$4 sm:$0xff] (!%p7720_p12)   ;;  %6047 = vmatpush1.bf16.msra.mxu1 (!%p7720_p12), %v8351_v27 }
 0x3e4   : > { %4362 = vst [vmem:[#allocation2 + $0x60] sm:$0xff] %v4346_v13  ;;  %4364 = vst [vmem:[#allocation2 + $0x70] sm:$0xff] %v4348_v15  ;;  %v10006_v2 = vsub.s32 (!%p7720_p12), 1, %v10003_v38  ;;  %v4402_v4 = vsub.s32 (!%p7720_p12), 3, %v10003_v38  ;;  %v8355_v39 = vld [vmem:[#allocation8 + $0x364] ss:$16 sps:$4 sm:$0xff] (!%p7720_p12)   ;;  %6048 = vmatprep.subr.bf16.mxu1 (!%p7720_p12), %v8353_v1 }
 0x3e5   : > { %4363 = vst [vmem:[#allocation2 + $0x68] sm:$0xff] %v4347_v16  ;;  %4365 = vst [vmem:[#allocation2 + $0x78] sm:$0xff] %v4349_v18  ;;  %v4406_v5 = vsub.s32 (!%p7720_p12), 4, %v10003_v38  ;;  %v8357_v6 = vld [vmem:[#allocation8 + $0x160] ss:$16 sps:$4 sm:$0xff] (!%p7720_p12)   ;;  %v10010_v11 = vld [vmem:[#allocation6] sm:$0xff] (!%p7720_p12)  ;;  %6090 = vmatpush1.bf16.msra.mxu0 (!%p7720_p12), %v8352_v0 }
 0x3e6   : > { %v8358_v7 = vld [vmem:[#allocation8 + $0x360] ss:$16 sps:$4 sm:$0xff]   ;;  %v8359_v12 = vld [vmem:[#allocation8 + $0x184] ss:$16 sps:$4 sm:$0xff]   ;;  %v4395_v13 = vrot.slane %v10010_v11, %v10006_v2  ;;  %v4403_v15 = vrot.slane %v10010_v11, %v4402_v4  ;;  %6091 = vmatprep.subr.bf16.mxu0 %v8355_v39  ;;  %v10021_v55 = vsub.s32 0, %v10003_v38  ;;  %v4398_v23 = vsub.s32 2, %v10003_v38 }
 0x3e7   : > { %v4371_v8 = vld [vmem:[#allocation2 + $0x8] sm:$0xff]  ;;  %v4373_v10 = vld [vmem:[#allocation2 + $0x18] sm:$0xff]  ;;  %v10018_v17 = vrot.slane %v10010_v11, %v4406_v5  ;;  %6049 = vmatpush1.bf16.msra.mxu1 %v8357_v6  ;;  %v4418_v50 = vsub.s32 7, %v10003_v38  ;;  %v4414_v36 = vsub.s32 6, %v10003_v38  ;;  %v8388_v0 = vld [vmem:[#allocation8 + $0xc] ss:$16 sps:$4 sm:$0xff]  }
 0x3e8   : > { %v4379_v9 = vld [vmem:[#allocation2 + $0x48] sm:$0xff]  ;;  %v4381_v14 = vld [vmem:[#allocation2 + $0x58] sm:$0xff]  ;;  %v4429_v18 = vadd.f32 %v4395_v13, %v4371_v8  ;;  %v4431_v21 = vadd.f32 %v4403_v15, %v4373_v10  ;;  %6050 = vmatprep.subr.bf16.mxu1 %v8359_v12  ;;  %v4391_v37 = vrot.slane %v10010_v11, %v10021_v55  ;;  %v4399_v41 = vrot.slane %v10010_v11, %v4398_v23  ;;  %v8386_v6 = vld [vmem:[#allocation8 + $0x8] ss:$16 sps:$4 sm:$0xff]  }
 0x3e9   : > { %v8361_v16 = vld [vmem:[#allocation8 + $0x384] ss:$16 sps:$4 sm:$0xff]   ;;  %v4437_v54 = vadd.f32 %v4395_v13, %v4379_v9  ;;  %v4439_v22 = vadd.f32 %v4403_v15, %v4381_v14  ;;  %6092 = vmatpush1.bf16.msra.mxu0 %v8358_v7  ;;  %v10038_v56 = vrot.slane %v10010_v11, %v4418_v50  ;;  %v10041_v52 = vrot.slane %v10010_v11, %v4414_v36  ;;  %v8381_v60 = vld [vmem:[#allocation8 + $0x1e0] ss:$16 sps:$4 sm:$0xff]   ;;  %v8394_v8 = vld [vmem:[#allocation8 + $0x2c] ss:$16 sps:$4 sm:$0xff]  }
 0x3ea   : > { %v4445_v28 = vmax.f32 %v4429_v18, 0.0  ;;  %6093 = vmatprep.subr.bf16.mxu0 %v8361_v16  ;;  %v4447_v31 = vmax.f32 %v4431_v21, 0.0  ;;  %v4428_v26 = vadd.f32 %v4391_v37, %v4370_v35  ;;  %v4436_v45 = vadd.f32 %v4391_v37, %v4378_v40  ;;  %v8382_v61 = vld [vmem:[#allocation8 + $0x3e0] ss:$16 sps:$4 sm:$0xff]   ;;  %v8385_v27 = vld [vmem:[#allocation8 + $0x404] ss:$16 sps:$4 sm:$0xff]  }
 0x3eb   : > { %v4453_v29 = vmax.f32 %v4437_v54, 0.0  ;;  %v4455_v32 = vmax.f32 %v4439_v22, 0.0  ;;  %6051 = vmatpush1.bf16.msra.mxu1 %v8363_v19  ;;  %v4430_v46 = vadd.f32 %v4399_v41, %v4372_v42  ;;  %v4438_v47 = vadd.f32 %v4399_v41, %v4380_v43  ;;  %v8383_v5 = vld [vmem:[#allocation8 + $0x400] ss:$16 sps:$4 sm:$0xff]   ;;  %v8391_v7 = vld [vmem:[#allocation8 + $0x424] ss:$16 sps:$4 sm:$0xff]  }
 0x3ec   : > { %6052 = vmatprep.subr.bf16.mxu1 %v8365_v25  ;;  %v4444_v53 = vmax.f32 %v4428_v26, 0.0  ;;  %v4452_v57 = vmax.f32 %v4436_v45, 0.0  ;;  %v8389_v9 = vld [vmem:[#allocation8 + $0x420] ss:$16 sps:$4 sm:$0xff]   ;;  %v8392_v12 = vld [vmem:[#allocation8 + $0x28] ss:$16 sps:$4 sm:$0xff]  }
 0x3ed   : > { %v10024_v34 = vpack.c.bf16 %v4453_v29, %v4445_v28  ;;  %v10028_v3 = vpack.c.bf16 %v4455_v32, %v4447_v31  ;;  %6094 = vmatpush1.bf16.msra.mxu0 %v8364_v20  ;;  %v4446_v58 = vmax.f32 %v4430_v46, 0.0  ;;  %v4454_v59 = vmax.f32 %v4438_v47, 0.0  ;;  %v8397_v13 = vld [vmem:[#allocation8 + $0x444] ss:$16 sps:$4 sm:$0xff]   ;;  %v8400_v10 = vld [vmem:[#allocation8 + $0x4c] ss:$16 sps:$4 sm:$0xff]  }
 0x3ee   : > { %6095 = vmatprep.subr.bf16.mxu0 %v8367_v30  ;;  %v10043_v1 = vpack.c.bf16 %v4452_v57, %v4444_v53  ;;  %v8395_v14 = vld [vmem:[#allocation8 + $0x440] ss:$16 sps:$4 sm:$0xff]   ;;  %v8398_v15 = vld [vmem:[#allocation8 + $0x48] ss:$16 sps:$4 sm:$0xff]   ;;  %v8403_v16 = vld [vmem:[#allocation8 + $0x464] ss:$16 sps:$4 sm:$0xff]  }
 0x3ef   : > { %6058 = vmatprep.mubr.bf16.mxu1 %v10024_v34  ;;  %6101 = vmatprep.mubr.bf16.mxu0 %v10028_v3  ;;  %v10045_v39 = vpack.c.bf16 %v4454_v59, %v4446_v58  ;;  %v8406_v18 = vld [vmem:[#allocation8 + $0x6c] ss:$16 sps:$4 sm:$0xff]   ;;  %v8401_v54 = vld [vmem:[#allocation8 + $0x460] ss:$16 sps:$4 sm:$0xff]   ;;  %v8404_v19 = vld [vmem:[#allocation8 + $0x68] ss:$16 sps:$4 sm:$0xff]  }
 0x3f0   : > { %6053 = vmatpush1.bf16.msra.mxu1 %v8369_v62  ;;  %v8409_v20 = vld [vmem:[#allocation8 + $0x484] ss:$16 sps:$4 sm:$0xff]   ;;  %v8412_v21 = vld [vmem:[#allocation8 + $0x8c] ss:$16 sps:$4 sm:$0xff]   ;;  %v8407_v22 = vld [vmem:[#allocation8 + $0x480] ss:$16 sps:$4 sm:$0xff]  }
 0x3f1   : > { %6096 = vmatpush1.bf16.msra.mxu0 %v8370_v33  ;;  %6054 = vmatprep.subr.bf16.mxu1 %v8371_v44  ;;  %v8410_v25 = vld [vmem:[#allocation8 + $0x88] ss:$16 sps:$4 sm:$0xff]   ;;  %v8415_v28 = vld [vmem:[#allocation8 + $0x4a4] ss:$16 sps:$4 sm:$0xff]   ;;  %v8418_v29 = vld [vmem:[#allocation8 + $0xac] ss:$16 sps:$4 sm:$0xff]  }
 0x3f2   : > { %6097 = vmatprep.subr.bf16.mxu0 %v8373_v24  ;;  %v4410_v30 = vsub.s32 5, %v10003_v38  ;;  %v8413_v31 = vld [vmem:[#allocation8 + $0x4a0] ss:$16 sps:$4 sm:$0xff]   ;;  %v8416_v32 = vld [vmem:[#allocation8 + $0xa8] ss:$16 sps:$4 sm:$0xff]  }
 0x3f3   : > { %v8421_v62 = vld [vmem:[#allocation8 + $0x4c4] ss:$16 sps:$4 sm:$0xff]   ;;  %v8424_v33 = vld [vmem:[#allocation8 + $0xcc] ss:$16 sps:$4 sm:$0xff]   ;;  %v8419_v35 = vld [vmem:[#allocation8 + $0x4c0] ss:$16 sps:$4 sm:$0xff]  }
 0x3f4   : > { %6055 = vmatpush1.bf16.msra.mxu1 %v8375_v48  ;;  %v8422_v37 = vld [vmem:[#allocation8 + $0xc8] ss:$16 sps:$4 sm:$0xff]   ;;  %v8427_v40 = vld [vmem:[#allocation8 + $0x4e4] ss:$16 sps:$4 sm:$0xff]   ;;  %v8430_v41 = vld [vmem:[#allocation8 + $0xec] ss:$16 sps:$4 sm:$0xff]  }
 0x3f5   : > { %6098 = vmatpush1.bf16.msra.mxu0 %v8376_v49  ;;  %6056 = vmatprep.subr.bf16.mxu1 %v8377_v51  ;;  %v4375_v42 = vld [vmem:[#allocation2 + $0x28] sm:$0xff]  ;;  %v8428_v46 = vld [vmem:[#allocation8 + $0xe8] ss:$16 sps:$4 sm:$0xff]   ;;  %v8436_v48 = vld [vmem:[#allocation8 + $0x10c] ss:$16 sps:$4 sm:$0xff]  }
 0x3f6   : > { %6099 = vmatprep.subr.bf16.mxu0 %v8379_v63  ;;  %v4383_v43 = vld [vmem:[#allocation2 + $0x68] sm:$0xff]  ;;  %v8434_v51 = vld [vmem:[#allocation8 + $0x108] ss:$16 sps:$4 sm:$0xff]   ;;  %v8442_v36 = vld [vmem:[#allocation8 + $0x12c] ss:$16 sps:$4 sm:$0xff]  }
 0x3f7   : > { %v8425_v45 = vld [vmem:[#allocation8 + $0x4e0] ss:$16 sps:$4 sm:$0xff]   ;;  %v8439_v63 = vld [vmem:[#allocation8 + $0x524] ss:$16 sps:$4 sm:$0xff]   ;;  %v8440_v57 = vld [vmem:[#allocation8 + $0x128] ss:$16 sps:$4 sm:$0xff]  }
 0x3f8   : > { %6057 = vmatpush1.bf16.msra.mxu1 %v8381_v60  ;;  %v8431_v50 = vld [vmem:[#allocation8 + $0x500] ss:$16 sps:$4 sm:$0xff]   ;;  %v8445_v58 = vld [vmem:[#allocation8 + $0x544] ss:$16 sps:$4 sm:$0xff]   ;;  %v8448_v59 = vld [vmem:[#allocation8 + $0x14c] ss:$16 sps:$4 sm:$0xff]  }
 0x3f9   : > { %6100 = vmatpush1.bf16.msra.mxu0 %v8382_v61  ;;  %6198 = vmatprep.subr.bf16.mxu1 %v8388_v0  ;;  %v8437_v53 = vld [vmem:[#allocation8 + $0x520] ss:$16 sps:$4 sm:$0xff]   ;;  %v8446_v61 = vld [vmem:[#allocation8 + $0x148] ss:$16 sps:$4 sm:$0xff]   ;;  %v8454_v0 = vld [vmem:[#allocation8 + $0x16c] ss:$16 sps:$4 sm:$0xff]  }
 0x3fa   : > { %6112 = vmatprep.subr.bf16.mxu0 %v8385_v27  ;;  %v8443_v60 = vld [vmem:[#allocation8 + $0x540] ss:$16 sps:$4 sm:$0xff]   ;;  %v8451_v27 = vld [vmem:[#allocation8 + $0x564] ss:$16 sps:$4 sm:$0xff]  }
 0x3fb   : > { %6059 = vmatmul.mubr.bf16.vlgmr.msra.gmra.mrb[0].mxu1 %v10043_v1  ;;  %v8779_v38 = vld [vmem:[#allocation14 + $0x70] sm:$0xff]  }
 0x3fc   : > { %6102 = vmatmul.mubr.bf16.vlgmr.msra.gmra.mrb[0].mxu0 %v10045_v39  ;;  %6199 = vmatpush1.bf16.msra.mxu1 %v8386_v6  ;;  %v8452_v6 = vld [vmem:[#allocation8 + $0x168] ss:$16 sps:$4 sm:$0xff]  }
 0x3fd   : > { %6113 = vmatpush1.bf16.msra.mxu0 %v8383_v5  ;;  %6200 = vmatprep.subr.bf16.mxu1 %v8394_v8  ;;  %v8449_v5 = vld [vmem:[#allocation8 + $0x560] ss:$16 sps:$4 sm:$0xff]   ;;  %v8460_v8 = vld [vmem:[#allocation8 + $0x18c] ss:$16 sps:$4 sm:$0xff]  }
 0x3fe   : > { %6114 = vmatprep.subr.bf16.mxu0 %v8391_v7  ;;  %6230 = vmatprep.mubr.bf16.mxu1 %v10024_v34  ;;  %v4411_v34 = vrot.slane %v10010_v11, %v4410_v30  ;;  %v8433_v11 = vld [vmem:[#allocation8 + $0x504] ss:$16 sps:$4 sm:$0xff]  }
 0x3ff   : > { %v8457_v7 = vld [vmem:[#allocation8 + $0x584] ss:$16 sps:$4 sm:$0xff]  }
 0x400   : > { %6201 = vmatpush1.bf16.msra.mxu1 %v8392_v12  ;;  %v4433_v44 = vadd.f32 %v4411_v34, %v4375_v42  ;;  %v4441_v24 = vadd.f32 %v4411_v34, %v4383_v43  ;;  %v8458_v12 = vld [vmem:[#allocation8 + $0x188] ss:$16 sps:$4 sm:$0xff]   ;;  %v8484_v34 = vld [vmem:[#allocation8 + $0x20c] ss:$16 sps:$4 sm:$0xff]   ;;  %v8485_v42 = vld [vmem:[#allocation8 + $0x620] ss:$16 sps:$4 sm:$0xff]  }
 0x401   : > { %6115 = vmatpush1.bf16.msra.mxu0 %v8389_v9  ;;  %6202 = vmatprep.subr.bf16.mxu1 %v8400_v10  ;;  %v8455_v9 = vld [vmem:[#allocation8 + $0x580] ss:$16 sps:$4 sm:$0xff]   ;;  %v8466_v10 = vld [vmem:[#allocation8 + $0x1ac] ss:$16 sps:$4 sm:$0xff]   ;;  %v8488_v43 = vld [vmem:[#allocation8 + $0x228] ss:$16 sps:$4 sm:$0xff]  }
 0x402   : > { %6116 = vmatprep.subr.bf16.mxu0 %v8397_v13  ;;  %v4449_v26 = vmax.f32 %v4433_v44, 0.0  ;;  %v4457_v47 = vmax.f32 %v4441_v24, 0.0  ;;  %v8463_v13 = vld [vmem:[#allocation8 + $0x5a4] ss:$16 sps:$4 sm:$0xff]  }
 0x403   : > { %v4377_v44 = vld [vmem:[#allocation2 + $0x38] sm:$0xff] }
 0x404   : > { %6203 = vmatpush1.bf16.msra.mxu1 %v8398_v15  ;;  %v10052_v49 = vpack.c.bf16 %v4457_v47, %v4449_v26  ;;  %v8464_v15 = vld [vmem:[#allocation8 + $0x1a8] ss:$16 sps:$4 sm:$0xff]   ;;  %v8493_v24 = vld [vmem:[#allocation8 + $0x644] ss:$16 sps:$4 sm:$0xff]   ;;  %v8496_v26 = vld [vmem:[#allocation8 + $0x24c] ss:$16 sps:$4 sm:$0xff]  }
 0x405   : > { %6117 = vmatpush1.bf16.msra.mxu0 %v8395_v14  ;;  %6204 = vmatprep.subr.bf16.mxu1 %v8406_v18  ;;  %v8461_v14 = vld [vmem:[#allocation8 + $0x5a0] ss:$16 sps:$4 sm:$0xff]   ;;  %v4382_v18 = vld [vmem:[#allocation2 + $0x60] sm:$0xff] }
 0x406   : > { %6118 = vmatprep.subr.bf16.mxu0 %v8403_v16  ;;  %6144 = vmatprep.mubr.bf16.mxu0 %v10052_v49  ;;  %v4374_v16 = vld [vmem:[#allocation2 + $0x20] sm:$0xff] }
 0x408   : > { %6205 = vmatpush1.bf16.msra.mxu1 %v8404_v19  ;;  %v8472_v19 = vld [vmem:[#allocation8 + $0x1cc] ss:$16 sps:$4 sm:$0xff]  }
 0x409   : > { %6119 = vmatpush1.bf16.msra.mxu0 %v8401_v54  ;;  %6206 = vmatprep.subr.bf16.mxu1 %v8412_v21  ;;  %v8469_v54 = vld [vmem:[#allocation8 + $0x5c4] ss:$16 sps:$4 sm:$0xff]   ;;  %v4440_v21 = vadd.f32 %v10018_v17, %v4382_v18  ;;  %v8530_v18 = vld [vmem:[#allocation8 + $0x308] ss:$16 sps:$4 sm:$0xff]  }
 0x40a   : > { %6120 = vmatprep.subr.bf16.mxu0 %v8409_v20  ;;  %v4432_v20 = vadd.f32 %v10018_v17, %v4374_v16  ;;  %v8479_v17 = vld [vmem:[#allocation8 + $0x600] ss:$16 sps:$4 sm:$0xff]  }
 0x40b   : > { %v8527_v16 = vld [vmem:[#allocation8 + $0x700] ss:$16 sps:$4 sm:$0xff]  }
 0x40c   : > { %6207 = vmatpush1.bf16.msra.mxu1 %v8410_v25  ;;  %v8470_v25 = vld [vmem:[#allocation8 + $0x1c8] ss:$16 sps:$4 sm:$0xff]   ;;  %v4448_v30 = vmax.f32 %v4432_v20, 0.0  ;;  %v8533_v20 = vld [vmem:[#allocation8 + $0x720] ss:$16 sps:$4 sm:$0xff]  }
 0x40d   : > { %6121 = vmatpush1.bf16.msra.mxu0 %v8407_v22  ;;  %6208 = vmatprep.subr.bf16.mxu1 %v8418_v29  ;;  %v8467_v22 = vld [vmem:[#allocation8 + $0x5c0] ss:$16 sps:$4 sm:$0xff]   ;;  %v8478_v29 = vld [vmem:[#allocation8 + $0x1ec] ss:$16 sps:$4 sm:$0xff]  }
 0x40e   : > { %6122 = vmatprep.subr.bf16.mxu0 %v8415_v28  ;;  %v8475_v28 = vld [vmem:[#allocation8 + $0x5e4] ss:$16 sps:$4 sm:$0xff]  }
 0x410   : > { %6209 = vmatpush1.bf16.msra.mxu1 %v8416_v32  ;;  %v8473_v32 = vld [vmem:[#allocation8 + $0x5e0] ss:$16 sps:$4 sm:$0xff]  }
 0x411   : > { %6123 = vmatpush1.bf16.msra.mxu0 %v8413_v31  ;;  %6210 = vmatprep.subr.bf16.mxu1 %v8424_v33  ;;  %v4456_v31 = vmax.f32 %v4440_v21, 0.0  ;;  %v8481_v33 = vld [vmem:[#allocation8 + $0x604] ss:$16 sps:$4 sm:$0xff]   ;;  %v8536_v21 = vld [vmem:[#allocation8 + $0x328] ss:$16 sps:$4 sm:$0xff]  }
 0x412   : > { %6124 = vmatprep.subr.bf16.mxu0 %v8421_v62  ;;  %v8476_v62 = vld [vmem:[#allocation8 + $0x1e8] ss:$16 sps:$4 sm:$0xff]  }
 0x414   : > { %6211 = vmatpush1.bf16.msra.mxu1 %v8422_v37  ;;  %v8482_v37 = vld [vmem:[#allocation8 + $0x208] ss:$16 sps:$4 sm:$0xff]  }
 0x415   : > { %6125 = vmatpush1.bf16.msra.mxu0 %v8419_v35  ;;  %6212 = vmatprep.subr.bf16.mxu1 %v8430_v41  ;;  %v10057_v35 = vpack.c.bf16 %v4456_v31, %v4448_v30  ;;  %v8490_v41 = vld [vmem:[#allocation8 + $0x22c] ss:$16 sps:$4 sm:$0xff]   ;;  %v8547_v30 = vld [vmem:[#allocation8 + $0x764] ss:$16 sps:$4 sm:$0xff]  }
 0x416   : > { %6126 = vmatprep.subr.bf16.mxu0 %v8427_v40  ;;  %v8487_v40 = vld [vmem:[#allocation8 + $0x624] ss:$16 sps:$4 sm:$0xff]   ;;  %v8550_v31 = vld [vmem:[#allocation8 + $0x36c] ss:$16 sps:$4 sm:$0xff]  }
 0x418   : > { %6213 = vmatpush1.bf16.msra.mxu1 %v8428_v46  ;;  %v4435_v46 = vadd.f32 %v10038_v56, %v4377_v44  ;;  %v8565_v44 = vld [vmem:[#allocation8 + $0x7c4] ss:$16 sps:$4 sm:$0xff]  }
 0x419   : > { %6127 = vmatpush1.bf16.msra.mxu0 %v8425_v45  ;;  %6214 = vmatprep.subr.bf16.mxu1 %v8436_v48  ;;  %v4385_v45 = vld [vmem:[#allocation2 + $0x78] sm:$0xff]  ;;  %v8494_v48 = vld [vmem:[#allocation8 + $0x248] ss:$16 sps:$4 sm:$0xff]  }
 0x41a   : > { %6128 = vmatprep.subr.bf16.mxu0 %v8433_v11  ;;  %v4443_v47 = vadd.f32 %v10038_v56, %v4385_v45  ;;  %v4451_v11 = vmax.f32 %v4435_v46, 0.0  ;;  %v8503_v56 = vld [vmem:[#allocation8 + $0x680] ss:$16 sps:$4 sm:$0xff]   ;;  %v4384_v45 = vld [vmem:[#allocation2 + $0x70] sm:$0xff] }
 0x41b   : > { %v8563_v46 = vld [vmem:[#allocation8 + $0x7c0] ss:$16 sps:$4 sm:$0xff]  }
 0x41c   : > { %6215 = vmatpush1.bf16.msra.mxu1 %v8434_v51  ;;  %v8499_v51 = vld [vmem:[#allocation8 + $0x664] ss:$16 sps:$4 sm:$0xff]  }
 0x41d   : > { %6129 = vmatpush1.bf16.msra.mxu0 %v8431_v50  ;;  %6216 = vmatprep.subr.bf16.mxu1 %v8442_v36  ;;  %v4459_v50 = vmax.f32 %v4443_v47, 0.0  ;;  %v8566_v47 = vld [vmem:[#allocation8 + $0x3c8] ss:$16 sps:$4 sm:$0xff]  }
 0x41e   : > { %6130 = vmatprep.subr.bf16.mxu0 %v8439_v63  ;;  %v8502_v63 = vld [vmem:[#allocation8 + $0x26c] ss:$16 sps:$4 sm:$0xff]  }
 0x41f   : > { %v10064_v36 = vpack.c.bf16 %v4459_v50, %v4451_v11  ;;  %v8574_v50 = vld [vmem:[#allocation8 + $0x3ec] ss:$16 sps:$4 sm:$0xff]  }
 0x420   : > { %6217 = vmatpush1.bf16.msra.mxu1 %v8440_v57  ;;  %v8500_v57 = vld [vmem:[#allocation8 + $0x268] ss:$16 sps:$4 sm:$0xff]  }
 0x421   : > { %6131 = vmatpush1.bf16.msra.mxu0 %v8437_v53  ;;  %6218 = vmatprep.subr.bf16.mxu1 %v8448_v59  ;;  %v8497_v53 = vld [vmem:[#allocation8 + $0x660] ss:$16 sps:$4 sm:$0xff]   ;;  %v8506_v59 = vld [vmem:[#allocation8 + $0x288] ss:$16 sps:$4 sm:$0xff]  }
 0x422   : > { %6132 = vmatprep.subr.bf16.mxu0 %v8445_v58  ;;  %v8505_v58 = vld [vmem:[#allocation8 + $0x684] ss:$16 sps:$4 sm:$0xff]  }
 0x424   : > { %6219 = vmatpush1.bf16.msra.mxu1 %v8446_v61  ;;  %v8514_v61 = vld [vmem:[#allocation8 + $0x2ac] ss:$16 sps:$4 sm:$0xff]  }
 0x425   : > { %6133 = vmatpush1.bf16.msra.mxu0 %v8443_v60  ;;  %6220 = vmatprep.subr.bf16.mxu1 %v8454_v0  ;;  %v8511_v60 = vld [vmem:[#allocation8 + $0x6a4] ss:$16 sps:$4 sm:$0xff]   ;;  %v8512_v0 = vld [vmem:[#allocation8 + $0x2a8] ss:$16 sps:$4 sm:$0xff]  }
 0x426   : > { %6134 = vmatprep.subr.bf16.mxu0 %v8451_v27  ;;  %v8509_v27 = vld [vmem:[#allocation8 + $0x6a0] ss:$16 sps:$4 sm:$0xff]  }
 0x428   : > { %6221 = vmatpush1.bf16.msra.mxu1 %v8452_v6  ;;  %v8520_v6 = vld [vmem:[#allocation8 + $0x2cc] ss:$16 sps:$4 sm:$0xff]  }
 0x429   : > { %6135 = vmatpush1.bf16.msra.mxu0 %v8449_v5  ;;  %6222 = vmatprep.subr.bf16.mxu1 %v8460_v8  ;;  %v8517_v5 = vld [vmem:[#allocation8 + $0x6c4] ss:$16 sps:$4 sm:$0xff]   ;;  %v8518_v8 = vld [vmem:[#allocation8 + $0x2c8] ss:$16 sps:$4 sm:$0xff]  }
 0x42a   : > { %6136 = vmatprep.subr.bf16.mxu0 %v8457_v7  ;;  %v8515_v7 = vld [vmem:[#allocation8 + $0x6c0] ss:$16 sps:$4 sm:$0xff]  }
 0x42c   : > { %6223 = vmatpush1.bf16.msra.mxu1 %v8458_v12  ;;  %v8526_v12 = vld [vmem:[#allocation8 + $0x2ec] ss:$16 sps:$4 sm:$0xff]  }
 0x42d   : > { %6137 = vmatpush1.bf16.msra.mxu0 %v8455_v9  ;;  %6224 = vmatprep.subr.bf16.mxu1 %v8466_v10  ;;  %v8523_v9 = vld [vmem:[#allocation8 + $0x6e4] ss:$16 sps:$4 sm:$0xff]   ;;  %v8524_v10 = vld [vmem:[#allocation8 + $0x2e8] ss:$16 sps:$4 sm:$0xff]  }
 0x42e   : > { %6138 = vmatprep.subr.bf16.mxu0 %v8463_v13  ;;  %v8521_v13 = vld [vmem:[#allocation8 + $0x6e0] ss:$16 sps:$4 sm:$0xff]  }
 0x430   : > { %6225 = vmatpush1.bf16.msra.mxu1 %v8464_v15  ;;  %v8532_v15 = vld [vmem:[#allocation8 + $0x30c] ss:$16 sps:$4 sm:$0xff]  }
 0x431   : > { %6139 = vmatpush1.bf16.msra.mxu0 %v8461_v14  ;;  %6226 = vmatprep.subr.bf16.mxu1 %v8472_v19  ;;  %v8529_v14 = vld [vmem:[#allocation8 + $0x704] ss:$16 sps:$4 sm:$0xff]   ;;  %v8538_v19 = vld [vmem:[#allocation8 + $0x32c] ss:$16 sps:$4 sm:$0xff]  }
 0x432   : > { %6140 = vmatprep.subr.bf16.mxu0 %v8469_v54  ;;  %v8535_v54 = vld [vmem:[#allocation8 + $0x724] ss:$16 sps:$4 sm:$0xff]  }
 0x434   : > { %6227 = vmatpush1.bf16.msra.mxu1 %v8470_v25  ;;  %v8544_v25 = vld [vmem:[#allocation8 + $0x34c] ss:$16 sps:$4 sm:$0xff]  }
 0x435   : > { %6141 = vmatpush1.bf16.msra.mxu0 %v8467_v22  ;;  %6228 = vmatprep.subr.bf16.mxu1 %v8478_v29  ;;  %v8541_v22 = vld [vmem:[#allocation8 + $0x744] ss:$16 sps:$4 sm:$0xff]   ;;  %v8542_v29 = vld [vmem:[#allocation8 + $0x348] ss:$16 sps:$4 sm:$0xff]  }
 0x436   : > { %6142 = vmatprep.subr.bf16.mxu0 %v8475_v28  ;;  %v8539_v28 = vld [vmem:[#allocation8 + $0x740] ss:$16 sps:$4 sm:$0xff]  }
 0x438   : > { %6229 = vmatpush1.bf16.msra.mxu1 %v8476_v62  ;;  %v8548_v62 = vld [vmem:[#allocation8 + $0x368] ss:$16 sps:$4 sm:$0xff]  }
 0x439   : > { %6143 = vmatpush1.bf16.msra.mxu0 %v8473_v32  ;;  %6241 = vmatprep.subr.bf16.mxu1 %v8484_v34  ;;  %v8545_v32 = vld [vmem:[#allocation8 + $0x760] ss:$16 sps:$4 sm:$0xff]   ;;  %v8556_v34 = vld [vmem:[#allocation8 + $0x38c] ss:$16 sps:$4 sm:$0xff]  }
 0x43a   : > { %6155 = vmatprep.subr.bf16.mxu0 %v8481_v33  ;;  %v8553_v33 = vld [vmem:[#allocation8 + $0x784] ss:$16 sps:$4 sm:$0xff]  }
 0x43b   : > { %6231 = vmatmul.mubr.bf16.vlgmr.msra.gmra.mrb[4].mxu1 %v10043_v1  ;;  %v8491_v1 = vld [vmem:[#allocation8 + $0x640] ss:$16 sps:$4 sm:$0xff]  }
 0x43c   : > { %6145 = vmatmul.mubr.bf16.vlgmr.msra.gmra.mrb[0].mxu0 %v10057_v35  ;;  %6242 = vmatpush1.bf16.msra.mxu1 %v8482_v37  ;;  %v8554_v37 = vld [vmem:[#allocation8 + $0x388] ss:$16 sps:$4 sm:$0xff]  }
 0x43d   : > { %6156 = vmatpush1.bf16.msra.mxu0 %v8479_v17  ;;  %6243 = vmatprep.subr.bf16.mxu1 %v8490_v41  ;;  %v8551_v17 = vld [vmem:[#allocation8 + $0x780] ss:$16 sps:$4 sm:$0xff]   ;;  %v8562_v41 = vld [vmem:[#allocation8 + $0x3ac] ss:$16 sps:$4 sm:$0xff]  }
 0x43e   : > { %6157 = vmatprep.subr.bf16.mxu0 %v8487_v40  ;;  %6273 = vmatprep.mubr.bf16.mxu1 %v10028_v3  ;;  %v8508_v3 = vld [vmem:[#allocation8 + $0x28c] ss:$16 sps:$4 sm:$0xff]   ;;  %v8559_v40 = vld [vmem:[#allocation8 + $0x7a4] ss:$16 sps:$4 sm:$0xff]  }
 0x43f   : > { %6187 = vmatprep.mubr.bf16.mxu0 %v10064_v36 }
 0x440   : > { %6244 = vmatpush1.bf16.msra.mxu1 %v8488_v43  ;;  %v8560_v43 = vld [vmem:[#allocation8 + $0x3a8] ss:$16 sps:$4 sm:$0xff]  }
 0x441   : > { %6158 = vmatpush1.bf16.msra.mxu0 %v8485_v42  ;;  %6245 = vmatprep.subr.bf16.mxu1 %v8496_v26  ;;  %v8557_v42 = vld [vmem:[#allocation8 + $0x7a0] ss:$16 sps:$4 sm:$0xff]   ;;  %v4376_v26 = vld [vmem:[#allocation2 + $0x30] sm:$0xff] }
 0x442   : > { %6159 = vmatprep.subr.bf16.mxu0 %v8493_v24  ;;  %v8568_v24 = vld [vmem:[#allocation8 + $0x3cc] ss:$16 sps:$4 sm:$0xff]   ;;  %v4434_v11 = vadd.f32 %v10041_v52, %v4376_v26 }
 0x443   : > { %v8701_v26 = vld [vmem:[#allocation11 + $0xa0] ss:$8 sps:$4 sm:$0xff]  }
 0x444   : > { %6246 = vmatpush1.bf16.msra.mxu1 %v8494_v48  ;;  %v8571_v48 = vld [vmem:[#allocation8 + $0x7e4] ss:$16 sps:$4 sm:$0xff]  }
 0x445   : > { %6160 = vmatpush1.bf16.msra.mxu0 %v8491_v1  ;;  %6247 = vmatprep.subr.bf16.mxu1 %v8502_v63  ;;  %v4442_v1 = vadd.f32 %v10041_v52, %v4384_v45  ;;  %v4450_v63 = vmax.f32 %v4434_v11, 0.0  ;;  %v8671_v52 = vld [vmem:[#allocation11] ss:$8 sps:$4 sm:$0xff]   ;;  %v8706_v45 = vld [vmem:[#allocation11 + $0xb4] ss:$8 sps:$4 sm:$0xff]  }
 0x446   : > { %6161 = vmatprep.subr.bf16.mxu0 %v8499_v51  ;;  %v8569_v51 = vld [vmem:[#allocation8 + $0x7e0] ss:$16 sps:$4 sm:$0xff]   ;;  %v8704_v11 = vld [vmem:[#allocation11 + $0xb0] ss:$8 sps:$4 sm:$0xff]  }
 0x448   : > { %6248 = vmatpush1.bf16.msra.mxu1 %v8500_v57  ;;  %v8572_v57 = vld [vmem:[#allocation8 + $0x3e8] ss:$16 sps:$4 sm:$0xff]  }
 0x449   : > { %6162 = vmatpush1.bf16.msra.mxu0 %v8497_v53  ;;  %6249 = vmatprep.subr.bf16.mxu1 %v8508_v3  ;;  %v4458_v53 = vmax.f32 %v4442_v1, 0.0  ;;  %v8575_v3 = vld [vmem:[#allocation8 + $0x408] ss:$16 sps:$4 sm:$0xff]  }
 0x44a   : > { %6163 = vmatprep.subr.bf16.mxu0 %v8505_v58  ;;  %v8577_v58 = vld [vmem:[#allocation8 + $0x40c] ss:$16 sps:$4 sm:$0xff]   ;;  %v8709_v1 = vld [vmem:[#allocation11 + $0xc4] ss:$8 sps:$4 sm:$0xff]  }
 0x44c   : > { %6250 = vmatpush1.bf16.msra.mxu1 %v8506_v59  ;;  %v8580_v59 = vld [vmem:[#allocation8 + $0x42c] ss:$16 sps:$4 sm:$0xff]  }
 0x44d   : > { %6164 = vmatpush1.bf16.msra.mxu0 %v8503_v56  ;;  %6251 = vmatprep.subr.bf16.mxu1 %v8514_v61  ;;  %v10069_v56 = vpack.c.bf16 %v4458_v53, %v4450_v63  ;;  %v8578_v61 = vld [vmem:[#allocation8 + $0x428] ss:$16 sps:$4 sm:$0xff]  }
 0x44e   : > { %6165 = vmatprep.subr.bf16.mxu0 %v8511_v60  ;;  %v8673_v60 = vld [vmem:[#allocation11 + $0x4] ss:$8 sps:$4 sm:$0xff]   ;;  %v8712_v63 = vld [vmem:[#allocation11 + $0xd4] ss:$8 sps:$4 sm:$0xff]  }
 0x44f   : > { %v8614_v53 = vld [vmem:[#allocation8 + $0x5a8] ss:$16 sps:$4 sm:$0xff]  }
 0x450   : > { %6252 = vmatpush1.bf16.msra.mxu1 %v8512_v0  ;;  %v8583_v0 = vld [vmem:[#allocation8 + $0x44c] ss:$16 sps:$4 sm:$0xff]  }
 0x451   : > { %6166 = vmatpush1.bf16.msra.mxu0 %v8509_v27  ;;  %6253 = vmatprep.subr.bf16.mxu1 %v8520_v6  ;;  %v8676_v27 = vld [vmem:[#allocation11 + $0x14] ss:$8 sps:$4 sm:$0xff]   ;;  %v8679_v6 = vld [vmem:[#allocation11 + $0x24] ss:$8 sps:$4 sm:$0xff]  }
 0x452   : > { %6167 = vmatprep.subr.bf16.mxu0 %v8517_v5  ;;  %v8674_v5 = vld [vmem:[#allocation11 + $0x10] ss:$8 sps:$4 sm:$0xff]  }
 0x454   : > { %6254 = vmatpush1.bf16.msra.mxu1 %v8518_v8  ;;  %v8586_v8 = vld [vmem:[#allocation8 + $0x46c] ss:$16 sps:$4 sm:$0xff]  }
 0x455   : > { %6168 = vmatpush1.bf16.msra.mxu0 %v8515_v7  ;;  %6255 = vmatprep.subr.bf16.mxu1 %v8526_v12  ;;  %v8581_v7 = vld [vmem:[#allocation8 + $0x448] ss:$16 sps:$4 sm:$0xff]   ;;  %v8589_v12 = vld [vmem:[#allocation8 + $0x48c] ss:$16 sps:$4 sm:$0xff]  }
 0x456   : > { %6169 = vmatprep.subr.bf16.mxu0 %v8523_v9  ;;  %v8584_v9 = vld [vmem:[#allocation8 + $0x468] ss:$16 sps:$4 sm:$0xff]  }
 0x458   : > { %6256 = vmatpush1.bf16.msra.mxu1 %v8524_v10  ;;  %v8685_v10 = vld [vmem:[#allocation11 + $0x44] ss:$8 sps:$4 sm:$0xff]  }
 0x459   : > { %6170 = vmatpush1.bf16.msra.mxu0 %v8521_v13  ;;  %6257 = vmatprep.subr.bf16.mxu1 %v8532_v15  ;;  %v8682_v13 = vld [vmem:[#allocation11 + $0x34] ss:$8 sps:$4 sm:$0xff]   ;;  %v8592_v15 = vld [vmem:[#allocation8 + $0x4ac] ss:$16 sps:$4 sm:$0xff]  }
 0x45a   : > { %6171 = vmatprep.subr.bf16.mxu0 %v8529_v14  ;;  %v8587_v14 = vld [vmem:[#allocation8 + $0x488] ss:$16 sps:$4 sm:$0xff]  }
 0x45c   : > { %6258 = vmatpush1.bf16.msra.mxu1 %v8530_v18  ;;  %v8688_v18 = vld [vmem:[#allocation11 + $0x54] ss:$8 sps:$4 sm:$0xff]  }
 0x45d   : > { %6172 = vmatpush1.bf16.msra.mxu0 %v8527_v16  ;;  %6259 = vmatprep.subr.bf16.mxu1 %v8538_v19  ;;  %v8683_v16 = vld [vmem:[#allocation11 + $0x40] ss:$8 sps:$4 sm:$0xff]  }
 0x45e   : > { %6173 = vmatprep.subr.bf16.mxu0 %v8535_v54  ;;  %v8590_v54 = vld [vmem:[#allocation8 + $0x4a8] ss:$16 sps:$4 sm:$0xff]   ;;  %v8595_v19 = vld [vmem:[#allocation8 + $0x4cc] ss:$16 sps:$4 sm:$0xff]  }
 0x460   : > { %6260 = vmatpush1.bf16.msra.mxu1 %v8536_v21  ;;  %v8691_v21 = vld [vmem:[#allocation11 + $0x64] ss:$8 sps:$4 sm:$0xff]  }
 0x461   : > { %6174 = vmatpush1.bf16.msra.mxu0 %v8533_v20  ;;  %6261 = vmatprep.subr.bf16.mxu1 %v8544_v25  ;;  %v8686_v20 = vld [vmem:[#allocation11 + $0x50] ss:$8 sps:$4 sm:$0xff]  }
 0x462   : > { %6175 = vmatprep.subr.bf16.mxu0 %v8541_v22  ;;  %v8593_v22 = vld [vmem:[#allocation8 + $0x4c8] ss:$16 sps:$4 sm:$0xff]   ;;  %v8598_v25 = vld [vmem:[#allocation8 + $0x4ec] ss:$16 sps:$4 sm:$0xff]  }
 0x464   : > { %6262 = vmatpush1.bf16.msra.mxu1 %v8542_v29  ;;  %v8694_v29 = vld [vmem:[#allocation11 + $0x74] ss:$8 sps:$4 sm:$0xff]  }
 0x465   : > { %6176 = vmatpush1.bf16.msra.mxu0 %v8539_v28  ;;  %6263 = vmatprep.subr.bf16.mxu1 %v8550_v31  ;;  %v8689_v28 = vld [vmem:[#allocation11 + $0x60] ss:$8 sps:$4 sm:$0xff]  }
 0x466   : > { %6177 = vmatprep.subr.bf16.mxu0 %v8547_v30  ;;  %v8596_v30 = vld [vmem:[#allocation8 + $0x4e8] ss:$16 sps:$4 sm:$0xff]   ;;  %v8601_v31 = vld [vmem:[#allocation8 + $0x50c] ss:$16 sps:$4 sm:$0xff]  }
 0x468   : > { %6264 = vmatpush1.bf16.msra.mxu1 %v8548_v62  ;;  %v8697_v62 = vld [vmem:[#allocation11 + $0x84] ss:$8 sps:$4 sm:$0xff]  }
 0x469   : > { %6178 = vmatpush1.bf16.msra.mxu0 %v8545_v32  ;;  %6265 = vmatprep.subr.bf16.mxu1 %v8556_v34  ;;  %v8692_v32 = vld [vmem:[#allocation11 + $0x70] ss:$8 sps:$4 sm:$0xff]  }
 0x46a   : > { %6179 = vmatprep.subr.bf16.mxu0 %v8553_v33  ;;  %v8599_v33 = vld [vmem:[#allocation8 + $0x508] ss:$16 sps:$4 sm:$0xff]   ;;  %v8604_v34 = vld [vmem:[#allocation8 + $0x52c] ss:$16 sps:$4 sm:$0xff]  }
 0x46c   : > { %6266 = vmatpush1.bf16.msra.mxu1 %v8554_v37  ;;  %v8700_v37 = vld [vmem:[#allocation11 + $0x94] ss:$8 sps:$4 sm:$0xff]  }
 0x46d   : > { %6180 = vmatpush1.bf16.msra.mxu0 %v8551_v17  ;;  %6267 = vmatprep.subr.bf16.mxu1 %v8562_v41  ;;  %v8695_v17 = vld [vmem:[#allocation11 + $0x80] ss:$8 sps:$4 sm:$0xff]  }
 0x46e   : > { %6181 = vmatprep.subr.bf16.mxu0 %v8559_v40  ;;  %v8602_v40 = vld [vmem:[#allocation8 + $0x528] ss:$16 sps:$4 sm:$0xff]   ;;  %v8607_v41 = vld [vmem:[#allocation8 + $0x54c] ss:$16 sps:$4 sm:$0xff]  }
 0x470   : > { %6268 = vmatpush1.bf16.msra.mxu1 %v8560_v43  ;;  %v8703_v43 = vld [vmem:[#allocation11 + $0xa4] ss:$8 sps:$4 sm:$0xff]  }
 0x471   : > { %6182 = vmatpush1.bf16.msra.mxu0 %v8557_v42  ;;  %6269 = vmatprep.subr.bf16.mxu1 %v8568_v24  ;;  %v8698_v42 = vld [vmem:[#allocation11 + $0x90] ss:$8 sps:$4 sm:$0xff]  }
 0x472   : > { %6183 = vmatprep.subr.bf16.mxu0 %v8565_v44  ;;  %v8605_v44 = vld [vmem:[#allocation8 + $0x548] ss:$16 sps:$4 sm:$0xff]   ;;  %v8610_v24 = vld [vmem:[#allocation8 + $0x56c] ss:$16 sps:$4 sm:$0xff]  }
 0x474   : > { %6270 = vmatpush1.bf16.msra.mxu1 %v8566_v47  ;;  %v8613_v47 = vld [vmem:[#allocation8 + $0x58c] ss:$16 sps:$4 sm:$0xff]  }
 0x475   : > { %6184 = vmatpush1.bf16.msra.mxu0 %v8563_v46  ;;  %6271 = vmatprep.subr.bf16.mxu1 %v8574_v50  ;;  %v8608_v46 = vld [vmem:[#allocation8 + $0x568] ss:$16 sps:$4 sm:$0xff]   ;;  %v8616_v50 = vld [vmem:[#allocation8 + $0x5ac] ss:$16 sps:$4 sm:$0xff]  }
 0x476   : > { %6185 = vmatprep.subr.bf16.mxu0 %v8571_v48  ;;  %v8611_v48 = vld [vmem:[#allocation8 + $0x588] ss:$16 sps:$4 sm:$0xff]  }
 0x478   : > { %6272 = vmatpush1.bf16.msra.mxu1 %v8572_v57  ;;  %v8619_v57 = vld [vmem:[#allocation8 + $0x5cc] ss:$16 sps:$4 sm:$0xff]  }
 0x479   : > { %6186 = vmatpush1.bf16.msra.mxu0 %v8569_v51  ;;  %6284 = vmatprep.subr.bf16.mxu1 %v8577_v58  ;;  %v8707_v51 = vld [vmem:[#allocation11 + $0xc0] ss:$8 sps:$4 sm:$0xff]   ;;  %v8710_v58 = vld [vmem:[#allocation11 + $0xd0] ss:$8 sps:$4 sm:$0xff]  }
 0x47a   : > { %6778 = vmatprep.subr.bf16.mxu0 %v8673_v60  ;;  %v8625_v60 = vld [vmem:[#allocation8 + $0x60c] ss:$16 sps:$4 sm:$0xff]  }
 0x47b   : > { %6274 = vmatmul.mubr.bf16.vlgmr.msra.gmra.mrb[4].mxu1 %v10045_v39  ;;  %v8677_v39 = vld [vmem:[#allocation11 + $0x20] ss:$8 sps:$4 sm:$0xff]  }
 0x47c   : > { %6188 = vmatmul.mubr.bf16.vlgmr.msra.gmra.mrb[0].mxu0 %v10069_v56  ;;  %6285 = vmatpush1.bf16.msra.mxu1 %v8575_v3  ;;  %v8617_v3 = vld [vmem:[#allocation8 + $0x5c8] ss:$16 sps:$4 sm:$0xff]  }
 0x47d   : > { %6316 = vmatprep.mubr.bf16.mxu1 %v10052_v49  ;;  %6286 = vmatprep.subr.bf16.mxu1 %v8580_v59  ;;  %v8680_v49 = vld [vmem:[#allocation11 + $0x30] ss:$8 sps:$4 sm:$0xff]  }
 0x47e   : > { %6779 = vmatpush1.bf16.msra.mxu0 %v8671_v52  ;;  %v8622_v59 = vld [vmem:[#allocation8 + $0x5ec] ss:$16 sps:$4 sm:$0xff]   ;;  %v8620_v52 = vld [vmem:[#allocation8 + $0x5e8] ss:$16 sps:$4 sm:$0xff]  }
 0x47f   : > { %6780 = vmatprep.subr.bf16.mxu0 %v8676_v27  ;;  %v8628_v27 = vld [vmem:[#allocation8 + $0x62c] ss:$16 sps:$4 sm:$0xff]  }
 0x480   : > { %6287 = vmatpush1.bf16.msra.mxu1 %v8578_v61  ;;  %v8623_v61 = vld [vmem:[#allocation8 + $0x608] ss:$16 sps:$4 sm:$0xff]  }
 0x481   : > { %6288 = vmatprep.subr.bf16.mxu1 %v8583_v0  ;;  %v8626_v0 = vld [vmem:[#allocation8 + $0x628] ss:$16 sps:$4 sm:$0xff]  }
 0x482   : > { %6781 = vmatpush1.bf16.msra.mxu0 %v8674_v5  ;;  %v8631_v5 = vld [vmem:[#allocation8 + $0x64c] ss:$16 sps:$4 sm:$0xff]  }
 0x483   : > { %6782 = vmatprep.subr.bf16.mxu0 %v8679_v6  ;;  %v8629_v6 = vld [vmem:[#allocation8 + $0x648] ss:$16 sps:$4 sm:$0xff]  }
 0x484   : > { %6289 = vmatpush1.bf16.msra.mxu1 %v8581_v7  ;;  %v8634_v7 = vld [vmem:[#allocation8 + $0x66c] ss:$16 sps:$4 sm:$0xff]  }
 0x485   : > { %6290 = vmatprep.subr.bf16.mxu1 %v8586_v8  ;;  %v8632_v8 = vld [vmem:[#allocation8 + $0x668] ss:$16 sps:$4 sm:$0xff]  }
 0x486   : > { %6783 = vmatpush1.bf16.msra.mxu0 %v8677_v39  ;;  %v8637_v39 = vld [vmem:[#allocation8 + $0x68c] ss:$16 sps:$4 sm:$0xff]  }
 0x487   : > { %6784 = vmatprep.subr.bf16.mxu0 %v8682_v13  ;;  %v8643_v13 = vld [vmem:[#allocation8 + $0x6cc] ss:$16 sps:$4 sm:$0xff]  }
 0x488   : > { %6291 = vmatpush1.bf16.msra.mxu1 %v8584_v9  ;;  %v8635_v9 = vld [vmem:[#allocation8 + $0x688] ss:$16 sps:$4 sm:$0xff]  }
 0x489   : > { %6292 = vmatprep.subr.bf16.mxu1 %v8589_v12  ;;  %v8640_v12 = vld [vmem:[#allocation8 + $0x6ac] ss:$16 sps:$4 sm:$0xff]  }
 0x48a   : > { %6785 = vmatpush1.bf16.msra.mxu0 %v8680_v49 }
 0x48b   : > { %6786 = vmatprep.subr.bf16.mxu0 %v8685_v10  ;;  %v8715_v10 = vld [vmem:[#allocation11 + $0xe4] ss:$8 sps:$4 sm:$0xff]  }
 0x48c   : > { %6293 = vmatpush1.bf16.msra.mxu1 %v8587_v14 }
 0x48d   : > { %6294 = vmatprep.subr.bf16.mxu1 %v8592_v15  ;;  %v8641_v15 = vld [vmem:[#allocation8 + $0x6c8] ss:$16 sps:$4 sm:$0xff]  }
 0x48e   : > { %6787 = vmatpush1.bf16.msra.mxu0 %v8683_v16  ;;  %v8713_v16 = vld [vmem:[#allocation11 + $0xe0] ss:$8 sps:$4 sm:$0xff]  }
 0x48f   : > { %6788 = vmatprep.subr.bf16.mxu0 %v8688_v18 }
 0x490   : > { %6295 = vmatpush1.bf16.msra.mxu1 %v8590_v54  ;;  %v8646_v54 = vld [vmem:[#allocation8 + $0x6ec] ss:$16 sps:$4 sm:$0xff]  }
 0x491   : > { %6296 = vmatprep.subr.bf16.mxu1 %v8595_v19  ;;  %v8718_v19 = vld [vmem:[#allocation11 + $0xf4] ss:$8 sps:$4 sm:$0xff]  }
 0x492   : > { %6789 = vmatpush1.bf16.msra.mxu0 %v8686_v20  ;;  %v8644_v20 = vld [vmem:[#allocation8 + $0x6e8] ss:$16 sps:$4 sm:$0xff]  }
 0x493   : > { %6790 = vmatprep.subr.bf16.mxu0 %v8691_v21  ;;  %v8716_v21 = vld [vmem:[#allocation11 + $0xf0] ss:$8 sps:$4 sm:$0xff]  }
 0x494   : > { %6297 = vmatpush1.bf16.msra.mxu1 %v8593_v22  ;;  %v8649_v22 = vld [vmem:[#allocation8 + $0x70c] ss:$16 sps:$4 sm:$0xff]  }
 0x495   : > { %6298 = vmatprep.subr.bf16.mxu1 %v8598_v25  ;;  %v8647_v25 = vld [vmem:[#allocation8 + $0x708] ss:$16 sps:$4 sm:$0xff]  }
 0x496   : > { %6791 = vmatpush1.bf16.msra.mxu0 %v8689_v28  ;;  %v8652_v28 = vld [vmem:[#allocation8 + $0x72c] ss:$16 sps:$4 sm:$0xff]  }
 0x497   : > { %6792 = vmatprep.subr.bf16.mxu0 %v8694_v29  ;;  %v8721_v29 = vld [vmem:[#allocation11 + $0x104] ss:$8 sps:$4 sm:$0xff]  }
 0x498   : > { %6299 = vmatpush1.bf16.msra.mxu1 %v8596_v30  ;;  %v8650_v30 = vld [vmem:[#allocation8 + $0x728] ss:$16 sps:$4 sm:$0xff]  }
 0x499   : > { %6300 = vmatprep.subr.bf16.mxu1 %v8601_v31  ;;  %v8655_v31 = vld [vmem:[#allocation8 + $0x74c] ss:$16 sps:$4 sm:$0xff]  }
 0x49a   : > { %6793 = vmatpush1.bf16.msra.mxu0 %v8692_v32  ;;  %v8653_v32 = vld [vmem:[#allocation8 + $0x748] ss:$16 sps:$4 sm:$0xff]  }
 0x49b   : > { %6794 = vmatprep.subr.bf16.mxu0 %v8697_v62  ;;  %v8658_v62 = vld [vmem:[#allocation8 + $0x76c] ss:$16 sps:$4 sm:$0xff]  }
 0x49c   : > { %6301 = vmatpush1.bf16.msra.mxu1 %v8599_v33  ;;  %v8656_v33 = vld [vmem:[#allocation8 + $0x768] ss:$16 sps:$4 sm:$0xff]  }
 0x49d   : > { %6302 = vmatprep.subr.bf16.mxu1 %v8604_v34  ;;  %v8661_v34 = vld [vmem:[#allocation8 + $0x78c] ss:$16 sps:$4 sm:$0xff]  }
 0x49e   : > { %6795 = vmatpush1.bf16.msra.mxu0 %v8695_v17  ;;  %v8659_v17 = vld [vmem:[#allocation8 + $0x788] ss:$16 sps:$4 sm:$0xff]  }
 0x49f   : > { %6796 = vmatprep.subr.bf16.mxu0 %v8700_v37  ;;  %v8664_v37 = vld [vmem:[#allocation8 + $0x7ac] ss:$16 sps:$4 sm:$0xff]  }
 0x4a0   : > { %6303 = vmatpush1.bf16.msra.mxu1 %v8602_v40  ;;  %v8662_v40 = vld [vmem:[#allocation8 + $0x7a8] ss:$16 sps:$4 sm:$0xff]  }
 0x4a1   : > { %6304 = vmatprep.subr.bf16.mxu1 %v8607_v41  ;;  %v8667_v41 = vld [vmem:[#allocation8 + $0x7cc] ss:$16 sps:$4 sm:$0xff]  }
 0x4a2   : > { %6797 = vmatpush1.bf16.msra.mxu0 %v8698_v42  ;;  %v8665_v42 = vld [vmem:[#allocation8 + $0x7c8] ss:$16 sps:$4 sm:$0xff]  }
 0x4a3   : > { %6798 = vmatprep.subr.bf16.mxu0 %v8703_v43  ;;  %v8670_v43 = vld [vmem:[#allocation8 + $0x7ec] ss:$16 sps:$4 sm:$0xff]  }
 0x4a4   : > { %6305 = vmatpush1.bf16.msra.mxu1 %v8605_v44  ;;  %v8668_v44 = vld [vmem:[#allocation8 + $0x7e8] ss:$16 sps:$4 sm:$0xff]  }
 0x4a5   : > { %6306 = vmatprep.subr.bf16.mxu1 %v8610_v24  ;;  %v10077_v24 = vld [vmem:[#allocation9] sm:$0xf] }
 0x4a6   : > { %6799 = vmatpush1.bf16.msra.mxu0 %v8701_v26  ;;  %v4729_v26 = vrot.slane %v10077_v24, %v10021_v55 }
 0x4a7   : > { %6800 = vmatprep.subr.bf16.mxu0 %v8706_v45  ;;  %v4733_v45 = vrot.slane %v10077_v24, %v10006_v2 }
 0x4a8   : > { %6307 = vmatpush1.bf16.msra.mxu1 %v8608_v46 }
 0x4a9   : > { %6308 = vmatprep.subr.bf16.mxu1 %v8613_v47 }
 0x4aa   : > { %6801 = vmatpush1.bf16.msra.mxu0 %v8704_v11 }
 0x4ab   : > { %6802 = vmatprep.subr.bf16.mxu0 %v8709_v1 }
 0x4ac   : > { %6309 = vmatpush1.bf16.msra.mxu1 %v8611_v48 }
 0x4ad   : > { %6310 = vmatprep.subr.bf16.mxu1 %v8616_v50 }
 0x4ae   : > { %6803 = vmatpush1.bf16.msra.mxu0 %v8707_v51 }
 0x4af   : > { %6804 = vmatprep.subr.bf16.mxu0 %v8712_v63 }
 0x4b0   : > { %6311 = vmatpush1.bf16.msra.mxu1 %v8614_v53 }
 0x4b1   : > { %6312 = vmatprep.subr.bf16.mxu1 %v8619_v57 }
 0x4b2   : > { %6805 = vmatpush1.bf16.msra.mxu0 %v8710_v58 }
 0x4b3   : > { %6806 = vmatprep.subr.bf16.mxu0 %v8715_v10  ;;  %v8773_v10 = vld [vmem:[#allocation14 + $0x58] sm:$0xff]  }
 0x4b4   : > { %6313 = vmatpush1.bf16.msra.mxu1 %v8617_v3 }
 0x4b5   : > { %6314 = vmatprep.subr.bf16.mxu1 %v8622_v59 }
 0x4b6   : > { %6807 = vmatpush1.bf16.msra.mxu0 %v8713_v16  ;;  %v8774_v16 = vld [vmem:[#allocation14 + $0x18] sm:$0xff]  }
 0x4b7   : > { %6808 = vmatprep.subr.bf16.mxu0 %v8718_v19  ;;  %v8736_v19 = vld [vmem:[#allocation11 + $0x154] ss:$8 sps:$4 sm:$0xff]  }
 0x4b8   : > { %6315 = vmatpush1.bf16.msra.mxu1 %v8620_v52 }
 0x4b9   : > { %6327 = vmatprep.subr.bf16.mxu1 %v8625_v60 }
 0x4ba   : > { %6809 = vmatpush1.bf16.msra.mxu0 %v8716_v21  ;;  %v8777_v21 = vld [vmem:[#allocation14 + $0x68] sm:$0xff]  }
 0x4bb   : > { %6317 = vmatmul.mubr.bf16.vlgmr.msra.gmra.mrb[4].mxu1 %v10057_v35  ;;  %v8638_v35 = vld [vmem:[#allocation8 + $0x6a8] ss:$16 sps:$4 sm:$0xff]   ;;  %6821 = vmatprep.subr.bf16.mxu0 %v8721_v29 }
 0x4bc   : > { %6328 = vmatpush1.bf16.msra.mxu1 %v8623_v61  ;;  %6359 = vmatprep.mubr.bf16.mxu1 %v10064_v36  ;;  %v8742_v29 = vld [vmem:[#allocation11 + $0x174] ss:$8 sps:$4 sm:$0xff]  }
 0x4bd   : > { %6329 = vmatprep.subr.bf16.mxu1 %v8628_v27 }
 0x4c0   : > { %6330 = vmatpush1.bf16.msra.mxu1 %v8626_v0  ;;  %v8719_v0 = vld [vmem:[#allocation11 + $0x100] ss:$8 sps:$4 sm:$0xff]  }
 0x4c1   : > { %6331 = vmatprep.subr.bf16.mxu1 %v8631_v5  ;;  %v8724_v5 = vld [vmem:[#allocation11 + $0x114] ss:$8 sps:$4 sm:$0xff]  }
 0x4c4   : > { %6332 = vmatpush1.bf16.msra.mxu1 %v8629_v6  ;;  %v8767_v6 = vld [vmem:[#allocation14 + $0x40] sm:$0xff]  }
 0x4c5   : > { %6333 = vmatprep.subr.bf16.mxu1 %v8634_v7  ;;  %v8768_v7 = vld [vmem:[#allocation14] sm:$0xff]  }
 0x4c8   : > { %6334 = vmatpush1.bf16.msra.mxu1 %v8632_v8  ;;  %v8769_v8 = vld [vmem:[#allocation14 + $0x48] sm:$0xff]  }
 0x4c9   : > { %6335 = vmatprep.subr.bf16.mxu1 %v8637_v39  ;;  %v8722_v39 = vld [vmem:[#allocation11 + $0x110] ss:$8 sps:$4 sm:$0xff]  }
 0x4cc   : > { %6336 = vmatpush1.bf16.msra.mxu1 %v8635_v9  ;;  %v8727_v9 = vld [vmem:[#allocation11 + $0x124] ss:$8 sps:$4 sm:$0xff]  }
 0x4cd   : > { %6337 = vmatprep.subr.bf16.mxu1 %v8640_v12  ;;  %v8770_v12 = vld [vmem:[#allocation14 + $0x8] sm:$0xff]  }
 0x4ce   : > { %v6060_v49 = vpop.f32.mrb[0].mxu1 }
 0x4cf   : > { %v6062_v36 = vpop.f32.mrb[1].mxu1  ;;  %v6061_v46 = vadd.f32 %v6060_v49, %v4729_v26  ;;  %v8730_v49 = vld [vmem:[#allocation11 + $0x134] ss:$8 sps:$4 sm:$0xff]  }
 0x4d0   : > { %v6064_v14 = vpop.f32.mrb[2].mxu1  ;;  %6338 = vmatpush1.bf16.msra.mxu1 %v8638_v35  ;;  %v6063_v47 = vadd.f32 %v6062_v36, %v4733_v45  ;;  %v8771_v35 = vld [vmem:[#allocation14 + $0x50] sm:$0xff]  }
 0x4d1   : > { %v6066_v18 = vpop.f32.mrb[3].mxu1  ;;  %6339 = vmatprep.subr.bf16.mxu1 %v8643_v13  ;;  %v6065_v1 = vadd.f32 %v6064_v14, %v4729_v26  ;;  %v8725_v13 = vld [vmem:[#allocation11 + $0x120] ss:$8 sps:$4 sm:$0xff]   ;;  %v8772_v36 = vld [vmem:[#allocation14 + $0x10] sm:$0xff]   ;;  %v8763_v26 = vld [vmem:[#allocation11 + $0x1e4] ss:$8 sps:$4 sm:$0xff]  }
 0x4d2   : > { %v6067_v51 = vadd.f32 %v6066_v18, %v4733_v45  ;;  %v8728_v14 = vld [vmem:[#allocation11 + $0x130] ss:$8 sps:$4 sm:$0xff]   ;;  %v8775_v18 = vld [vmem:[#allocation14 + $0x60] sm:$0xff]  }
 0x4d3   : > { %v8761_v45 = vld [vmem:[#allocation11 + $0x1e0] ss:$8 sps:$4 sm:$0xff]  }
 0x4d4   : > { %6340 = vmatpush1.bf16.msra.mxu1 %v8641_v15  ;;  %v8733_v15 = vld [vmem:[#allocation11 + $0x144] ss:$8 sps:$4 sm:$0xff]  }
 0x4d5   : > { %6341 = vmatprep.subr.bf16.mxu1 %v8646_v54  ;;  %v8731_v54 = vld [vmem:[#allocation11 + $0x140] ss:$8 sps:$4 sm:$0xff]  }
 0x4d8   : > { %6342 = vmatpush1.bf16.msra.mxu1 %v8644_v20  ;;  %v8776_v20 = vld [vmem:[#allocation14 + $0x20] sm:$0xff]  }
 0x4d9   : > { %6343 = vmatprep.subr.bf16.mxu1 %v8649_v22  ;;  %v8734_v22 = vld [vmem:[#allocation11 + $0x150] ss:$8 sps:$4 sm:$0xff]  }
 0x4dc   : > { %6344 = vmatpush1.bf16.msra.mxu1 %v8647_v25  ;;  %v8739_v25 = vld [vmem:[#allocation11 + $0x164] ss:$8 sps:$4 sm:$0xff]  }
 0x4dd   : > { %6345 = vmatprep.subr.bf16.mxu1 %v8652_v28  ;;  %v8737_v28 = vld [vmem:[#allocation11 + $0x160] ss:$8 sps:$4 sm:$0xff]  }
 0x4e0   : > { %6346 = vmatpush1.bf16.msra.mxu1 %v8650_v30  ;;  %v8740_v30 = vld [vmem:[#allocation11 + $0x170] ss:$8 sps:$4 sm:$0xff]  }
 0x4e1   : > { %6347 = vmatprep.subr.bf16.mxu1 %v8655_v31  ;;  %v8745_v31 = vld [vmem:[#allocation11 + $0x184] ss:$8 sps:$4 sm:$0xff]  }
 0x4e4   : > { %6348 = vmatpush1.bf16.msra.mxu1 %v8653_v32  ;;  %v8743_v32 = vld [vmem:[#allocation11 + $0x180] ss:$8 sps:$4 sm:$0xff]  }
 0x4e5   : > { %6349 = vmatprep.subr.bf16.mxu1 %v8658_v62  ;;  %v8748_v62 = vld [vmem:[#allocation11 + $0x194] ss:$8 sps:$4 sm:$0xff]  }
 0x4e8   : > { %6350 = vmatpush1.bf16.msra.mxu1 %v8656_v33  ;;  %v8746_v33 = vld [vmem:[#allocation11 + $0x190] ss:$8 sps:$4 sm:$0xff]  }
 0x4e9   : > { %6351 = vmatprep.subr.bf16.mxu1 %v8661_v34  ;;  %v8751_v34 = vld [vmem:[#allocation11 + $0x1a4] ss:$8 sps:$4 sm:$0xff]  }
 0x4ec   : > { %6352 = vmatpush1.bf16.msra.mxu1 %v8659_v17  ;;  %v8749_v17 = vld [vmem:[#allocation11 + $0x1a0] ss:$8 sps:$4 sm:$0xff]  }
 0x4ed   : > { %6353 = vmatprep.subr.bf16.mxu1 %v8664_v37  ;;  %v8754_v37 = vld [vmem:[#allocation11 + $0x1b4] ss:$8 sps:$4 sm:$0xff]  }
 0x4f0   : > { %6354 = vmatpush1.bf16.msra.mxu1 %v8662_v40  ;;  %v8752_v40 = vld [vmem:[#allocation11 + $0x1b0] ss:$8 sps:$4 sm:$0xff]  }
 0x4f1   : > { %6355 = vmatprep.subr.bf16.mxu1 %v8667_v41  ;;  %v8757_v41 = vld [vmem:[#allocation11 + $0x1c4] ss:$8 sps:$4 sm:$0xff]  }
 0x4f4   : > { %6356 = vmatpush1.bf16.msra.mxu1 %v8665_v42  ;;  %v8755_v42 = vld [vmem:[#allocation11 + $0x1c0] ss:$8 sps:$4 sm:$0xff]  }
 0x4f5   : > { %6357 = vmatprep.subr.bf16.mxu1 %v8670_v43  ;;  %v8760_v43 = vld [vmem:[#allocation11 + $0x1d4] ss:$8 sps:$4 sm:$0xff]  }
 0x4f8   : > { %6358 = vmatpush1.bf16.msra.mxu1 %v8668_v44  ;;  %v8758_v44 = vld [vmem:[#allocation11 + $0x1d0] ss:$8 sps:$4 sm:$0xff]  }
 0x4f9   : > { %8063 = vmatprep.subr.bf16.mxu1 %v8767_v6 }
 0x4fb   : > { %6360 = vmatmul.mubr.bf16.vlgmr.msra.gmra.mrb[4].mxu1 %v10069_v56 }
 0x4fc   : > { %8064 = vmatpush3.bf16.msra.mxu1 %v8768_v7 }
 0x4fd   : > { %8065 = vmatprep.subr.bf16.mxu1 %v8769_v8 }
 0x500   : > { %8066 = vmatpush3.bf16.msra.mxu1 %v8770_v12 }
 0x501   : > { %8067 = vmatprep.subr.bf16.mxu1 %v8771_v35 }
 0x504   : > { %8068 = vmatpush3.bf16.msra.mxu1 %v8772_v36 }
 0x505   : > { %8069 = vmatprep.subr.bf16.mxu1 %v8773_v10 }
 0x508   : > { %8070 = vmatpush3.bf16.msra.mxu1 %v8774_v16 }
 0x509   : > { %8071 = vmatprep.subr.bf16.mxu1 %v8775_v18 }
 0x50c   : > { %8072 = vmatpush3.bf16.msra.mxu1 %v8776_v20 }
 0x50d   : > { %8073 = vmatprep.subr.bf16.mxu1 %v8777_v21 }
 0x54f   : > { %v6189_v11 = vpop.f32.mrb[0].mxu0 }
 0x550   : > { %v8134_v48 = vadd.f32 %v6189_v11, %v6061_v46  ;;  %v6191_v50 = vpop.f32.mrb[1].mxu0  ;;  %v8766_v46 = vld [vmem:[#allocation11 + $0x1f4] ss:$8 sps:$4 sm:$0xff]   ;;  %v4737_v11 = vrot.slane %v10077_v24, %v4398_v23  ;;  %v8778_v23 = vld [vmem:[#allocation14 + $0x28] sm:$0xff]  }
 0x551   : > { %v8136_v63 = vadd.f32 %v6191_v50, %v6063_v47  ;;  %v6193_v53 = vpop.f32.mrb[2].mxu0  ;;  %v8764_v47 = vld [vmem:[#allocation11 + $0x1f0] ss:$8 sps:$4 sm:$0xff]   ;;  %8074 = vmatpush3.bf16.msra.mxu1 %v8778_v23 }
 0x552   : > { %v8138_v57 = vadd.f32 %v6193_v53, %v6065_v1  ;;  %v6195_v58 = vpop.f32.mrb[3].mxu0  ;;  %v6370_v3 = vmax.f32 %v8134_v48, 0.0  ;;  %v4741_v1 = vrot.slane %v10077_v24, %v4402_v4  ;;  %v8780_v4 = vld [vmem:[#allocation14 + $0x30] sm:$0xff]   ;;  %8075 = vmatprep.subr.bf16.mxu1 %v8779_v38  ;;  %v8781_v24 = vld [vmem:[#allocation14 + $0x78] sm:$0xff]  }
 0x553   : > { %v8140_v56 = vadd.f32 %v6195_v58, %v6067_v51  ;;  %v6371_v52 = vmax.f32 %v8136_v63, 0.0 }
 0x554   : > { %v6374_v59 = vmax.f32 %v8138_v57, 0.0 }
 0x555   : > { %v6375_v60 = vmax.f32 %v8140_v56, 0.0  ;;  %8076 = vmatpush3.bf16.msra.mxu1 %v8780_v4 }
 0x556   : > { %v6378_v61 = vpack.c.bf16 %v6374_v59, %v6370_v3  ;;  %8077 = vmatprep.subr.bf16.mxu1 %v8781_v24 }
 0x557   : > { %v6379_v27 = vpack.c.bf16 %v6375_v60, %v6371_v52 }
 0x559   : > { %6810 = vmatprep.mubr.bf16.mxu0 %v6379_v27 }
 0x55a   : > { %6811 = vmatmul.mubr.bf16.vlgmr.msra.gmra.mrb[4].mxu0 %v6378_v61 }
 0x55b   : > { %6822 = vmatpush1.bf16.msra.mxu0 %v8719_v0  ;;  %v8782_v0 = vld [vmem:[#allocation14 + $0x38] sm:$0xff]  }
 0x55c   : > { %6823 = vmatprep.subr.bf16.mxu0 %v8724_v5  ;;  %8078 = vmatpush3.bf16.msra.mxu1 %v8782_v0  ;;  %v6446_v5 = vld [vmem:[#allocation12] sm:$0x3] }
 0x55d   : > { %v6451_v6 = vrot.slane %v6446_v5, %v10021_v55  ;;  %v6455_v7 = vrot.slane %v6446_v5, %v10006_v2  ;;  %v8041_v55 = vld [vmem:[#allocation15] ss:$0 sm:$0xff] }
 0x55f   : > { %6824 = vmatpush1.bf16.msra.mxu0 %v8722_v39 }
 0x560   : > { %6825 = vmatprep.subr.bf16.mxu0 %v8727_v9 }
 0x563   : > { %6826 = vmatpush1.bf16.msra.mxu0 %v8725_v13 }
 0x564   : > { %6827 = vmatprep.subr.bf16.mxu0 %v8730_v49 }
 0x567   : > { %6828 = vmatpush1.bf16.msra.mxu0 %v8728_v14 }
 0x568   : > { %6829 = vmatprep.subr.bf16.mxu0 %v8733_v15 }
 0x56b   : > { %6830 = vmatpush1.bf16.msra.mxu0 %v8731_v54 }
 0x56c   : > { %6831 = vmatprep.subr.bf16.mxu0 %v8736_v19 }
 0x56f   : > { %6832 = vmatpush1.bf16.msra.mxu0 %v8734_v22 }
 0x570   : > { %6833 = vmatprep.subr.bf16.mxu0 %v8739_v25 }
 0x573   : > { %6834 = vmatpush1.bf16.msra.mxu0 %v8737_v28 }
 0x574   : > { %6835 = vmatprep.subr.bf16.mxu0 %v8742_v29 }
 0x577   : > { %6836 = vmatpush1.bf16.msra.mxu0 %v8740_v30 }
 0x578   : > { %6837 = vmatprep.subr.bf16.mxu0 %v8745_v31 }
 0x57b   : > { %6838 = vmatpush1.bf16.msra.mxu0 %v8743_v32 }
 0x57c   : > { %6839 = vmatprep.subr.bf16.mxu0 %v8748_v62 }
 0x57f   : > { %6840 = vmatpush1.bf16.msra.mxu0 %v8746_v33 }
 0x580   : > { %6841 = vmatprep.subr.bf16.mxu0 %v8751_v34 }
 0x583   : > { %6842 = vmatpush1.bf16.msra.mxu0 %v8749_v17 }
 0x584   : > { %6843 = vmatprep.subr.bf16.mxu0 %v8754_v37 }
 0x587   : > { %6844 = vmatpush1.bf16.msra.mxu0 %v8752_v40 }
 0x588   : > { %6845 = vmatprep.subr.bf16.mxu0 %v8757_v41 }
 0x58b   : > { %6846 = vmatpush1.bf16.msra.mxu0 %v8755_v42 }
 0x58c   : > { %6847 = vmatprep.subr.bf16.mxu0 %v8760_v43 }
 0x58f   : > { %6848 = vmatpush1.bf16.msra.mxu0 %v8758_v44 }
 0x590   : > { %6849 = vmatprep.subr.bf16.mxu0 %v8763_v26 }
 0x593   : > { %6850 = vmatpush1.bf16.msra.mxu0 %v8761_v45 }
 0x594   : > { %6851 = vmatprep.subr.bf16.mxu0 %v8766_v46 }
 0x597   : > { %6852 = vmatpush1.bf16.msra.mxu0 %v8764_v47 }
 0x5ce   : > { %v6361_v48 = vpop.f32.mrb[4].mxu1 }
 0x5cf   : > { %v8141_v50 = vadd.f32 %v6361_v48, %v4737_v11  ;;  %v6363_v51 = vpop.f32.mrb[5].mxu1 }
 0x5d0   : > { %v8142_v63 = vadd.f32 %v6363_v51, %v4741_v1  ;;  %v6365_v53 = vpop.f32.mrb[6].mxu1 }
 0x5d1   : > { %v8143_v57 = vadd.f32 %v6365_v53, %v4737_v11  ;;  %v6367_v58 = vpop.f32.mrb[7].mxu1  ;;  %v6372_v3 = vmax.f32 %v8141_v50, 0.0 }
 0x5d2   : > { %v8144_v56 = vadd.f32 %v6367_v58, %v4741_v1  ;;  %v6373_v52 = vmax.f32 %v8142_v63, 0.0 }
 0x5d3   : > { %v6376_v59 = vmax.f32 %v8143_v57, 0.0 }
 0x5d4   : > { %v6377_v60 = vmax.f32 %v8144_v56, 0.0 }
 0x5d5   : > { %v6380_v61 = vpack.c.bf16 %v6376_v59, %v6372_v3 }
 0x5d6   : > { %v6381_v27 = vpack.c.bf16 %v6377_v60, %v6373_v52 }
 0x5d8   : > { %6853 = vmatprep.mubr.bf16.mxu0 %v6381_v27 }
 0x5d9   : > { %6854 = vmatmul.mubr.bf16.vlgmr.msra.gmra.mrb[4].mxu0 %v6380_v61 }
 0x6ac   : > { %v6855_v8 = vpop.f32.mrb[4].mxu0 }
 0x6ad   : > { %v8145_v39 = vadd.f32 %v6855_v8, %v6451_v6  ;;  %v6857_v9 = vpop.f32.mrb[5].mxu0 }
 0x6ae   : > { %v8146_v12 = vadd.f32 %v6857_v9, %v6455_v7  ;;  %v6859_v35 = vpop.f32.mrb[6].mxu0 }
 0x6af   : > { %v8147_v13 = vadd.f32 %v6859_v35, %v6451_v6  ;;  %v6861_v49 = vpop.f32.mrb[7].mxu0  ;;  %v6864_v10 = vmax.f32 %v8145_v39, 0.0 }
 0x6b0   : > { %v8148_v36 = vadd.f32 %v6861_v49, %v6455_v7  ;;  %v6865_v15 = vmax.f32 %v8146_v12, 0.0 }
 0x6b1   : > { %v6866_v14 = vmax.f32 %v8147_v13, 0.0 }
 0x6b2   : > { %v6867_v16 = vmax.f32 %v8148_v36, 0.0 }
 0x6b3   : > { %v6868_v18 = vpack.c.bf16 %v6866_v14, %v6864_v10 }
 0x6b4   : > { %v6869_v54 = vpack.c.bf16 %v6867_v16, %v6865_v15 }
 0x6b6   : > { %7037 = vmatprep.mubr.bf16.mxu1 %v6869_v54 }
 0x6b7   : > { %7038 = vmatmul.mubr.bf16.vlgmr.msra.gmra.mrb[8].mxu1 %v6868_v18 }
 0x78a   : > { %v8079_v19 = vpop.f32.mrb[8].mxu1 }
 0x78b   : > { %v8080_v20 = vpop.f32.mrb[9].mxu1 }
 0x78c   : > { %v8081_v2 = vadd.f32 %v8080_v20, %v8079_v19  ;;  %v8082_v21 = vpop.f32.mrb[10].mxu1 }
 0x78d   : > { %v8083_v22 = vpop.f32.mrb[11].mxu1 }
 0x78e   : > { %v7040_v25 = vadd.f32 %v8081_v2, %v8041_v55  ;;  %v8084_v28 = vadd.f32 %v8083_v22, %v8082_v21 }
 0x790   : > { %7046 = vst [vmem:[%s10119_s9] sm:$0xff] %v7040_v25  ;;  %v7043_v29 = vadd.f32 %v8084_v28, %v8041_v55 }
 0x792   : > { %7047 = vst [vmem:[%s10119_s9 + $0x8] sm:$0xff] %v7043_v29 }
 0x793 PF: > { %s10150_s12 = sld [smem:[#allocation22_spill]]  ;;  %s10151_s15 = sld [smem:[#allocation23_spill]] }
 0x794   : > { %s10152_s30 = smov %s9049_s10  ;;  %s10153_s10 = smov %s9053_s11 }
 0x799   : > { %p23_p5 = scmp.ge.s32.totalorder %s10150_s12, 10   ;;  %s10154_s11 = smov %s10151_s15 }
 0x79b   :  { %25 = sbr.rel (!%p23_p5) target bundleno = 10 (0xa), region = 159 }
 0x7a2   :  { %7059 = vsyncpa [#allocation5], 1 }
 0x7a3   :  { %7061 = vsyncpa [#allocation5 + $0x1], 1 }
 0x7a4   :  { %7062 = vsyncpa [#allocation7], 1 }
 0x7a5   :  { %7063 = vsyncpa [#allocation10], 1 }
 0x7a6   :  { %7064 = vsyncpa [#allocation13], 1 }
 0x7a7   :  { %7065 = vsyncpa [#allocation16], 1 }

</bundles_post_ra>
